<compile_context>
chip_gen: v7x
topology: tpu7x:2x2x1
jax: 0.10.0
libtpu: 0.0.40
codegen_flags: <defaults>
</compile_context>

<pallas_src>
import numpy as np
import jax
import jax.numpy as jnp
from jax.experimental import pallas as pl
from jax.experimental.pallas import tpu as pltpu

NEG_SLOPE = 0.01              # PyTorch nn.LeakyReLU default
IMG = 32                      # input H = W
CIN, C1, C2 = 3, 6, 16        # channels
KH, KW = 5, 5                 # conv kernel
OW1 = IMG - KW + 1            # 28  conv1 output H/W
PW1 = OW1 // 2                # 14  pool1 output H/W
OW2 = PW1 - KW + 1            # 10  conv2 output H/W
PW2 = OW2 // 2                # 5   pool2 output H/W
N1, N2, N3 = 120, 84, 10      # fc sizes
LANES = 128

BBLK = 8                      # images per grid step
RBLK = IMG * BBLK             # 256 input rows per block (row = b*32 + h)
R1 = RBLK - (KH - 1)          # 252 conv1 rows computed
R2 = (R1 - 1) - 2 * (KH - 1)  # 243 conv2 rows computed (reads p1 rows +0..+8)
RP2 = R2 - 2                  # 241 pooled-2 rows (valid at rows b*32 + 4*Y2)


def _lrelu(v):
    return jnp.where(v > 0, v, NEG_SLOPE * v)


# ---------------------------------------------------------------------------
# Fused kernel: conv1+pool1+conv2+pool2+compact+fc1+fc2+fc3 for one batch block
# ---------------------------------------------------------------------------
def _lenet_kernel(x_ref, m1_ref, m2_ref, fcm_ref, sel_ref, w2_ref, w3_ref,
                  bc1_ref, bc2_ref, bf1_ref, bf2_ref, bf3_ref,
                  o_ref, p1_ref):
    bf16 = jnp.bfloat16
    f32 = jnp.float32

    # ---- conv1: 5 row taps fused along K, even|odd x in the two lane halves --
    xcat = jnp.concatenate(
        [x_ref[pl.ds(i, R1), :] for i in range(KH)], axis=1).astype(bf16)
    z1 = jnp.dot(xcat, m1_ref[...], preferred_element_type=f32)      # (R1, 256)

    # 2x2/2 maxpool: columns = aligned half max, rows = sublane-shifted max.
    c1 = jnp.maximum(z1[:, :LANES], z1[:, LANES:])                   # (R1, 128)
    p1 = jnp.maximum(c1[:R1 - 1, :], c1[1:, :])                      # (R1-1, 128)
    # valid at rows b*32 + 2*Y, lanes c*14 + X (compact pooled columns)
    p1_ref[...] = _lrelu(p1 + bc1_ref[...])

    # ---- conv2: 5 row taps at row-stride 2, fused along K ---------------------
    pcat = jnp.concatenate(
        [p1_ref[pl.ds(2 * i, R2), :] for i in range(KH)], axis=1).astype(bf16)
    z2 = jnp.dot(pcat, m2_ref[...], preferred_element_type=f32)      # (R2, 256)
    c2 = jnp.maximum(z2[:, :LANES], z2[:, LANES:])                   # (R2, 128)
    # valid at rows b*32 + 4*Y2, lanes o2*5 + X2
    p2 = _lrelu(jnp.maximum(c2[:RP2, :], c2[2:, :]) + bc2_ref[...])  # (RP2, 128)

    # ---- compact the batch rows (selection matmul) then fc1 / fc2 / fc3 -------
    pc = jnp.dot(sel_ref[...], p2.astype(bf16),
                 preferred_element_type=f32).astype(bf16)            # (5*BBLK, 128)
    y = jnp.dot(pc[:BBLK, :], fcm_ref[0], preferred_element_type=f32)
    for t in range(1, PW2):
        y = y + jnp.dot(pc[t * BBLK:(t + 1) * BBLK, :], fcm_ref[t],
                        preferred_element_type=f32)
    y = _lrelu(y + bf1_ref[...])                                      # (BBLK, 128)
    y = _lrelu(jnp.dot(y.astype(bf16), w2_ref[...],
                       preferred_element_type=f32) + bf2_ref[...])    # (BBLK, 128)
    # fc3 kept in f32; single contiguous (BBLK, 10) store
    o_ref[...] = (jnp.dot(y, w3_ref[...], preferred_element_type=f32)
                  + bf3_ref[...])


def _resident_spec(shape):
    nd = len(shape)
    return pl.BlockSpec(shape, lambda i, _nd=nd: (0,) * _nd)


def forward(x, prep):
    B = x.shape[0]
    nblk = (B + BBLK - 1) // BBLK
    Bp = nblk * BBLK
    # NCHW -> rows b*32 + h, cols c*32 + w; pad lanes to 128 and the batch up
    # to a multiple of BBLK (padded images are computed and discarded).
    x2d = x.transpose(0, 2, 1, 3).reshape(B * IMG, CIN * IMG)
    x2d = jnp.pad(x2d, ((0, (Bp - B) * IMG), (0, LANES - CIN * IMG)))

    weights = (prep["m1"], prep["m2"], prep["fcm"], prep["sel"],
               prep["w2"], prep["w3"],
               prep["bc1"], prep["bc2"], prep["bf1"], prep["bf2"], prep["bf3"])

    out = pl.pallas_call(
        _lenet_kernel,
        out_shape=jax.ShapeDtypeStruct((Bp, N3), jnp.float32),
        grid=(nblk,),
        in_specs=[pl.BlockSpec((RBLK, LANES), lambda i: (i, 0))]
                 + [_resident_spec(w.shape) for w in weights],
        out_specs=pl.BlockSpec((BBLK, N3), lambda i: (i, 0)),
        scratch_shapes=[pltpu.VMEM((R1 - 1, LANES), jnp.float32)],
        compiler_params=pltpu.CompilerParams(
            dimension_semantics=("parallel",)),
    )(x2d, *weights)
    return out[:B]


# ---------------------------------------------------------------------------
# One-time weight preparation (banded fused-tap conv matrices, folded flatten)
# ---------------------------------------------------------------------------
def prepare_params(p):
    w1 = np.asarray(p["w1"], np.float32); b1 = np.asarray(p["b1"], np.float32)
    w2 = np.asarray(p["w2"], np.float32); b2 = np.asarray(p["b2"], np.float32)
    fc1w = np.asarray(p["fc1w"], np.float32); fc1b = np.asarray(p["fc1b"], np.float32)
    fc2w = np.asarray(p["fc2w"], np.float32); fc2b = np.asarray(p["fc2b"], np.float32)
    fc3w = np.asarray(p["fc3w"], np.float32); fc3b = np.asarray(p["fc3b"], np.float32)

    # conv1: K = 5 slabs of 128 (tap i -> lanes c*32 + w of the row-i window),
    # N = 256: even output cols (x=2X) in lanes [0,128), odd (x=2X+1) in [128,256).
    X1 = np.arange(PW1)
    m1 = np.zeros((KH * LANES, 2 * LANES), np.float32)
    for i in range(KH):
        for c in range(CIN):
            for j in range(KW):
                for o in range(C1):
                    m1[i * LANES + c * IMG + 2 * X1 + j, o * PW1 + X1] = w1[o, c, i, j]
                    m1[i * LANES + c * IMG + 2 * X1 + 1 + j,
                       LANES + o * PW1 + X1] = w1[o, c, i, j]

    # conv2: input lanes are the compact pooled columns c*14 + X; same even/odd
    # output-column split.  Row-pool stride 2 stays folded into the tap offsets.
    X2 = np.arange(PW2)
    m2 = np.zeros((KH * LANES, 2 * LANES), np.float32)
    for i in range(KH):
        for c in range(C1):
            for j in range(KW):
                for o in range(C2):
                    m2[i * LANES + c * PW1 + 2 * X2 + j, o * PW2 + X2] = w2[o, c, i, j]
                    m2[i * LANES + c * PW1 + 2 * X2 + 1 + j,
                       LANES + o * PW2 + X2] = w2[o, c, i, j]

    # fc1 per-Y2 tap matrices with the torch NCHW flatten (f = o*25 + Y*5 + X)
    # folded in; K = compact p2 lanes (o*5 + X), padded to 128; N padded to 128.
    fcm = np.zeros((PW2, LANES, LANES), np.float32)
    for Y in range(PW2):
        for o in range(C2):
            for X in range(PW2):
                fcm[Y, o * PW2 + X, :N1] = fc1w[:, o * PW2 * PW2 + Y * PW2 + X]

    # selection matrix: row Y*BBLK + b picks pooled-2 row 32*b + 4*Y
    sel = np.zeros((PW2 * BBLK, RP2), np.float32)
    for Y in range(PW2):
        for b in range(BBLK):
            sel[Y * BBLK + b, IMG * b + 4 * Y] = 1.0

    w2p = np.zeros((LANES, LANES), np.float32); w2p[:N1, :N2] = fc2w.T
    w3p = np.zeros((LANES, N3), np.float32);    w3p[:N2, :] = fc3w.T

    bc1 = np.zeros((1, LANES), np.float32); bc1[0, :C1 * PW1] = np.repeat(b1, PW1)
    bc2 = np.zeros((1, LANES), np.float32); bc2[0, :C2 * PW2] = np.repeat(b2, PW2)
    bf1 = np.zeros((1, LANES), np.float32); bf1[0, :N1] = fc1b
    bf2 = np.zeros((1, LANES), np.float32); bf2[0, :N2] = fc2b

    bf16 = jnp.bfloat16
    return {
        "m1": jnp.asarray(m1, bf16), "m2": jnp.asarray(m2, bf16),
        "fcm": jnp.asarray(fcm, bf16), "sel": jnp.asarray(sel, bf16),
        "w2": jnp.asarray(w2p, bf16), "w3": jnp.asarray(w3p),   # fc3 stays f32
        "bc1": jnp.asarray(bc1), "bc2": jnp.asarray(bc2),
        "bf1": jnp.asarray(bf1), "bf2": jnp.asarray(bf2),
        "bf3": jnp.asarray(fc3b.reshape(1, N3)),
    }


# ---------------------------------------------------------------------------
# Pure-JAX reference (torch-convention params) for verification
# ---------------------------------------------------------------------------
def reference(x, p):
    def lrelu(v):
        return jnp.where(v > 0, v, NEG_SLOPE * v)

    def conv(x, w, b):
        y = jax.lax.conv_general_dilated(
            x, w, (1, 1), "VALID", dimension_numbers=("NCHW", "OIHW", "NCHW"))
        return y + b.reshape(1, -1, 1, 1)

    def pool(x):
        return jax.lax.reduce_window(
            x, -jnp.inf, jax.lax.max, (1, 1, 2, 2), (1, 1, 2, 2), "VALID")

    x = pool(lrelu(conv(x, p["w1"], p["b1"])))
    x = pool(lrelu(conv(x, p["w2"], p["b2"])))
    x = x.reshape(x.shape[0], -1)
    x = lrelu(x @ p["fc1w"].T + p["fc1b"])
    x = lrelu(x @ p["fc2w"].T + p["fc2b"])
    return x @ p["fc3w"].T + p["fc3b"]


def init_params(key):
    ks = jax.random.split(key, 10)

    def u(k, shape, fan_in):
        bound = 1.0 / np.sqrt(fan_in)
        return jax.random.uniform(k, shape, jnp.float32, -bound, bound)

    # PyTorch-convention shapes: conv OIHW, linear (out, in)
    return {
        "w1": u(ks[0], (6, 3, 5, 5), 3 * 25), "b1": u(ks[1], (6,), 3 * 25),
        "w2": u(ks[2], (16, 6, 5, 5), 6 * 25), "b2": u(ks[3], (16,), 6 * 25),
        "fc1w": u(ks[4], (120, 400), 400), "fc1b": u(ks[5], (120,), 400),
        "fc2w": u(ks[6], (84, 120), 120), "fc2b": u(ks[7], (84,), 120),
        "fc3w": u(ks[8], (10, 84), 84), "fc3b": u(ks[9], (10,), 84),
    }


if __name__ == "__main__":
    key = jax.random.PRNGKey(0)
    kx, kp = jax.random.split(key)
    # LeNet-style input: batch=2, 3 channels, 32x32 (flatten gives 16*5*5 = 400)
    x = jax.random.normal(kx, (2, 3, 32, 32), jnp.float32)
    params = init_params(kp)
    prep = prepare_params(params)   # one-time weight transform (off the hot path)

    out = jax.block_until_ready(jax.jit(forward)(x, prep))
    ref = jax.block_until_ready(reference(x, params))

    assert out.shape == (2, 10), out.shape
    err = float(jnp.max(jnp.abs(out - ref)))
    # bf16 matmul weights (f32 accumulation) -> tolerance loosened vs the f32 ref
    assert jnp.allclose(out, ref, rtol=3e-2, atol=3e-2), err
    print("KERNEL_OK")
</pallas_src>

<mosaic_0001>
module attributes {stable_mosaic.version = 11 : i64} {
  func.func @_lenet_kernel(%arg0: i32, %arg1: memref<256x128xf32, #tpu.memory_space<vmem>>, %arg2: memref<640x256xbf16, #tpu.memory_space<vmem>>, %arg3: memref<640x256xbf16, #tpu.memory_space<vmem>>, %arg4: memref<5x128x128xbf16, #tpu.memory_space<vmem>>, %arg5: memref<40x241xbf16, #tpu.memory_space<vmem>>, %arg6: memref<128x128xbf16, #tpu.memory_space<vmem>>, %arg7: memref<128x10xf32, #tpu.memory_space<vmem>>, %arg8: memref<1x128xf32, #tpu.memory_space<vmem>>, %arg9: memref<1x128xf32, #tpu.memory_space<vmem>>, %arg10: memref<1x128xf32, #tpu.memory_space<vmem>>, %arg11: memref<1x128xf32, #tpu.memory_space<vmem>>, %arg12: memref<1x10xf32, #tpu.memory_space<vmem>>, %arg13: memref<8x10xf32, #tpu.memory_space<vmem>>, %arg14: memref<251x128xf32, #tpu.memory_space<vmem>>) attributes {dimension_semantics = [#tpu.dimension_semantics<parallel>], iteration_bounds = array<i64: 1>, scalar_prefetch = 0 : i64, scratch_operands = 1 : i64, tpu.core_type = #tpu.core_type<tc>, window_params = [{transform_indices = @transform_0, window_bounds = array<i64: 256, 128>}, {pipeline_mode = #tpu.pipeline_mode<synchronous>, transform_indices = @transform_1, window_bounds = array<i64: 640, 256>}, {pipeline_mode = #tpu.pipeline_mode<synchronous>, transform_indices = @transform_2, window_bounds = array<i64: 640, 256>}, {pipeline_mode = #tpu.pipeline_mode<synchronous>, transform_indices = @transform_3, window_bounds = array<i64: 5, 128, 128>}, {pipeline_mode = #tpu.pipeline_mode<synchronous>, transform_indices = @transform_4, window_bounds = array<i64: 40, 241>}, {pipeline_mode = #tpu.pipeline_mode<synchronous>, transform_indices = @transform_5, window_bounds = array<i64: 128, 128>}, {pipeline_mode = #tpu.pipeline_mode<synchronous>, transform_indices = @transform_6, window_bounds = array<i64: 128, 10>}, {pipeline_mode = #tpu.pipeline_mode<synchronous>, transform_indices = @transform_7, window_bounds = array<i64: 1, 128>}, {pipeline_mode = #tpu.pipeline_mode<synchronous>, transform_indices = @transform_8, window_bounds = array<i64: 1, 128>}, {pipeline_mode = #tpu.pipeline_mode<synchronous>, transform_indices = @transform_9, window_bounds = array<i64: 1, 128>}, {pipeline_mode = #tpu.pipeline_mode<synchronous>, transform_indices = @transform_10, window_bounds = array<i64: 1, 128>}, {pipeline_mode = #tpu.pipeline_mode<synchronous>, transform_indices = @transform_11, window_bounds = array<i64: 1, 10>}, {transform_indices = @transform_12, window_bounds = array<i64: 8, 10>}]} {
    %c0 = arith.constant 0 : index
    %c0_0 = arith.constant 0 : index
    %0 = vector.load %arg1[%c0, %c0_0] : memref<256x128xf32, #tpu.memory_space<vmem>>, vector<252x128xf32>
    %c1 = arith.constant 1 : index
    %c0_1 = arith.constant 0 : index
    %1 = vector.load %arg1[%c1, %c0_1] : memref<256x128xf32, #tpu.memory_space<vmem>>, vector<252x128xf32>
    %c2 = arith.constant 2 : index
    %c0_2 = arith.constant 0 : index
    %2 = vector.load %arg1[%c2, %c0_2] : memref<256x128xf32, #tpu.memory_space<vmem>>, vector<252x128xf32>
    %c3 = arith.constant 3 : index
    %c0_3 = arith.constant 0 : index
    %3 = vector.load %arg1[%c3, %c0_3] : memref<256x128xf32, #tpu.memory_space<vmem>>, vector<252x128xf32>
    %c4 = arith.constant 4 : index
    %c0_4 = arith.constant 0 : index
    %4 = vector.load %arg1[%c4, %c0_4] : memref<256x128xf32, #tpu.memory_space<vmem>>, vector<252x128xf32>
    %5 = tpu.concatenate %0, %1, %2, %3, %4 in 1 : vector<252x128xf32>, vector<252x128xf32>, vector<252x128xf32>, vector<252x128xf32>, vector<252x128xf32> -> vector<252x640xf32>
    %6 = arith.truncf %5 : vector<252x640xf32> to vector<252x640xbf16>
    %c0_5 = arith.constant 0 : index
    %c0_6 = arith.constant 0 : index
    %7 = vector.load %arg2[%c0_5, %c0_6] : memref<640x256xbf16, #tpu.memory_space<vmem>>, vector<640x256xbf16>
    %cst = arith.constant dense<0.000000e+00> : vector<252x256xf32>
    %8 = tpu.matmul %6, %7, %cst {dimension_numbers = #tpu.dot_dimension_numbers<[1], [0], [0], [1], [0, 0, 1, 1], [], []>} : vector<252x640xbf16>, vector<640x256xbf16>, vector<252x256xf32> -> vector<252x256xf32>
    %9 = vector.extract_strided_slice %8 {offsets = [0, 0], sizes = [252, 128], strides = [1, 1]} : vector<252x256xf32> to vector<252x128xf32>
    %10 = vector.extract_strided_slice %8 {offsets = [0, 128], sizes = [252, 128], strides = [1, 1]} : vector<252x256xf32> to vector<252x128xf32>
    %11 = arith.maximumf %9, %10 : vector<252x128xf32>
    %12 = vector.extract_strided_slice %11 {offsets = [0, 0], sizes = [251, 128], strides = [1, 1]} : vector<252x128xf32> to vector<251x128xf32>
    %13 = vector.extract_strided_slice %11 {offsets = [1, 0], sizes = [251, 128], strides = [1, 1]} : vector<252x128xf32> to vector<251x128xf32>
    %14 = arith.maximumf %12, %13 : vector<251x128xf32>
    %c0_7 = arith.constant 0 : index
    %c0_8 = arith.constant 0 : index
    %15 = vector.load %arg8[%c0_7, %c0_8] : memref<1x128xf32, #tpu.memory_space<vmem>>, vector<1x128xf32>
    %16 = vector.broadcast %15 : vector<1x128xf32> to vector<251x128xf32>
    %17 = arith.addf %14, %16 : vector<251x128xf32>
    %cst_9 = arith.constant 0.000000e+00 : f32
    %18 = vector.broadcast %cst_9 : f32 to vector<251x128xf32>
    %19 = arith.cmpf ogt, %17, %18 : vector<251x128xf32>
    %cst_10 = arith.constant 0.00999999977 : f32
    %20 = vector.broadcast %cst_10 : f32 to vector<251x128xf32>
    %21 = arith.mulf %20, %17 : vector<251x128xf32>
    %22 = arith.select %19, %17, %21 : vector<251x128xi1>, vector<251x128xf32>
    %c0_11 = arith.constant 0 : index
    %c0_12 = arith.constant 0 : index
    %23 = vector.load %arg14[%c0_11, %c0_12] : memref<251x128xf32, #tpu.memory_space<vmem>>, vector<251x128xf32>
    tpu.vector_store %arg14[%c0_11, %c0_12], %22 {strides = array<i32>} : memref<251x128xf32, #tpu.memory_space<vmem>>, vector<251x128xf32>,
    %c0_13 = arith.constant 0 : index
    %c0_14 = arith.constant 0 : index
    %24 = vector.load %arg14[%c0_13, %c0_14] : memref<251x128xf32, #tpu.memory_space<vmem>>, vector<243x128xf32>
    %c2_15 = arith.constant 2 : index
    %c0_16 = arith.constant 0 : index
    %25 = vector.load %arg14[%c2_15, %c0_16] : memref<251x128xf32, #tpu.memory_space<vmem>>, vector<243x128xf32>
    %c4_17 = arith.constant 4 : index
    %c0_18 = arith.constant 0 : index
    %26 = vector.load %arg14[%c4_17, %c0_18] : memref<251x128xf32, #tpu.memory_space<vmem>>, vector<243x128xf32>
    %c6 = arith.constant 6 : index
    %c0_19 = arith.constant 0 : index
    %27 = vector.load %arg14[%c6, %c0_19] : memref<251x128xf32, #tpu.memory_space<vmem>>, vector<243x128xf32>
    %c8 = arith.constant 8 : index
    %c0_20 = arith.constant 0 : index
    %28 = vector.load %arg14[%c8, %c0_20] : memref<251x128xf32, #tpu.memory_space<vmem>>, vector<243x128xf32>
    %29 = tpu.concatenate %24, %25, %26, %27, %28 in 1 : vector<243x128xf32>, vector<243x128xf32>, vector<243x128xf32>, vector<243x128xf32>, vector<243x128xf32> -> vector<243x640xf32>
    %30 = arith.truncf %29 : vector<243x640xf32> to vector<243x640xbf16>
    %c0_21 = arith.constant 0 : index
    %c0_22 = arith.constant 0 : index
    %31 = vector.load %arg3[%c0_21, %c0_22] : memref<640x256xbf16, #tpu.memory_space<vmem>>, vector<640x256xbf16>
    %cst_23 = arith.constant dense<0.000000e+00> : vector<243x256xf32>
    %32 = tpu.matmul %30, %31, %cst_23 {dimension_numbers = #tpu.dot_dimension_numbers<[1], [0], [0], [1], [0, 0, 1, 1], [], []>} : vector<243x640xbf16>, vector<640x256xbf16>, vector<243x256xf32> -> vector<243x256xf32>
    %33 = vector.extract_strided_slice %32 {offsets = [0, 0], sizes = [243, 128], strides = [1, 1]} : vector<243x256xf32> to vector<243x128xf32>
    %34 = vector.extract_strided_slice %32 {offsets = [0, 128], sizes = [243, 128], strides = [1, 1]} : vector<243x256xf32> to vector<243x128xf32>
    %35 = arith.maximumf %33, %34 : vector<243x128xf32>
    %36 = vector.extract_strided_slice %35 {offsets = [0, 0], sizes = [241, 128], strides = [1, 1]} : vector<243x128xf32> to vector<241x128xf32>
    %37 = vector.extract_strided_slice %35 {offsets = [2, 0], sizes = [241, 128], strides = [1, 1]} : vector<243x128xf32> to vector<241x128xf32>
    %38 = arith.maximumf %36, %37 : vector<241x128xf32>
    %c0_24 = arith.constant 0 : index
    %c0_25 = arith.constant 0 : index
    %39 = vector.load %arg9[%c0_24, %c0_25] : memref<1x128xf32, #tpu.memory_space<vmem>>, vector<1x128xf32>
    %40 = vector.broadcast %39 : vector<1x128xf32> to vector<241x128xf32>
    %41 = arith.addf %38, %40 : vector<241x128xf32>
    %cst_26 = arith.constant 0.000000e+00 : f32
    %42 = vector.broadcast %cst_26 : f32 to vector<241x128xf32>
    %43 = arith.cmpf ogt, %41, %42 : vector<241x128xf32>
    %cst_27 = arith.constant 0.00999999977 : f32
    %44 = vector.broadcast %cst_27 : f32 to vector<241x128xf32>
    %45 = arith.mulf %44, %41 : vector<241x128xf32>
    %46 = arith.select %43, %41, %45 : vector<241x128xi1>, vector<241x128xf32>
    %c0_28 = arith.constant 0 : index
    %c0_29 = arith.constant 0 : index
    %47 = vector.load %arg5[%c0_28, %c0_29] : memref<40x241xbf16, #tpu.memory_space<vmem>>, vector<40x241xbf16>
    %48 = arith.truncf %46 : vector<241x128xf32> to vector<241x128xbf16>
    %cst_30 = arith.constant dense<0.000000e+00> : vector<40x128xf32>
    %49 = tpu.matmul %47, %48, %cst_30 {dimension_numbers = #tpu.dot_dimension_numbers<[1], [0], [0], [1], [0, 0, 1, 1], [], []>} : vector<40x241xbf16>, vector<241x128xbf16>, vector<40x128xf32> -> vector<40x128xf32>
    %50 = arith.truncf %49 : vector<40x128xf32> to vector<40x128xbf16>
    %51 = vector.extract_strided_slice %50 {offsets = [0, 0], sizes = [8, 128], strides = [1, 1]} : vector<40x128xbf16> to vector<8x128xbf16>
    %c0_31 = arith.constant 0 : index
    %c0_32 = arith.constant 0 : index
    %c0_33 = arith.constant 0 : index
    %52 = vector.load %arg4[%c0_31, %c0_32, %c0_33] : memref<5x128x128xbf16, #tpu.memory_space<vmem>>, vector<1x128x128xbf16>
    %53 = vector.shape_cast %52 : vector<1x128x128xbf16> to vector<128x128xbf16>
    %cst_34 = arith.constant dense<0.000000e+00> : vector<8x128xf32>
    %54 = tpu.matmul %51, %53, %cst_34 {dimension_numbers = #tpu.dot_dimension_numbers<[1], [0], [0], [1], [0, 0, 1, 1], [], []>} : vector<8x128xbf16>, vector<128x128xbf16>, vector<8x128xf32> -> vector<8x128xf32>
    %55 = vector.extract_strided_slice %50 {offsets = [8, 0], sizes = [8, 128], strides = [1, 1]} : vector<40x128xbf16> to vector<8x128xbf16>
    %c1_35 = arith.constant 1 : index
    %c0_36 = arith.constant 0 : index
    %c0_37 = arith.constant 0 : index
    %56 = vector.load %arg4[%c1_35, %c0_36, %c0_37] : memref<5x128x128xbf16, #tpu.memory_space<vmem>>, vector<1x128x128xbf16>
    %57 = vector.shape_cast %56 : vector<1x128x128xbf16> to vector<128x128xbf16>
    %cst_38 = arith.constant dense<0.000000e+00> : vector<8x128xf32>
    %58 = tpu.matmul %55, %57, %cst_38 {dimension_numbers = #tpu.dot_dimension_numbers<[1], [0], [0], [1], [0, 0, 1, 1], [], []>} : vector<8x128xbf16>, vector<128x128xbf16>, vector<8x128xf32> -> vector<8x128xf32>
    %59 = arith.addf %54, %58 : vector<8x128xf32>
    %60 = vector.extract_strided_slice %50 {offsets = [16, 0], sizes = [8, 128], strides = [1, 1]} : vector<40x128xbf16> to vector<8x128xbf16>
    %c2_39 = arith.constant 2 : index
    %c0_40 = arith.constant 0 : index
    %c0_41 = arith.constant 0 : index
    %61 = vector.load %arg4[%c2_39, %c0_40, %c0_41] : memref<5x128x128xbf16, #tpu.memory_space<vmem>>, vector<1x128x128xbf16>
    %62 = vector.shape_cast %61 : vector<1x128x128xbf16> to vector<128x128xbf16>
    %cst_42 = arith.constant dense<0.000000e+00> : vector<8x128xf32>
    %63 = tpu.matmul %60, %62, %cst_42 {dimension_numbers = #tpu.dot_dimension_numbers<[1], [0], [0], [1], [0, 0, 1, 1], [], []>} : vector<8x128xbf16>, vector<128x128xbf16>, vector<8x128xf32> -> vector<8x128xf32>
    %64 = arith.addf %59, %63 : vector<8x128xf32>
    %65 = vector.extract_strided_slice %50 {offsets = [24, 0], sizes = [8, 128], strides = [1, 1]} : vector<40x128xbf16> to vector<8x128xbf16>
    %c3_43 = arith.constant 3 : index
    %c0_44 = arith.constant 0 : index
    %c0_45 = arith.constant 0 : index
    %66 = vector.load %arg4[%c3_43, %c0_44, %c0_45] : memref<5x128x128xbf16, #tpu.memory_space<vmem>>, vector<1x128x128xbf16>
    %67 = vector.shape_cast %66 : vector<1x128x128xbf16> to vector<128x128xbf16>
    %cst_46 = arith.constant dense<0.000000e+00> : vector<8x128xf32>
    %68 = tpu.matmul %65, %67, %cst_46 {dimension_numbers = #tpu.dot_dimension_numbers<[1], [0], [0], [1], [0, 0, 1, 1], [], []>} : vector<8x128xbf16>, vector<128x128xbf16>, vector<8x128xf32> -> vector<8x128xf32>
    %69 = arith.addf %64, %68 : vector<8x128xf32>
    %70 = vector.extract_strided_slice %50 {offsets = [32, 0], sizes = [8, 128], strides = [1, 1]} : vector<40x128xbf16> to vector<8x128xbf16>
    %c4_47 = arith.constant 4 : index
    %c0_48 = arith.constant 0 : index
    %c0_49 = arith.constant 0 : index
    %71 = vector.load %arg4[%c4_47, %c0_48, %c0_49] : memref<5x128x128xbf16, #tpu.memory_space<vmem>>, vector<1x128x128xbf16>
    %72 = vector.shape_cast %71 : vector<1x128x128xbf16> to vector<128x128xbf16>
    %cst_50 = arith.constant dense<0.000000e+00> : vector<8x128xf32>
    %73 = tpu.matmul %70, %72, %cst_50 {dimension_numbers = #tpu.dot_dimension_numbers<[1], [0], [0], [1], [0, 0, 1, 1], [], []>} : vector<8x128xbf16>, vector<128x128xbf16>, vector<8x128xf32> -> vector<8x128xf32>
    %74 = arith.addf %69, %73 : vector<8x128xf32>
    %c0_51 = arith.constant 0 : index
    %c0_52 = arith.constant 0 : index
    %75 = vector.load %arg10[%c0_51, %c0_52] : memref<1x128xf32, #tpu.memory_space<vmem>>, vector<1x128xf32>
    %76 = vector.broadcast %75 : vector<1x128xf32> to vector<8x128xf32>
    %77 = arith.addf %74, %76 : vector<8x128xf32>
    %cst_53 = arith.constant 0.000000e+00 : f32
    %78 = vector.broadcast %cst_53 : f32 to vector<8x128xf32>
    %79 = arith.cmpf ogt, %77, %78 : vector<8x128xf32>
    %cst_54 = arith.constant 0.00999999977 : f32
    %80 = vector.broadcast %cst_54 : f32 to vector<8x128xf32>
    %81 = arith.mulf %80, %77 : vector<8x128xf32>
    %82 = arith.select %79, %77, %81 : vector<8x128xi1>, vector<8x128xf32>
    %83 = arith.truncf %82 : vector<8x128xf32> to vector<8x128xbf16>
    %c0_55 = arith.constant 0 : index
    %c0_56 = arith.constant 0 : index
    %84 = vector.load %arg6[%c0_55, %c0_56] : memref<128x128xbf16, #tpu.memory_space<vmem>>, vector<128x128xbf16>
    %cst_57 = arith.constant dense<0.000000e+00> : vector<8x128xf32>
    %85 = tpu.matmul %83, %84, %cst_57 {dimension_numbers = #tpu.dot_dimension_numbers<[1], [0], [0], [1], [0, 0, 1, 1], [], []>} : vector<8x128xbf16>, vector<128x128xbf16>, vector<8x128xf32> -> vector<8x128xf32>
    %c0_58 = arith.constant 0 : index
    %c0_59 = arith.constant 0 : index
    %86 = vector.load %arg11[%c0_58, %c0_59] : memref<1x128xf32, #tpu.memory_space<vmem>>, vector<1x128xf32>
    %87 = vector.broadcast %86 : vector<1x128xf32> to vector<8x128xf32>
    %88 = arith.addf %85, %87 : vector<8x128xf32>
    %cst_60 = arith.constant 0.000000e+00 : f32
    %89 = vector.broadcast %cst_60 : f32 to vector<8x128xf32>
    %90 = arith.cmpf ogt, %88, %89 : vector<8x128xf32>
    %cst_61 = arith.constant 0.00999999977 : f32
    %91 = vector.broadcast %cst_61 : f32 to vector<8x128xf32>
    %92 = arith.mulf %91, %88 : vector<8x128xf32>
    %93 = arith.select %90, %88, %92 : vector<8x128xi1>, vector<8x128xf32>
    %c0_62 = arith.constant 0 : index
    %c0_63 = arith.constant 0 : index
    %94 = vector.load %arg7[%c0_62, %c0_63] : memref<128x10xf32, #tpu.memory_space<vmem>>, vector<128x10xf32>
    %cst_64 = arith.constant dense<0.000000e+00> : vector<8x10xf32>
    %95 = tpu.matmul %93, %94, %cst_64 {dimension_numbers = #tpu.dot_dimension_numbers<[1], [0], [0], [1], [0, 0, 1, 1], [], []>} : vector<8x128xf32>, vector<128x10xf32>, vector<8x10xf32> -> vector<8x10xf32>
    %c0_65 = arith.constant 0 : index
    %c0_66 = arith.constant 0 : index
    %96 = vector.load %arg12[%c0_65, %c0_66] : memref<1x10xf32, #tpu.memory_space<vmem>>, vector<1x10xf32>
    %97 = vector.broadcast %96 : vector<1x10xf32> to vector<8x10xf32>
    %98 = arith.addf %95, %97 : vector<8x10xf32>
    %c0_67 = arith.constant 0 : index
    %c0_68 = arith.constant 0 : index
    %99 = vector.load %arg13[%c0_67, %c0_68] : memref<8x10xf32, #tpu.memory_space<vmem>>, vector<8x10xf32>
    tpu.vector_store %arg13[%c0_67, %c0_68], %98 {strides = array<i32>} : memref<8x10xf32, #tpu.memory_space<vmem>>, vector<8x10xf32>,
    return
  }
  func.func @transform_0(%arg0: i32) -> (i32, i32) {
    %c0_i32 = arith.constant 0 : i32
    %c0_i32_0 = arith.constant 0 : i32
    return %arg0, %c0_i32 : i32, i32
  }
  func.func @transform_1(%arg0: i32) -> (i32, i32) {
    %c0_i32 = arith.constant 0 : i32
    %c0_i32_0 = arith.constant 0 : i32
    %c0_i32_1 = arith.constant 0 : i32
    return %c0_i32, %c0_i32_0 : i32, i32
  }
  func.func @transform_2(%arg0: i32) -> (i32, i32) {
    %c0_i32 = arith.constant 0 : i32
    %c0_i32_0 = arith.constant 0 : i32
    %c0_i32_1 = arith.constant 0 : i32
    return %c0_i32, %c0_i32_0 : i32, i32
  }
  func.func @transform_3(%arg0: i32) -> (i32, i32, i32) {
    %c0_i32 = arith.constant 0 : i32
    %c0_i32_0 = arith.constant 0 : i32
    %c0_i32_1 = arith.constant 0 : i32
    %c0_i32_2 = arith.constant 0 : i32
    return %c0_i32, %c0_i32_0, %c0_i32_1 : i32, i32, i32
  }
  func.func @transform_4(%arg0: i32) -> (i32, i32) {
    %c0_i32 = arith.constant 0 : i32
    %c0_i32_0 = arith.constant 0 : i32
    %c0_i32_1 = arith.constant 0 : i32
    return %c0_i32, %c0_i32_0 : i32, i32
  }
  func.func @transform_5(%arg0: i32) -> (i32, i32) {
    %c0_i32 = arith.constant 0 : i32
    %c0_i32_0 = arith.constant 0 : i32
    %c0_i32_1 = arith.constant 0 : i32
    return %c0_i32, %c0_i32_0 : i32, i32
  }
  func.func @transform_6(%arg0: i32) -> (i32, i32) {
    %c0_i32 = arith.constant 0 : i32
    %c0_i32_0 = arith.constant 0 : i32
    %c0_i32_1 = arith.constant 0 : i32
    return %c0_i32, %c0_i32_0 : i32, i32
  }
  func.func @transform_7(%arg0: i32) -> (i32, i32) {
    %c0_i32 = arith.constant 0 : i32
    %c0_i32_0 = arith.constant 0 : i32
    %c0_i32_1 = arith.constant 0 : i32
    return %c0_i32, %c0_i32_0 : i32, i32
  }
  func.func @transform_8(%arg0: i32) -> (i32, i32) {
    %c0_i32 = arith.constant 0 : i32
    %c0_i32_0 = arith.constant 0 : i32
    %c0_i32_1 = arith.constant 0 : i32
    return %c0_i32, %c0_i32_0 : i32, i32
  }
  func.func @transform_9(%arg0: i32) -> (i32, i32) {
    %c0_i32 = arith.constant 0 : i32
    %c0_i32_0 = arith.constant 0 : i32
    %c0_i32_1 = arith.constant 0 : i32
    return %c0_i32, %c0_i32_0 : i32, i32
  }
  func.func @transform_10(%arg0: i32) -> (i32, i32) {
    %c0_i32 = arith.constant 0 : i32
    %c0_i32_0 = arith.constant 0 : i32
    %c0_i32_1 = arith.constant 0 : i32
    return %c0_i32, %c0_i32_0 : i32, i32
  }
  func.func @transform_11(%arg0: i32) -> (i32, i32) {
    %c0_i32 = arith.constant 0 : i32
    %c0_i32_0 = arith.constant 0 : i32
    %c0_i32_1 = arith.constant 0 : i32
    return %c0_i32, %c0_i32_0 : i32, i32
  }
  func.func @transform_12(%arg0: i32) -> (i32, i32) {
    %c0_i32 = arith.constant 0 : i32
    %c0_i32_0 = arith.constant 0 : i32
    return %arg0, %c0_i32 : i32, i32
  }
}

</mosaic_0001>

<bundles_post_ra>
// kernel: forward.1
= control target key start
LH: loop header
LB: loop body
LE: loop exit
PB: predicated region body
PF: predicated region fallthrough
CT: control target
= control target key end

     0   :  { %17 = vsyncpa [#allocation4], 0  ;;  %s5351_s21 = smov [#allocation3]   ;;  %s6823_s0 = inlined_call_operand.vmem [shape: f32[256,128], index: 0, kind: input, shape index: {}]   ;;  %s6824_s1 = inlined_call_operand.vmem [shape: bf16[640,256], index: 1, kind: input, shape index: {}]   ;;  %s6825_s2 = inlined_call_operand.hbm [shape: bf16[640,256], index: 2, kind: input, shape index: {}]   ;;  %s6826_s3 = inlined_call_operand.vmem [shape: bf16[5,128,128], index: 3, kind: input, shape index: {}]   ;;  %s6827_s4 = inlined_call_operand.vmem [shape: bf16[40,241], index: 4, kind: input, shape index: {}]   ;;  %s6828_s5 = inlined_call_operand.vmem [shape: bf16[128,128], index: 5, kind: input, shape index: {}]   ;;  %s6829_s6 = inlined_call_operand.vmem [shape: f32[128,10], index: 6, kind: input, shape index: {}]   ;;  %s6830_s7 = inlined_call_operand.vmem [shape: f32[1,128], index: 7, kind: input, shape index: {}]   ;;  %s6831_s8 = inlined_call_operand.vmem [shape: f32[1,128], index: 8, kind: input, shape index: {}]   ;;  %s6832_s9 = inlined_call_operand.vmem [shape: f32[1,128], index: 9, kind: input, shape index: {}]   ;;  %s6833_s10 = inlined_call_operand.vmem [shape: f32[1,128], index: 10, kind: input, shape index: {}]   ;;  %s6834_s11 = inlined_call_operand.vmem [shape: f32[1,10], index: 11, kind: input, shape index: {}]   ;;  %s6835_s12 = inlined_call_operand.vmem [shape: f32[8,10], index: 12, kind: output, shape index: {}]  }
   0x1   :  { %s27_s22 = sshll.u32 %s5351_s21, 4  ;;  %s5327_s25 = scalar_lea.hbm %s6825_s2, 10240  ;;  %s28_s22 = int_to_ptr.vmem [resolvable:$true] %s27_s22 }
   0x2   :  { %p5328_p0 = scmp.ne.s32.totalorder %s6825_s2, %s5327_s25  ;;  %p5331_p1 = scmp.lt.u32.totalorder %s5327_s25, %s6825_s2 }
   0x4   :  { %p5333_p2 = pnand %p5331_p1, %p5328_p0 }
   0x6   :  { %5336 = shalt.err (!%p5333_p2)
}
   0x7   :  { %s5337_s30 = scalar_lea.vmem %s28_s22, 10240  ;;  %p5342_p4 = scmp.lt.s32.totalorder %s28_s22, %s28_s22 }
   0x8   :  { %p5338_p3 = scmp.ne.s32.totalorder %s28_s22, %s5337_s30  ;;  %p5343_p5 = scmp.lt.s32.totalorder %s5337_s30, %s5337_s30 }
   0xa   :  { %p5344_p6 = por %p5343_p5, %p5342_p4 }
   0xc   :  { %p5345_p7 = pnand %p5344_p6, %p5338_p3 }
   0xe   :  { %5348 = shalt.err (!%p5345_p7)
}
   0xf   :  { %s5352_s13 = smov 128   ;;  %s5353_s14 = smov 8  }
  0x10   :  { %33 = dma.hbm_to_vmem [thread:$0]  %s6825_s2, 10240, %s28_s22, [#allocation4], %s5352_s13, %s5352_s13, %s5353_s14  }
  0x11   :  { %5349 = dma.done.wait [#allocation4], 10240  }
  0x12   :  { %5350 = vsyncadd [#allocation4], 4294957056  ;;  %v5031_v0 = vld [vmem:[%s6824_s1 + $0x4] ss:$8 sps:$4 sm:$0xff]   ;;  %v5033_v1 = vld [vmem:[%s6824_s1] ss:$8 sps:$4 sm:$0xff]  }
  0x13   :  { %776 = vmatprep.subr.bf16.mxu0 %v5031_v0  ;;  %v5034_v2 = vld [vmem:[%s6824_s1 + $0x14] ss:$8 sps:$4 sm:$0xff]   ;;  %v5036_v3 = vld [vmem:[%s6824_s1 + $0x10] ss:$8 sps:$4 sm:$0xff]   ;;  %v5037_v4 = vld [vmem:[%s6824_s1 + $0x24] ss:$8 sps:$4 sm:$0xff]  }
  0x14   :  { %777 = vmatpush1.bf16.msra.mxu0 %v5033_v1  ;;  %v5039_v5 = vld [vmem:[%s6824_s1 + $0x20] ss:$8 sps:$4 sm:$0xff]   ;;  %v5040_v6 = vld [vmem:[%s6824_s1 + $0x34] ss:$8 sps:$4 sm:$0xff]   ;;  %v5042_v7 = vld [vmem:[%s6824_s1 + $0x30] ss:$8 sps:$4 sm:$0xff]  }
  0x15   :  { %778 = vmatprep.subr.bf16.mxu0 %v5034_v2  ;;  %v5043_v8 = vld [vmem:[%s6824_s1 + $0x44] ss:$8 sps:$4 sm:$0xff]   ;;  %v5045_v9 = vld [vmem:[%s6824_s1 + $0x40] ss:$8 sps:$4 sm:$0xff]   ;;  %v5046_v10 = vld [vmem:[%s6824_s1 + $0x54] ss:$8 sps:$4 sm:$0xff]  }
  0x16   :  { %v5048_v11 = vld [vmem:[%s6824_s1 + $0x50] ss:$8 sps:$4 sm:$0xff]   ;;  %v5049_v12 = vld [vmem:[%s6824_s1 + $0x64] ss:$8 sps:$4 sm:$0xff]   ;;  %v5051_v16 = vld [vmem:[%s6824_s1 + $0x60] ss:$8 sps:$4 sm:$0xff]  }
  0x17   :  { %v88_v13 = vld [vmem:[%s6823_s0 + $0x1] sm:$0xff]  ;;  %v89_v14 = vld [vmem:[%s6823_s0 + $0x9] sm:$0xff]  ;;  %v5052_v17 = vld [vmem:[%s6824_s1 + $0x74] ss:$8 sps:$4 sm:$0xff]   ;;  %vm1419_vm0 = vcmask 1046528  }
  0x18   :  { %779 = vmatpush1.bf16.msra.mxu0 %v5036_v3  ;;  %v217_v15 = vpack.c.bf16 %v89_v14, %v88_v13  ;;  %v5054_v18 = vld [vmem:[%s6824_s1 + $0x70] ss:$8 sps:$4 sm:$0xff]   ;;  %v5055_v19 = vld [vmem:[%s6824_s1 + $0x84] ss:$8 sps:$4 sm:$0xff]   ;;  %v5057_v20 = vld [vmem:[%s6824_s1 + $0x80] ss:$8 sps:$4 sm:$0xff]  }
  0x19   :  { %780 = vmatprep.subr.bf16.mxu0 %v5037_v4  ;;  %v5058_v21 = vld [vmem:[%s6824_s1 + $0x94] ss:$8 sps:$4 sm:$0xff]   ;;  %v5060_v22 = vld [vmem:[%s6824_s1 + $0x90] ss:$8 sps:$4 sm:$0xff]   ;;  %v5061_v23 = vld [vmem:[%s6824_s1 + $0xa4] ss:$8 sps:$4 sm:$0xff]  }
  0x1a   :  { %808 = vmatprep.mubr.bf16.mxu0 %v217_v15  ;;  %v5063_v24 = vld [vmem:[%s6824_s1 + $0xa0] ss:$8 sps:$4 sm:$0xff]   ;;  %v5064_v25 = vld [vmem:[%s6824_s1 + $0xb4] ss:$8 sps:$4 sm:$0xff]   ;;  %v5066_v26 = vld [vmem:[%s6824_s1 + $0xb0] ss:$8 sps:$4 sm:$0xff]  }
  0x1b   :  { %v5067_v27 = vld [vmem:[%s6824_s1 + $0xc4] ss:$8 sps:$4 sm:$0xff]   ;;  %v5069_v28 = vld [vmem:[%s6824_s1 + $0xc0] ss:$8 sps:$4 sm:$0xff]   ;;  %v5070_v29 = vld [vmem:[%s6824_s1 + $0xd4] ss:$8 sps:$4 sm:$0xff]  }
  0x1c   :  { %781 = vmatpush1.bf16.msra.mxu0 %v5039_v5  ;;  %v5072_v30 = vld [vmem:[%s6824_s1 + $0xd0] ss:$8 sps:$4 sm:$0xff]   ;;  %v5073_v31 = vld [vmem:[%s6824_s1 + $0xe4] ss:$8 sps:$4 sm:$0xff]   ;;  %v5075_v32 = vld [vmem:[%s6824_s1 + $0xe0] ss:$8 sps:$4 sm:$0xff]  }
  0x1d   :  { %782 = vmatprep.subr.bf16.mxu0 %v5040_v6  ;;  %v5076_v33 = vld [vmem:[%s6824_s1 + $0xf4] ss:$8 sps:$4 sm:$0xff]   ;;  %v5078_v34 = vld [vmem:[%s6824_s1 + $0xf0] ss:$8 sps:$4 sm:$0xff]   ;;  %v56_v35 = vld [vmem:[%s6823_s0] sm:$0xff] }
  0x1e   :  { %v57_v36 = vld [vmem:[%s6823_s0 + $0x8] sm:$0xff]  ;;  %v90_v37 = vld [vmem:[%s6823_s0 + $0x11] sm:$0xff]  ;;  %v91_v38 = vld [vmem:[%s6823_s0 + $0x19] sm:$0xff] }
  0x1f   :  { %v5081_v39 = vld [vmem:[%s6824_s1 + $0x104] ss:$8 sps:$4 sm:$0xff]   ;;  %v216_v40 = vpack.c.bf16 %v57_v36, %v56_v35  ;;  %v222_v41 = vpack.c.bf16 %v91_v38, %v90_v37  ;;  %v5079_v42 = vld [vmem:[%s6824_s1 + $0x100] ss:$8 sps:$4 sm:$0xff]   ;;  %v5084_v43 = vld [vmem:[%s6824_s1 + $0x114] ss:$8 sps:$4 sm:$0xff]  }
  0x20   :  { %783 = vmatpush1.bf16.msra.mxu0 %v5042_v7  ;;  %v58_v44 = vld [vmem:[%s6823_s0 + $0x10] sm:$0xff]  ;;  %v59_v45 = vld [vmem:[%s6823_s0 + $0x18] sm:$0xff]  ;;  %v92_v46 = vld [vmem:[%s6823_s0 + $0x21] sm:$0xff] }
  0x21   :  { %784 = vmatprep.subr.bf16.mxu0 %v5043_v8  ;;  %v93_v47 = vld [vmem:[%s6823_s0 + $0x29] sm:$0xff]  ;;  %v221_v51 = vpack.c.bf16 %v59_v45, %v58_v44  ;;  %v5090_v52 = vld [vmem:[%s6824_s1 + $0x134] ss:$8 sps:$4 sm:$0xff]   ;;  %v60_v54 = vld [vmem:[%s6823_s0 + $0x20] sm:$0xff] }
  0x22   :  { %v5082_v48 = vld [vmem:[%s6824_s1 + $0x110] ss:$8 sps:$4 sm:$0xff]   ;;  %v5087_v49 = vld [vmem:[%s6824_s1 + $0x124] ss:$8 sps:$4 sm:$0xff]   ;;  %v5085_v50 = vld [vmem:[%s6824_s1 + $0x120] ss:$8 sps:$4 sm:$0xff]   ;;  %v227_v53 = vpack.c.bf16 %v93_v47, %v92_v46 }
  0x23   :  { %v61_v55 = vld [vmem:[%s6823_s0 + $0x28] sm:$0xff]  ;;  %v94_v56 = vld [vmem:[%s6823_s0 + $0x31] sm:$0xff]  ;;  %v95_v57 = vld [vmem:[%s6823_s0 + $0x39] sm:$0xff] }
  0x24   :  { %785 = vmatpush1.bf16.msra.mxu0 %v5045_v9  ;;  %v5088_v58 = vld [vmem:[%s6824_s1 + $0x130] ss:$8 sps:$4 sm:$0xff]   ;;  %v5093_v59 = vld [vmem:[%s6824_s1 + $0x144] ss:$8 sps:$4 sm:$0xff]   ;;  %v5091_v60 = vld [vmem:[%s6824_s1 + $0x140] ss:$8 sps:$4 sm:$0xff]   ;;  %v226_v61 = vpack.c.bf16 %v61_v55, %v60_v54  ;;  %v232_v63 = vpack.c.bf16 %v95_v57, %v94_v56 }
  0x25   :  { %786 = vmatprep.subr.bf16.mxu0 %v5046_v10  ;;  %v5096_v62 = vld [vmem:[%s6824_s1 + $0x154] ss:$8 sps:$4 sm:$0xff]   ;;  %v96_v2 = vld [vmem:[%s6823_s0 + $0x41] sm:$0xff]  ;;  %v97_v3 = vld [vmem:[%s6823_s0 + $0x49] sm:$0xff] }
  0x26   :  { %v62_v0 = vld [vmem:[%s6823_s0 + $0x30] sm:$0xff]  ;;  %v63_v1 = vld [vmem:[%s6823_s0 + $0x38] sm:$0xff]  ;;  %v5099_v5 = vld [vmem:[%s6824_s1 + $0x164] ss:$8 sps:$4 sm:$0xff]   ;;  %v237_v9 = vpack.c.bf16 %v97_v3, %v96_v2 }
  0x27   :  { %v5094_v4 = vld [vmem:[%s6824_s1 + $0x150] ss:$8 sps:$4 sm:$0xff]   ;;  %v5097_v6 = vld [vmem:[%s6824_s1 + $0x160] ss:$8 sps:$4 sm:$0xff]   ;;  %v231_v7 = vpack.c.bf16 %v63_v1, %v62_v0  ;;  %v5102_v8 = vld [vmem:[%s6824_s1 + $0x174] ss:$8 sps:$4 sm:$0xff]  }
  0x28   :  { %787 = vmatpush1.bf16.msra.mxu0 %v5048_v11  ;;  %v64_v10 = vld [vmem:[%s6823_s0 + $0x40] sm:$0xff]  ;;  %v65_v11 = vld [vmem:[%s6823_s0 + $0x48] sm:$0xff]  ;;  %v5100_v14 = vld [vmem:[%s6824_s1 + $0x170] ss:$8 sps:$4 sm:$0xff]  }
  0x29   :  { %788 = vmatprep.subr.bf16.mxu0 %v5049_v12  ;;  %v98_v12 = vld [vmem:[%s6823_s0 + $0x51] sm:$0xff]  ;;  %v99_v13 = vld [vmem:[%s6823_s0 + $0x59] sm:$0xff]  ;;  %v5105_v15 = vld [vmem:[%s6824_s1 + $0x184] ss:$8 sps:$4 sm:$0xff]  }
  0x2a   :  { %v5117_v35 = vld [vmem:[%s6824_s1 + $0x1c4] ss:$8 sps:$4 sm:$0xff]   ;;  %v5115_v36 = vld [vmem:[%s6824_s1 + $0x1c0] ss:$8 sps:$4 sm:$0xff]   ;;  %v5120_v38 = vld [vmem:[%s6824_s1 + $0x1d4] ss:$8 sps:$4 sm:$0xff]  }
  0x2b   :  { %v5118_v44 = vld [vmem:[%s6824_s1 + $0x1d0] ss:$8 sps:$4 sm:$0xff]   ;;  %v5123_v45 = vld [vmem:[%s6824_s1 + $0x1e4] ss:$8 sps:$4 sm:$0xff]   ;;  %v5121_v46 = vld [vmem:[%s6824_s1 + $0x1e0] ss:$8 sps:$4 sm:$0xff]  }
  0x2c   :  { %789 = vmatpush1.bf16.msra.mxu0 %v5051_v16  ;;  %v5103_v16 = vld [vmem:[%s6824_s1 + $0x180] ss:$8 sps:$4 sm:$0xff]   ;;  %v5124_v54 = vld [vmem:[%s6824_s1 + $0x1f0] ss:$8 sps:$4 sm:$0xff]   ;;  %v5129_v0 = vld [vmem:[%s6824_s1 + $0x204] ss:$8 sps:$4 sm:$0xff]  }
  0x2d   :  { %790 = vmatprep.subr.bf16.mxu0 %v5052_v17  ;;  %v236_v17 = vpack.c.bf16 %v65_v11, %v64_v10  ;;  %v74_v57 = vld [vmem:[%s6823_s0 + $0x90] sm:$0xff]  ;;  %v77_v1 = vld [vmem:[%s6823_s0 + $0xa8] sm:$0xff]  ;;  %v111_v3 = vld [vmem:[%s6823_s0 + $0xb9] sm:$0xff] }
  0x2e   :  { %v110_v2 = vld [vmem:[%s6823_s0 + $0xb1] sm:$0xff] }
  0x30   :  { %791 = vmatpush1.bf16.msra.mxu0 %v5054_v18  ;;  %v5108_v18 = vld [vmem:[%s6824_s1 + $0x194] ss:$8 sps:$4 sm:$0xff]  }
  0x31   :  { %792 = vmatprep.subr.bf16.mxu0 %v5055_v19  ;;  %v242_v19 = vpack.c.bf16 %v99_v13, %v98_v12  ;;  %v80_v12 = vld [vmem:[%s6823_s0 + $0xc0] sm:$0xff]  ;;  %v81_v13 = vld [vmem:[%s6823_s0 + $0xc8] sm:$0xff] }
  0x34   :  { %793 = vmatpush1.bf16.msra.mxu0 %v5057_v20  ;;  %v66_v20 = vld [vmem:[%s6823_s0 + $0x50] sm:$0xff] }
  0x35   :  { %794 = vmatprep.subr.bf16.mxu0 %v5058_v21  ;;  %v67_v21 = vld [vmem:[%s6823_s0 + $0x58] sm:$0xff] }
  0x38   :  { %795 = vmatpush1.bf16.msra.mxu0 %v5060_v22  ;;  %v100_v22 = vld [vmem:[%s6823_s0 + $0x61] sm:$0xff] }
  0x39   :  { %796 = vmatprep.subr.bf16.mxu0 %v5061_v23  ;;  %v101_v23 = vld [vmem:[%s6823_s0 + $0x69] sm:$0xff] }
  0x3c   :  { %797 = vmatpush1.bf16.msra.mxu0 %v5063_v24  ;;  %v5106_v24 = vld [vmem:[%s6824_s1 + $0x190] ss:$8 sps:$4 sm:$0xff]  }
  0x3d   :  { %798 = vmatprep.subr.bf16.mxu0 %v5064_v25  ;;  %v5111_v25 = vld [vmem:[%s6824_s1 + $0x1a4] ss:$8 sps:$4 sm:$0xff]  }
  0x40   :  { %799 = vmatpush1.bf16.msra.mxu0 %v5066_v26  ;;  %v5109_v26 = vld [vmem:[%s6824_s1 + $0x1a0] ss:$8 sps:$4 sm:$0xff]  }
  0x41   :  { %800 = vmatprep.subr.bf16.mxu0 %v5067_v27  ;;  %v241_v27 = vpack.c.bf16 %v67_v21, %v66_v20  ;;  %v116_v20 = vld [vmem:[%s6823_s0 + $0xe1] sm:$0xff]  ;;  %v117_v21 = vld [vmem:[%s6823_s0 + $0xe9] sm:$0xff] }
  0x44   :  { %801 = vmatpush1.bf16.msra.mxu0 %v5069_v28  ;;  %v5114_v28 = vld [vmem:[%s6824_s1 + $0x1b4] ss:$8 sps:$4 sm:$0xff]  }
  0x45   :  { %802 = vmatprep.subr.bf16.mxu0 %v5070_v29  ;;  %v247_v29 = vpack.c.bf16 %v101_v23, %v100_v22  ;;  %v287_v23 = vpack.c.bf16 %v117_v21, %v116_v20  ;;  %v165_v20 = vld [vmem:[%s6823_s0 + $0x6b] sm:$0xff] }
  0x48   :  { %803 = vmatpush1.bf16.msra.mxu0 %v5072_v30  ;;  %v68_v30 = vld [vmem:[%s6823_s0 + $0x60] sm:$0xff] }
  0x49   :  { %804 = vmatprep.subr.bf16.mxu0 %v5073_v31  ;;  %v69_v31 = vld [vmem:[%s6823_s0 + $0x68] sm:$0xff] }
  0x4a   :  { %v246_v37 = vpack.c.bf16 %v69_v31, %v68_v30  ;;  %v86_v30 = vld [vmem:[%s6823_s0 + $0xf0] sm:$0xff]  ;;  %v87_v31 = vld [vmem:[%s6823_s0 + $0xf8] sm:$0xf] }
  0x4c   :  { %805 = vmatpush1.bf16.msra.mxu0 %v5075_v32  ;;  %v102_v32 = vld [vmem:[%s6823_s0 + $0x71] sm:$0xff] }
  0x4d   :  { %806 = vmatprep.subr.bf16.mxu0 %v5076_v33  ;;  %v103_v33 = vld [vmem:[%s6823_s0 + $0x79] sm:$0xff] }
  0x50   :  { %807 = vmatpush1.bf16.msra.mxu0 %v5078_v34  ;;  %v5112_v34 = vld [vmem:[%s6824_s1 + $0x1b0] ss:$8 sps:$4 sm:$0xff]  }
  0x51   :  { %969 = vmatprep.subr.bf16.mxu0 %v5081_v39  ;;  %v252_v39 = vpack.c.bf16 %v103_v33, %v102_v32  ;;  %v152_v32 = vld [vmem:[%s6823_s0 + $0x3] sm:$0xff]  ;;  %v153_v33 = vld [vmem:[%s6823_s0 + $0xb] sm:$0xff] }
  0x53   :  { %809 = vmatmul.mubr.bf16.vlgmr.msra.gmra.mrb[0].mxu0 %v216_v40  ;;  %v70_v40 = vld [vmem:[%s6823_s0 + $0x70] sm:$0xff] }
  0x54   :  { %818 = vmatprep.mubr.bf16.mxu0 %v222_v41  ;;  %970 = vmatpush1.bf16.msra.mxu0 %v5079_v42  ;;  %v71_v41 = vld [vmem:[%s6823_s0 + $0x78] sm:$0xff]  ;;  %v104_v42 = vld [vmem:[%s6823_s0 + $0x81] sm:$0xff] }
  0x55   :  { %971 = vmatprep.subr.bf16.mxu0 %v5084_v43  ;;  %v105_v43 = vld [vmem:[%s6823_s0 + $0x89] sm:$0xff]  ;;  %v251_v47 = vpack.c.bf16 %v71_v41, %v70_v40 }
  0x58   :  { %972 = vmatpush1.bf16.msra.mxu0 %v5082_v48  ;;  %v5126_v48 = vld [vmem:[%s6824_s1 + $0x1f4] ss:$8 sps:$4 sm:$0xff]  }
  0x59   :  { %973 = vmatprep.subr.bf16.mxu0 %v5087_v49  ;;  %v257_v49 = vpack.c.bf16 %v105_v43, %v104_v42  ;;  %v5127_v42 = vld [vmem:[%s6824_s1 + $0x200] ss:$8 sps:$4 sm:$0xff]   ;;  %v5132_v43 = vld [vmem:[%s6824_s1 + $0x214] ss:$8 sps:$4 sm:$0xff]  }
  0x5b   :  { %819 = vmatmul.mubr.bf16.gmra.mrb[4].mxu0 %v221_v51  ;;  %v73_v51 = vld [vmem:[%s6823_s0 + $0x88] sm:$0xff] }
  0x5c   :  { %828 = vmatprep.mubr.bf16.mxu0 %v227_v53  ;;  %974 = vmatpush1.bf16.msra.mxu0 %v5085_v50  ;;  %v72_v50 = vld [vmem:[%s6823_s0 + $0x80] sm:$0xff] }
  0x5d   :  { %975 = vmatprep.subr.bf16.mxu0 %v5090_v52  ;;  %v106_v52 = vld [vmem:[%s6823_s0 + $0x91] sm:$0xff]  ;;  %v107_v53 = vld [vmem:[%s6823_s0 + $0x99] sm:$0xff]  ;;  %v256_v55 = vpack.c.bf16 %v73_v51, %v72_v50 }
  0x5e   :  { %v262_v56 = vpack.c.bf16 %v107_v53, %v106_v52  ;;  %v5133_v52 = vld [vmem:[%s6824_s1 + $0x220] ss:$8 sps:$4 sm:$0xff]   ;;  %v5138_v53 = vld [vmem:[%s6824_s1 + $0x234] ss:$8 sps:$4 sm:$0xff]  }
  0x60   :  { %976 = vmatpush1.bf16.msra.mxu0 %v5088_v58  ;;  %v75_v58 = vld [vmem:[%s6823_s0 + $0x98] sm:$0xff] }
  0x61   :  { %977 = vmatprep.subr.bf16.mxu0 %v5093_v59  ;;  %v108_v59 = vld [vmem:[%s6823_s0 + $0xa1] sm:$0xff] }
  0x63   :  { %829 = vmatmul.mubr.bf16.gmra.mrb[8].mxu0 %v226_v61  ;;  %v261_v61 = vpack.c.bf16 %v75_v58, %v74_v57  ;;  %v158_v57 = vld [vmem:[%s6823_s0 + $0x33] sm:$0xff]  ;;  %v159_v58 = vld [vmem:[%s6823_s0 + $0x3b] sm:$0xff] }
  0x64   :  { %838 = vmatprep.mubr.bf16.mxu0 %v232_v63  ;;  %978 = vmatpush1.bf16.msra.mxu0 %v5091_v60  ;;  %v109_v60 = vld [vmem:[%s6823_s0 + $0xa9] sm:$0xff]  ;;  %v76_v63 = vld [vmem:[%s6823_s0 + $0xa0] sm:$0xff] }
  0x65   :  { %979 = vmatprep.subr.bf16.mxu0 %v5096_v62  ;;  %v267_v62 = vpack.c.bf16 %v109_v60, %v108_v59  ;;  %v5141_v59 = vld [vmem:[%s6824_s1 + $0x244] ss:$8 sps:$4 sm:$0xff]  }
  0x68   :  { %980 = vmatpush1.bf16.msra.mxu0 %v5094_v4  ;;  %v266_v4 = vpack.c.bf16 %v77_v1, %v76_v63  ;;  %v5144_v63 = vld [vmem:[%s6824_s1 + $0x254] ss:$8 sps:$4 sm:$0xff]  }
  0x69   :  { %981 = vmatprep.subr.bf16.mxu0 %v5099_v5  ;;  %v272_v5 = vpack.c.bf16 %v111_v3, %v110_v2  ;;  %v127_v1 = vld [vmem:[%s6823_s0 + $0x3a] sm:$0xff]  ;;  %v160_v3 = vld [vmem:[%s6823_s0 + $0x43] sm:$0xff] }
  0x6a   :  { %v5142_v2 = vld [vmem:[%s6824_s1 + $0x250] ss:$8 sps:$4 sm:$0xff]  }
  0x6b   :  { %839 = vmatmul.mubr.bf16.gmra.mrb[12].mxu0 %v231_v7  ;;  %v79_v7 = vld [vmem:[%s6823_s0 + $0xb8] sm:$0xff] }
  0x6c   :  { %848 = vmatprep.mubr.bf16.mxu0 %v237_v9  ;;  %982 = vmatpush1.bf16.msra.mxu0 %v5097_v6  ;;  %v78_v6 = vld [vmem:[%s6823_s0 + $0xb0] sm:$0xff] }
  0x6d   :  { %983 = vmatprep.subr.bf16.mxu0 %v5102_v8  ;;  %v112_v8 = vld [vmem:[%s6823_s0 + $0xc1] sm:$0xff]  ;;  %v113_v9 = vld [vmem:[%s6823_s0 + $0xc9] sm:$0xff]  ;;  %v271_v10 = vpack.c.bf16 %v79_v7, %v78_v6 }
  0x6e   :  { %v277_v11 = vpack.c.bf16 %v113_v9, %v112_v8  ;;  %v5145_v8 = vld [vmem:[%s6824_s1 + $0x260] ss:$8 sps:$4 sm:$0xff]   ;;  %v5150_v9 = vld [vmem:[%s6824_s1 + $0x274] ss:$8 sps:$4 sm:$0xff]  }
  0x70   :  { %984 = vmatpush1.bf16.msra.mxu0 %v5100_v14  ;;  %v114_v14 = vld [vmem:[%s6823_s0 + $0xd1] sm:$0xff] }
  0x71   :  { %985 = vmatprep.subr.bf16.mxu0 %v5105_v15  ;;  %v115_v15 = vld [vmem:[%s6823_s0 + $0xd9] sm:$0xff] }
  0x73   :  { %849 = vmatmul.mubr.bf16.gmra.mrb[16].mxu0 %v236_v17  ;;  %v282_v17 = vpack.c.bf16 %v115_v15, %v114_v14  ;;  %v163_v14 = vld [vmem:[%s6823_s0 + $0x5b] sm:$0xff] }
  0x74   :  { %858 = vmatprep.mubr.bf16.mxu0 %v242_v19  ;;  %986 = vmatpush1.bf16.msra.mxu0 %v5103_v16  ;;  %v276_v16 = vpack.c.bf16 %v81_v13, %v80_v12  ;;  %v83_v19 = vld [vmem:[%s6823_s0 + $0xd8] sm:$0xff] }
  0x75   :  { %987 = vmatprep.subr.bf16.mxu0 %v5108_v18  ;;  %v82_v18 = vld [vmem:[%s6823_s0 + $0xd0] sm:$0xff] }
  0x76   :  { %v281_v22 = vpack.c.bf16 %v83_v19, %v82_v18  ;;  %v5148_v12 = vld [vmem:[%s6824_s1 + $0x270] ss:$8 sps:$4 sm:$0xff]   ;;  %v164_v19 = vld [vmem:[%s6823_s0 + $0x63] sm:$0xff] }
  0x77   :  { %v162_v13 = vld [vmem:[%s6823_s0 + $0x53] sm:$0xff] }
  0x78   :  { %988 = vmatpush1.bf16.msra.mxu0 %v5106_v24  ;;  %v84_v24 = vld [vmem:[%s6823_s0 + $0xe0] sm:$0xff] }
  0x79   :  { %989 = vmatprep.subr.bf16.mxu0 %v5111_v25  ;;  %v85_v25 = vld [vmem:[%s6823_s0 + $0xe8] sm:$0xff]  ;;  %v131_v18 = vld [vmem:[%s6823_s0 + $0x5a] sm:$0xff] }
  0x7b   :  { %859 = vmatmul.mubr.bf16.gmra.mrb[20].mxu0 %v241_v27  ;;  %v119_v27 = vld [vmem:[%s6823_s0 + $0xf9] sm:$0xf] }
  0x7c   :  { %868 = vmatprep.mubr.bf16.mxu0 %v247_v29  ;;  %990 = vmatpush1.bf16.msra.mxu0 %v5109_v26  ;;  %v118_v26 = vld [vmem:[%s6823_s0 + $0xf1] sm:$0xff] }
  0x7d   :  { %991 = vmatprep.subr.bf16.mxu0 %v5114_v28  ;;  %v286_v28 = vpack.c.bf16 %v85_v25, %v84_v24  ;;  %v292_v29 = vpack.c.bf16 %v119_v27, %v118_v26  ;;  %v133_v24 = vld [vmem:[%s6823_s0 + $0x6a] sm:$0xff]  ;;  %v166_v25 = vld [vmem:[%s6823_s0 + $0x73] sm:$0xff]  ;;  %v167_v26 = vld [vmem:[%s6823_s0 + $0x7b] sm:$0xff] }
  0x80   :  { %992 = vmatpush1.bf16.msra.mxu0 %v5112_v34  ;;  %v291_v34 = vpack.c.bf16 %v87_v31, %v86_v30  ;;  %v135_v30 = vld [vmem:[%s6823_s0 + $0x7a] sm:$0xff]  ;;  %v168_v31 = vld [vmem:[%s6823_s0 + $0x83] sm:$0xff] }
  0x81   :  { %993 = vmatprep.subr.bf16.mxu0 %v5117_v35  ;;  %v219_v35 = vpack.c.bf16 %v153_v33, %v152_v32  ;;  %v169_v32 = vld [vmem:[%s6823_s0 + $0x8b] sm:$0xff] }
  0x83   :  { %869 = vmatmul.mubr.bf16.gmra.mrb[24].mxu0 %v246_v37  ;;  %v121_v37 = vld [vmem:[%s6823_s0 + $0xa] sm:$0xff] }
  0x84   :  { %878 = vmatprep.mubr.bf16.mxu0 %v252_v39  ;;  %994 = vmatpush1.bf16.msra.mxu0 %v5115_v36  ;;  %v120_v36 = vld [vmem:[%s6823_s0 + $0x2] sm:$0xff] }
  0x85   :  { %995 = vmatprep.subr.bf16.mxu0 %v5120_v38  ;;  %v154_v38 = vld [vmem:[%s6823_s0 + $0x13] sm:$0xff]  ;;  %v155_v39 = vld [vmem:[%s6823_s0 + $0x1b] sm:$0xff]  ;;  %v218_v40 = vpack.c.bf16 %v121_v37, %v120_v36  ;;  %v137_v36 = vld [vmem:[%s6823_s0 + $0x8a] sm:$0xff] }
  0x86   :  { %v224_v41 = vpack.c.bf16 %v155_v39, %v154_v38  ;;  %v170_v37 = vld [vmem:[%s6823_s0 + $0x93] sm:$0xff]  ;;  %v171_v38 = vld [vmem:[%s6823_s0 + $0x9b] sm:$0xff] }
  0x88   :  { %996 = vmatpush1.bf16.msra.mxu0 %v5118_v44  ;;  %v122_v44 = vld [vmem:[%s6823_s0 + $0x12] sm:$0xff] }
  0x89   :  { %997 = vmatprep.subr.bf16.mxu0 %v5123_v45  ;;  %v123_v45 = vld [vmem:[%s6823_s0 + $0x1a] sm:$0xff] }
  0x8a   :  { %v223_v50 = vpack.c.bf16 %v123_v45, %v122_v44  ;;  %v173_v44 = vld [vmem:[%s6823_s0 + $0xab] sm:$0xff] }
  0x8b   :  { %879 = vmatmul.mubr.bf16.gmra.mrb[28].mxu0 %v251_v47  ;;  %v156_v47 = vld [vmem:[%s6823_s0 + $0x23] sm:$0xff] }
  0x8c   :  { %888 = vmatprep.mubr.bf16.mxu0 %v257_v49  ;;  %998 = vmatpush1.bf16.msra.mxu0 %v5121_v46  ;;  %v5130_v46 = vld [vmem:[%s6824_s1 + $0x210] ss:$8 sps:$4 sm:$0xff]   ;;  %v5135_v49 = vld [vmem:[%s6824_s1 + $0x224] ss:$8 sps:$4 sm:$0xff]  }
  0x8d   :  { %999 = vmatprep.subr.bf16.mxu0 %v5126_v48  ;;  %v157_v48 = vld [vmem:[%s6823_s0 + $0x2b] sm:$0xff] }
  0x8e   :  { %v229_v51 = vpack.c.bf16 %v157_v48, %v156_v47  ;;  %v140_v47 = vld [vmem:[%s6823_s0 + $0xa2] sm:$0xff]  ;;  %v141_v48 = vld [vmem:[%s6823_s0 + $0xaa] sm:$0xff] }
  0x90   :  { %1000 = vmatpush1.bf16.msra.mxu0 %v5124_v54  ;;  %v124_v54 = vld [vmem:[%s6823_s0 + $0x22] sm:$0xff] }
  0x91   :  { %1162 = vmatprep.subr.bf16.mxu0 %v5129_v0  ;;  %v126_v0 = vld [vmem:[%s6823_s0 + $0x32] sm:$0xff] }
  0x92   :  { %v233_v6 = vpack.c.bf16 %v127_v1, %v126_v0  ;;  %v146_v1 = vld [vmem:[%s6823_s0 + $0xd2] sm:$0xff] }
  0x93   :  { %889 = vmatmul.mubr.bf16.gmra.mrb[32].mxu0 %v256_v55  ;;  %v125_v55 = vld [vmem:[%s6823_s0 + $0x2a] sm:$0xff] }
  0x94   :  { %898 = vmatprep.mubr.bf16.mxu0 %v262_v56  ;;  %v5136_v56 = vld [vmem:[%s6824_s1 + $0x230] ss:$8 sps:$4 sm:$0xff]   ;;  %v228_v60 = vpack.c.bf16 %v125_v55, %v124_v54  ;;  %v176_v55 = vld [vmem:[%s6823_s0 + $0xc3] sm:$0xff] }
  0x95   :  { %v143_v54 = vld [vmem:[%s6823_s0 + $0xba] sm:$0xff] }
  0x9b   :  { %899 = vmatmul.mubr.bf16.gmra.mrb[36].mxu0 %v261_v61  ;;  %v234_v61 = vpack.c.bf16 %v159_v58, %v158_v57 }
  0x9c   :  { %908 = vmatprep.mubr.bf16.mxu0 %v267_v62  ;;  %v5139_v62 = vld [vmem:[%s6824_s1 + $0x240] ss:$8 sps:$4 sm:$0xff]  }
  0xa3   :  { %909 = vmatmul.mubr.bf16.gmra.mrb[40].mxu0 %v266_v4  ;;  %v161_v4 = vld [vmem:[%s6823_s0 + $0x4b] sm:$0xff] }
  0xa4   :  { %918 = vmatprep.mubr.bf16.mxu0 %v272_v5  ;;  %v5147_v5 = vld [vmem:[%s6824_s1 + $0x264] ss:$8 sps:$4 sm:$0xff]   ;;  %v239_v7 = vpack.c.bf16 %v161_v4, %v160_v3 }
  0xa5   :  { %v180_v3 = vld [vmem:[%s6823_s0 + $0xe3] sm:$0xff]  ;;  %v181_v4 = vld [vmem:[%s6823_s0 + $0xeb] sm:$0xff] }
  0xab   :  { %919 = vmatmul.mubr.bf16.gmra.mrb[44].mxu0 %v271_v10  ;;  %v128_v10 = vld [vmem:[%s6823_s0 + $0x42] sm:$0xff] }
  0xac   :  { %928 = vmatprep.mubr.bf16.mxu0 %v277_v11  ;;  %v129_v11 = vld [vmem:[%s6823_s0 + $0x4a] sm:$0xff] }
  0xad   :  { %v238_v15 = vpack.c.bf16 %v129_v11, %v128_v10  ;;  %v183_v10 = vld [vmem:[%s6823_s0 + $0xfb] sm:$0xf] }
  0xb3   :  { %929 = vmatmul.mubr.bf16.gmra.mrb[48].mxu0 %v276_v16  ;;  %v244_v16 = vpack.c.bf16 %v163_v14, %v162_v13  ;;  %v150_v13 = vld [vmem:[%s6823_s0 + $0xf2] sm:$0xff]  ;;  %v151_v14 = vld [vmem:[%s6823_s0 + $0xfa] sm:$0xf] }
  0xb4   :  { %938 = vmatprep.mubr.bf16.mxu0 %v282_v17  ;;  %v130_v17 = vld [vmem:[%s6823_s0 + $0x52] sm:$0xff] }
  0xb5   :  { %v243_v21 = vpack.c.bf16 %v131_v18, %v130_v17  ;;  %v5153_v17 = vld [vmem:[#allocation3] ss:$8 sps:$4 sm:$0xff]   ;;  %v5154_v18 = vld [vmem:[#allocation3 + $0x14] ss:$8 sps:$4 sm:$0xff]  }
  0xbb   :  { %939 = vmatmul.mubr.bf16.gmra.mrb[52].mxu0 %v281_v22  ;;  %v249_v22 = vpack.c.bf16 %v165_v20, %v164_v19  ;;  %v5354_v19 = vmov 0   ;;  %v184_v20 = vld [vmem:[%s6823_s0 + $0x4] sm:$0xff] }
  0xbc   :  { %948 = vmatprep.mubr.bf16.mxu0 %v287_v23  ;;  %v132_v23 = vld [vmem:[%s6823_s0 + $0x62] sm:$0xff] }
  0xbd   :  { %v248_v27 = vpack.c.bf16 %v133_v24, %v132_v23  ;;  %v5157_v24 = vld [vmem:[#allocation3 + $0x24] ss:$8 sps:$4 sm:$0xff]  }
  0xc3   :  { %949 = vmatmul.mubr.bf16.gmra.mrb[56].mxu0 %v286_v28  ;;  %v254_v28 = vpack.c.bf16 %v167_v26, %v166_v25  ;;  %v5159_v25 = vld [vmem:[#allocation3 + $0x20] ss:$8 sps:$4 sm:$0xff]   ;;  %v5160_v26 = vld [vmem:[#allocation3 + $0x34] ss:$8 sps:$4 sm:$0xff]  }
  0xc4   :  { %958 = vmatprep.mubr.bf16.mxu0 %v292_v29  ;;  %v134_v29 = vld [vmem:[%s6823_s0 + $0x72] sm:$0xff] }
  0xc5   :  { %v253_v33 = vpack.c.bf16 %v135_v30, %v134_v29  ;;  %v5162_v29 = vld [vmem:[#allocation3 + $0x30] ss:$8 sps:$4 sm:$0xff]  }
  0xcb   :  { %959 = vmatmul.mubr.bf16.gmra.mrb[60].mxu0 %v291_v34  ;;  %v259_v34 = vpack.c.bf16 %v169_v32, %v168_v31  ;;  %v5163_v31 = vld [vmem:[#allocation3 + $0x44] ss:$8 sps:$4 sm:$0xff]   ;;  %v5165_v32 = vld [vmem:[#allocation3 + $0x40] ss:$8 sps:$4 sm:$0xff]  }
  0xcc   :  { %1001 = vmatprep.mubr.bf16.mxu0 %v219_v35  ;;  %v136_v35 = vld [vmem:[%s6823_s0 + $0x82] sm:$0xff] }
  0xcd   :  { %v258_v39 = vpack.c.bf16 %v137_v36, %v136_v35  ;;  %v189_v35 = vld [vmem:[%s6823_s0 + $0x2c] sm:$0xff] }
  0xce   :  { %v5168_v36 = vld [vmem:[#allocation3 + $0x50] ss:$8 sps:$4 sm:$0xff]  }
  0xd3   :  { %1002 = vmatmul.mubr.bf16.vlgmr.msra.gmra.mrb[0].mxu0 %v218_v40  ;;  %v264_v40 = vpack.c.bf16 %v171_v38, %v170_v37  ;;  %v5169_v38 = vld [vmem:[#allocation3 + $0x64] ss:$8 sps:$4 sm:$0xff]  }
  0xd4   :  { %1011 = vmatprep.mubr.bf16.mxu0 %v224_v41  ;;  %1163 = vmatpush1.bf16.msra.mxu0 %v5127_v42  ;;  %v138_v41 = vld [vmem:[%s6823_s0 + $0x92] sm:$0xff]  ;;  %v139_v42 = vld [vmem:[%s6823_s0 + $0x9a] sm:$0xff] }
  0xd5   :  { %1164 = vmatprep.subr.bf16.mxu0 %v5132_v43  ;;  %v172_v43 = vld [vmem:[%s6823_s0 + $0xa3] sm:$0xff]  ;;  %v263_v45 = vpack.c.bf16 %v139_v42, %v138_v41  ;;  %v190_v41 = vld [vmem:[%s6823_s0 + $0x34] sm:$0xff] }
  0xd6   :  { %v191_v42 = vld [vmem:[%s6823_s0 + $0x3c] sm:$0xff] }
  0xd8   :  { %1165 = vmatpush1.bf16.msra.mxu0 %v5130_v46  ;;  %v269_v46 = vpack.c.bf16 %v173_v44, %v172_v43  ;;  %v235_v43 = vpack.c.bf16 %v191_v42, %v190_v41  ;;  %v192_v44 = vld [vmem:[%s6823_s0 + $0x44] sm:$0xff] }
  0xd9   :  { %1166 = vmatprep.subr.bf16.mxu0 %v5135_v49  ;;  %v174_v49 = vld [vmem:[%s6823_s0 + $0xb3] sm:$0xff] }
  0xdb   :  { %1012 = vmatmul.mubr.bf16.gmra.mrb[4].mxu0 %v223_v50  ;;  %v175_v50 = vld [vmem:[%s6823_s0 + $0xbb] sm:$0xff] }
  0xdc   :  { %1021 = vmatprep.mubr.bf16.mxu0 %v229_v51  ;;  %1167 = vmatpush1.bf16.msra.mxu0 %v5133_v52  ;;  %v268_v51 = vpack.c.bf16 %v141_v48, %v140_v47  ;;  %v274_v52 = vpack.c.bf16 %v175_v50, %v174_v49  ;;  %v194_v47 = vld [vmem:[%s6823_s0 + $0x54] sm:$0xff]  ;;  %v195_v48 = vld [vmem:[%s6823_s0 + $0x5c] sm:$0xff]  ;;  %v196_v50 = vld [vmem:[%s6823_s0 + $0x64] sm:$0xff] }
  0xdd   :  { %1168 = vmatprep.subr.bf16.mxu0 %v5138_v53  ;;  %v142_v53 = vld [vmem:[%s6823_s0 + $0xb2] sm:$0xff]  ;;  %v245_v49 = vpack.c.bf16 %v195_v48, %v194_v47 }
  0xde   :  { %v273_v57 = vpack.c.bf16 %v143_v54, %v142_v53  ;;  %v198_v53 = vld [vmem:[%s6823_s0 + $0x74] sm:$0xff]  ;;  %v199_v54 = vld [vmem:[%s6823_s0 + $0x7c] sm:$0xff] }
  0xe0   :  { %1169 = vmatpush1.bf16.msra.mxu0 %v5136_v56  ;;  %v177_v56 = vld [vmem:[%s6823_s0 + $0xcb] sm:$0xff] }
  0xe1   :  { %1170 = vmatprep.subr.bf16.mxu0 %v5141_v59  ;;  %v279_v58 = vpack.c.bf16 %v177_v56, %v176_v55  ;;  %v144_v59 = vld [vmem:[%s6823_s0 + $0xc2] sm:$0xff]  ;;  %v255_v55 = vpack.c.bf16 %v199_v54, %v198_v53 }
  0xe2   :  { %v200_v56 = vld [vmem:[%s6823_s0 + $0x84] sm:$0xff] }
  0xe3   :  { %1022 = vmatmul.mubr.bf16.gmra.mrb[8].mxu0 %v228_v60  ;;  %v145_v60 = vld [vmem:[%s6823_s0 + $0xca] sm:$0xff] }
  0xe4   :  { %1031 = vmatprep.mubr.bf16.mxu0 %v234_v61  ;;  %1171 = vmatpush1.bf16.msra.mxu0 %v5139_v62  ;;  %v178_v61 = vld [vmem:[%s6823_s0 + $0xd3] sm:$0xff]  ;;  %v179_v62 = vld [vmem:[%s6823_s0 + $0xdb] sm:$0xff] }
  0xe5   :  { %1172 = vmatprep.subr.bf16.mxu0 %v5144_v63  ;;  %v278_v63 = vpack.c.bf16 %v145_v60, %v144_v59  ;;  %v284_v0 = vpack.c.bf16 %v179_v62, %v178_v61  ;;  %v202_v59 = vld [vmem:[%s6823_s0 + $0x94] sm:$0xff]  ;;  %v203_v60 = vld [vmem:[%s6823_s0 + $0x9c] sm:$0xff]  ;;  %v204_v62 = vld [vmem:[%s6823_s0 + $0xa4] sm:$0xff] }
  0xe6   :  { %v265_v61 = vpack.c.bf16 %v203_v60, %v202_v59 }
  0xe8   :  { %1173 = vmatpush1.bf16.msra.mxu0 %v5142_v2  ;;  %v147_v2 = vld [vmem:[%s6823_s0 + $0xda] sm:$0xff] }
  0xe9   :  { %1174 = vmatprep.subr.bf16.mxu0 %v5147_v5  ;;  %v283_v5 = vpack.c.bf16 %v147_v2, %v146_v1  ;;  %v206_v1 = vld [vmem:[%s6823_s0 + $0xb4] sm:$0xff]  ;;  %v207_v2 = vld [vmem:[%s6823_s0 + $0xbc] sm:$0xff] }
  0xeb   :  { %1032 = vmatmul.mubr.bf16.gmra.mrb[12].mxu0 %v233_v6  ;;  %v289_v6 = vpack.c.bf16 %v181_v4, %v180_v3  ;;  %v5174_v3 = vld [vmem:[#allocation3 + $0x70] ss:$8 sps:$4 sm:$0xff]   ;;  %v275_v4 = vpack.c.bf16 %v207_v2, %v206_v1 }
  0xec   :  { %1041 = vmatprep.mubr.bf16.mxu0 %v239_v7  ;;  %1175 = vmatpush1.bf16.msra.mxu0 %v5145_v8  ;;  %v148_v7 = vld [vmem:[%s6823_s0 + $0xe2] sm:$0xff]  ;;  %v149_v8 = vld [vmem:[%s6823_s0 + $0xea] sm:$0xff] }
  0xed   :  { %1176 = vmatprep.subr.bf16.mxu0 %v5150_v9  ;;  %v182_v9 = vld [vmem:[%s6823_s0 + $0xf3] sm:$0xff]  ;;  %v288_v11 = vpack.c.bf16 %v149_v8, %v148_v7  ;;  %v208_v8 = vld [vmem:[%s6823_s0 + $0xc4] sm:$0xff] }
  0xee   :  { %v5178_v7 = vld [vmem:[#allocation3 + $0x94] ss:$8 sps:$4 sm:$0xff]  }
  0xf0   :  { %1177 = vmatpush1.bf16.msra.mxu0 %v5148_v12  ;;  %v294_v12 = vpack.c.bf16 %v183_v10, %v182_v9  ;;  %v209_v9 = vld [vmem:[%s6823_s0 + $0xcc] sm:$0xff] }
  0xf1   :  { %v5180_v10 = vld [vmem:[#allocation3 + $0x90] ss:$8 sps:$4 sm:$0xff]  }
  0xf3   :  { %1042 = vmatmul.mubr.bf16.gmra.mrb[16].mxu0 %v238_v15  ;;  %v293_v15 = vpack.c.bf16 %v151_v14, %v150_v13  ;;  %v5183_v13 = vld [vmem:[#allocation3 + $0xa0] ss:$8 sps:$4 sm:$0xff]   ;;  %v5184_v14 = vld [vmem:[#allocation3 + $0xb4] ss:$8 sps:$4 sm:$0xff]  }
  0xf4   :  { %1051 = vmatprep.mubr.bf16.mxu0 %v244_v16  ;;  %v5151_v16 = vld [vmem:[#allocation3 + $0x4] ss:$8 sps:$4 sm:$0xff]  }
  0xf5   :  { %2429 = vmatprep.subr.bf16.mxu1 %v5151_v16  ;;  %v211_v16 = vld [vmem:[%s6823_s0 + $0xdc] sm:$0xff] }
  0xf6   :  { %2430 = vmatpush1.bf16.msra.mxu1 %v5153_v17  ;;  %v5186_v17 = vld [vmem:[#allocation3 + $0xb0] ss:$8 sps:$4 sm:$0xff]  }
  0xf7   :  { %2431 = vmatprep.subr.bf16.mxu1 %v5154_v18 }
  0xfb   :  { %1052 = vmatmul.mubr.bf16.gmra.mrb[20].mxu0 %v243_v21  ;;  %v185_v21 = vld [vmem:[%s6823_s0 + $0xc] sm:$0xff] }
  0xfc   :  { %1061 = vmatprep.mubr.bf16.mxu0 %v249_v22  ;;  %v5156_v22 = vld [vmem:[#allocation3 + $0x10] ss:$8 sps:$4 sm:$0xff]   ;;  %v220_v23 = vpack.c.bf16 %v185_v21, %v184_v20  ;;  %v5187_v20 = vld [vmem:[#allocation3 + $0xc4] ss:$8 sps:$4 sm:$0xff]   ;;  %v5189_v21 = vld [vmem:[#allocation3 + $0xc0] ss:$8 sps:$4 sm:$0xff]  }
  0xfd   :  { %2432 = vmatpush1.bf16.msra.mxu1 %v5156_v22  ;;  %v5190_v22 = vld [vmem:[#allocation3 + $0xd4] ss:$8 sps:$4 sm:$0xff]  }
  0xfe   :  { %2433 = vmatprep.subr.bf16.mxu1 %v5157_v24  ;;  %v213_v24 = vld [vmem:[%s6823_s0 + $0xec] sm:$0xff] }
 0x101   :  { %2434 = vmatpush1.bf16.msra.mxu1 %v5159_v25  ;;  %v5192_v25 = vld [vmem:[#allocation3 + $0xd0] ss:$8 sps:$4 sm:$0xff]  }
 0x102   :  { %2435 = vmatprep.subr.bf16.mxu1 %v5160_v26 }
 0x103   :  { %1062 = vmatmul.mubr.bf16.gmra.mrb[24].mxu0 %v248_v27  ;;  %v186_v27 = vld [vmem:[%s6823_s0 + $0x14] sm:$0xff] }
 0x104   :  { %1071 = vmatprep.mubr.bf16.mxu0 %v254_v28  ;;  %v187_v28 = vld [vmem:[%s6823_s0 + $0x1c] sm:$0xff] }
 0x105   :  { %v225_v30 = vpack.c.bf16 %v187_v28, %v186_v27  ;;  %2436 = vmatpush1.bf16.msra.mxu1 %v5162_v29  ;;  %v5193_v27 = vld [vmem:[#allocation3 + $0xe4] ss:$8 sps:$4 sm:$0xff]   ;;  %v5195_v28 = vld [vmem:[#allocation3 + $0xe0] ss:$8 sps:$4 sm:$0xff]   ;;  %v5196_v29 = vld [vmem:[#allocation3 + $0xf4] ss:$8 sps:$4 sm:$0xff]  }
 0x106   :  { %2437 = vmatprep.subr.bf16.mxu1 %v5163_v31  ;;  %v215_v31 = vld [vmem:[%s6823_s0 + $0xfc] sm:$0xf] }
 0x109   :  { %2438 = vmatpush1.bf16.msra.mxu1 %v5165_v32  ;;  %v5198_v32 = vld [vmem:[#allocation3 + $0xf0] ss:$8 sps:$4 sm:$0xff]  }
 0x10b   :  { %1072 = vmatmul.mubr.bf16.gmra.mrb[28].mxu0 %v253_v33  ;;  %v5166_v33 = vld [vmem:[#allocation3 + $0x54] ss:$8 sps:$4 sm:$0xff]  }
 0x10c   :  { %1081 = vmatprep.mubr.bf16.mxu0 %v259_v34  ;;  %v188_v34 = vld [vmem:[%s6823_s0 + $0x24] sm:$0xff]  ;;  %2439 = vmatprep.subr.bf16.mxu1 %v5166_v33 }
 0x10d   :  { %v230_v37 = vpack.c.bf16 %v189_v35, %v188_v34  ;;  %2440 = vmatpush1.bf16.msra.mxu1 %v5168_v36  ;;  %v5201_v34 = vld [vmem:[#allocation3 + $0x104] ss:$8 sps:$4 sm:$0xff]  }
 0x10e   :  { %2441 = vmatprep.subr.bf16.mxu1 %v5169_v38 }
 0x113   :  { %1082 = vmatmul.mubr.bf16.gmra.mrb[32].mxu0 %v258_v39  ;;  %v5171_v39 = vld [vmem:[#allocation3 + $0x60] ss:$8 sps:$4 sm:$0xff]  }
 0x114   :  { %1091 = vmatprep.mubr.bf16.mxu0 %v264_v40  ;;  %v5172_v40 = vld [vmem:[#allocation3 + $0x74] ss:$8 sps:$4 sm:$0xff]   ;;  %2442 = vmatpush1.bf16.msra.mxu1 %v5171_v39 }
 0x115   :  { %2443 = vmatprep.subr.bf16.mxu1 %v5172_v40 }
 0x118   :  { %2444 = vmatpush1.bf16.msra.mxu1 %v5174_v3 }
 0x11b   :  { %1092 = vmatmul.mubr.bf16.gmra.mrb[36].mxu0 %v263_v45  ;;  %v193_v45 = vld [vmem:[%s6823_s0 + $0x4c] sm:$0xff] }
 0x11c   :  { %1101 = vmatprep.mubr.bf16.mxu0 %v269_v46  ;;  %v240_v46 = vpack.c.bf16 %v193_v45, %v192_v44  ;;  %v6175_v44 = vld [vmem:[%s6830_s7] ss:$0 sm:$0xff] }
 0x123   :  { %1102 = vmatmul.mubr.bf16.gmra.mrb[40].mxu0 %v268_v51  ;;  %v197_v51 = vld [vmem:[%s6823_s0 + $0x6c] sm:$0xff] }
 0x124   :  { %1111 = vmatprep.mubr.bf16.mxu0 %v274_v52  ;;  %v250_v52 = vpack.c.bf16 %v197_v51, %v196_v50 }
 0x12b   :  { %1112 = vmatmul.mubr.bf16.gmra.mrb[44].mxu0 %v273_v57  ;;  %v201_v57 = vld [vmem:[%s6823_s0 + $0x8c] sm:$0xff] }
 0x12c   :  { %1121 = vmatprep.mubr.bf16.mxu0 %v279_v58  ;;  %v260_v58 = vpack.c.bf16 %v201_v57, %v200_v56 }
 0x133   :  { %1122 = vmatmul.mubr.bf16.gmra.mrb[48].mxu0 %v278_v63  ;;  %v205_v63 = vld [vmem:[%s6823_s0 + $0xac] sm:$0xff] }
 0x134   :  { %1131 = vmatprep.mubr.bf16.mxu0 %v284_v0  ;;  %v270_v0 = vpack.c.bf16 %v205_v63, %v204_v62 }
 0x13b   :  { %1132 = vmatmul.mubr.bf16.gmra.mrb[52].mxu0 %v283_v5  ;;  %v5175_v5 = vld [vmem:[#allocation3 + $0x84] ss:$8 sps:$4 sm:$0xff]  }
 0x13c   :  { %1141 = vmatprep.mubr.bf16.mxu0 %v289_v6  ;;  %v5177_v6 = vld [vmem:[#allocation3 + $0x80] ss:$8 sps:$4 sm:$0xff]   ;;  %2445 = vmatprep.subr.bf16.mxu1 %v5175_v5 }
 0x13d   :  { %2446 = vmatpush1.bf16.msra.mxu1 %v5177_v6 }
 0x13e   :  { %2447 = vmatprep.subr.bf16.mxu1 %v5178_v7 }
 0x141   :  { %2448 = vmatpush1.bf16.msra.mxu1 %v5180_v10 }
 0x143   :  { %1142 = vmatmul.mubr.bf16.gmra.mrb[56].mxu0 %v288_v11  ;;  %v280_v11 = vpack.c.bf16 %v209_v9, %v208_v8 }
 0x144   :  { %1151 = vmatprep.mubr.bf16.mxu0 %v294_v12  ;;  %v5181_v12 = vld [vmem:[#allocation3 + $0xa4] ss:$8 sps:$4 sm:$0xff]  }
 0x145   :  { %2449 = vmatprep.subr.bf16.mxu1 %v5181_v12 }
 0x146   :  { %2450 = vmatpush1.bf16.msra.mxu1 %v5183_v13 }
 0x147   :  { %2451 = vmatprep.subr.bf16.mxu1 %v5184_v14 }
 0x14a   :  { %2452 = vmatpush1.bf16.msra.mxu1 %v5186_v17 }
 0x14b   :  { %1152 = vmatmul.mubr.bf16.gmra.mrb[60].mxu0 %v293_v15  ;;  %v210_v15 = vld [vmem:[%s6823_s0 + $0xd4] sm:$0xff]  ;;  %2453 = vmatprep.subr.bf16.mxu1 %v5187_v20 }
 0x14c   :  { %1194 = vmatprep.mubr.bf16.mxu0 %v5354_v19  ;;  %v285_v18 = vpack.c.bf16 %v211_v16, %v210_v15 }
 0x14e   :  { %2454 = vmatpush1.bf16.msra.mxu1 %v5189_v21 }
 0x14f   :  { %2455 = vmatprep.subr.bf16.mxu1 %v5190_v22 }
 0x152   :  { %2456 = vmatpush1.bf16.msra.mxu1 %v5192_v25 }
 0x153   :  { %1195 = vmatmul.mubr.bf16.vlgmr.msra.gmra.mrb[0].mxu0 %v220_v23  ;;  %v212_v23 = vld [vmem:[%s6823_s0 + $0xe4] sm:$0xff]  ;;  %2457 = vmatprep.subr.bf16.mxu1 %v5193_v27 }
 0x154   :  { %1204 = vmatprep.mubr.bf16.mxu0 %v5354_v19  ;;  %v290_v26 = vpack.c.bf16 %v213_v24, %v212_v23 }
 0x156   :  { %2458 = vmatpush1.bf16.msra.mxu1 %v5195_v28 }
 0x157   :  { %2459 = vmatprep.subr.bf16.mxu1 %v5196_v29 }
 0x15a   :  { %2460 = vmatpush1.bf16.msra.mxu1 %v5198_v32 }
 0x15b   :  { %1205 = vmatmul.mubr.bf16.gmra.mrb[4].mxu0 %v225_v30  ;;  %v214_v30 = vld [vmem:[%s6823_s0 + $0xf4] sm:$0xff]  ;;  %2620 = vmatprep.subr.bf16.mxu1 %v5201_v34 }
 0x15c   :  { %1214 = vmatprep.mubr.bf16.mxu0 %v5354_v19  ;;  %v295_v33 = vpack.c.bf16 %v215_v31, %v214_v30 }
 0x163   :  { %1215 = vmatmul.mubr.bf16.gmra.mrb[8].mxu0 %v230_v37 }
 0x164   :  { %1224 = vmatprep.mubr.bf16.mxu0 %v5354_v19 }
 0x16b   :  { %1225 = vmatmul.mubr.bf16.gmra.mrb[12].mxu0 %v235_v43 }
 0x16c   :  { %1234 = vmatprep.mubr.bf16.mxu0 %v5354_v19 }
 0x173   :  { %1235 = vmatmul.mubr.bf16.gmra.mrb[16].mxu0 %v240_v46 }
 0x174   :  { %1244 = vmatprep.mubr.bf16.mxu0 %v5354_v19 }
 0x17b   :  { %1245 = vmatmul.mubr.bf16.gmra.mrb[20].mxu0 %v245_v49 }
 0x17c   :  { %1254 = vmatprep.mubr.bf16.mxu0 %v5354_v19 }
 0x183   :  { %1255 = vmatmul.mubr.bf16.gmra.mrb[24].mxu0 %v250_v52 }
 0x184   :  { %1264 = vmatprep.mubr.bf16.mxu0 %v5354_v19 }
 0x18b   :  { %1265 = vmatmul.mubr.bf16.gmra.mrb[28].mxu0 %v255_v55 }
 0x18c   :  { %1274 = vmatprep.mubr.bf16.mxu0 %v5354_v19 }
 0x193   :  { %1275 = vmatmul.mubr.bf16.gmra.mrb[32].mxu0 %v260_v58 }
 0x194   :  { %1284 = vmatprep.mubr.bf16.mxu0 %v5354_v19 }
 0x19b   :  { %1285 = vmatmul.mubr.bf16.gmra.mrb[36].mxu0 %v265_v61 }
 0x19c   :  { %1294 = vmatprep.mubr.bf16.mxu0 %v5354_v19 }
 0x1a3   :  { %1295 = vmatmul.mubr.bf16.gmra.mrb[40].mxu0 %v270_v0 }
 0x1a4   :  { %1304 = vmatprep.mubr.bf16.mxu0 %v5354_v19 }
 0x1ab   :  { %1305 = vmatmul.mubr.bf16.gmra.mrb[44].mxu0 %v275_v4 }
 0x1ac   :  { %1314 = vmatprep.mubr.bf16.mxu0 %v5354_v19 }
 0x1b3   :  { %1315 = vmatmul.mubr.bf16.gmra.mrb[48].mxu0 %v280_v11 }
 0x1b4   :  { %1324 = vmatprep.mubr.bf16.mxu0 %v5354_v19 }
 0x1bb   :  { %1325 = vmatmul.mubr.bf16.gmra.mrb[52].mxu0 %v285_v18 }
 0x1bc   :  { %1334 = vmatprep.mubr.bf16.mxu0 %v5354_v19 }
 0x1c3   :  { %1335 = vmatmul.mubr.bf16.gmra.mrb[56].mxu0 %v290_v26 }
 0x1c4   :  { %1344 = vmatprep.mubr.bf16.mxu0 %v5354_v19 }
 0x1cb   :  { %1345 = vmatmul.mubr.bf16.gmra.mrb[60].mxu0 %v295_v33 }
 0x226   :  { %v1196_v35 = vpop.f32.mrb[0].mxu0 }
 0x227   :  { %v1198_v36 = vpop.f32.mrb[1].mxu0 }
 0x228   :  { %v1355_v37 = vmax.f32 %v1196_v35, %v1198_v36  ;;  %v1200_v38 = vpop.f32.mrb[2].mxu0 }
 0x229   :  { %v1202_v39 = vpop.f32.mrb[3].mxu0 }
 0x22a   :  { %v1356_v40 = vmax.f32 %v1200_v38, %v1202_v39  ;;  %v1420_v41 = vrot.slane %v1355_v37, 1  ;;  %v5199_v39 = vld [vmem:[#allocation3 + $0x100] ss:$8 sps:$4 sm:$0xff]  }
 0x22c   :  { %v1421_v42 = vrot.slane %v1356_v40, 1 }
 0x22e   :  { %v1422_v43 = vsel %vm1419_vm0, %v1420_v41, %v1421_v42  ;;  %v1206_v45 = vpop.f32.mrb[4].mxu0 }
 0x22f   :  { %v1515_v46 = vmax.f32 %v1355_v37, %v1422_v43  ;;  %v1208_v47 = vpop.f32.mrb[5].mxu0  ;;  %v5204_v43 = vld [vmem:[#allocation3 + $0x114] ss:$8 sps:$4 sm:$0xff]  }
 0x230   :  { %v1357_v48 = vmax.f32 %v1206_v45, %v1208_v47  ;;  %v1210_v49 = vpop.f32.mrb[6].mxu0 }
 0x231   :  { %v1554_v50 = vadd.f32 %v6175_v44, %v1515_v46  ;;  %v1212_v51 = vpop.f32.mrb[7].mxu0 }
 0x232   :  { %v1423_v52 = vrot.slane %v1357_v48, 1  ;;  %v1358_v53 = vmax.f32 %v1210_v49, %v1212_v51 }
 0x233   :  { %vm1586_vm1 = vcmp.gt.f32.partialorder %v1554_v50, 0.0  ;;  %v1618_v54 = vmul.f32 0.01, %v1554_v50 }
 0x234   :  { %v1424_v55 = vsel %vm1419_vm0, %v1421_v42, %v1423_v52  ;;  %v1425_v56 = vrot.slane %v1358_v53, 1 }
 0x235   :  { %v6179_v57 = vsel %vm1586_vm1, %v1554_v50, %v1618_v54  ;;  %v1516_v58 = vmax.f32 %v1356_v40, %v1424_v55  ;;  %v5207_v55 = vld [vmem:[#allocation3 + $0x124] ss:$8 sps:$4 sm:$0xff]  }
 0x236   :  { %1682 = vst [vmem:[#allocation2] sm:$0xff] %v6179_v57  ;;  %v1426_v59 = vsel %vm1419_vm0, %v1423_v52, %v1425_v56  ;;  %v1216_v60 = vpop.f32.mrb[8].mxu0  ;;  %v5202_v52 = vld [vmem:[#allocation3 + $0x110] ss:$8 sps:$4 sm:$0xff]  }
 0x237   :  { %v1555_v61 = vadd.f32 %v6175_v44, %v1516_v58  ;;  %v1517_v62 = vmax.f32 %v1357_v48, %v1426_v59  ;;  %v1218_v63 = vpop.f32.mrb[9].mxu0 }
 0x238   :  { %v1359_v0 = vmax.f32 %v1216_v60, %v1218_v63  ;;  %v1220_v1 = vpop.f32.mrb[10].mxu0 }
 0x239   :  { %vm1587_vm2 = vcmp.gt.f32.partialorder %v1555_v61, 0.0  ;;  %v1619_v2 = vmul.f32 0.01, %v1555_v61  ;;  %v1556_v3 = vadd.f32 %v6175_v44, %v1517_v62  ;;  %v1222_v4 = vpop.f32.mrb[11].mxu0 }
 0x23a   :  { %v1427_v5 = vrot.slane %v1359_v0, 1  ;;  %v1360_v6 = vmax.f32 %v1220_v1, %v1222_v4 }
 0x23b   :  { %v1651_v7 = vsel %vm1587_vm2, %v1555_v61, %v1619_v2  ;;  %vm1588_vm3 = vcmp.gt.f32.partialorder %v1556_v3, 0.0  ;;  %v1620_v8 = vmul.f32 0.01, %v1556_v3  ;;  %v5205_v2 = vld [vmem:[#allocation3 + $0x120] ss:$8 sps:$4 sm:$0xff]  }
 0x23c   :  { %1683 = vst [vmem:[#allocation2 + $0x8] sm:$0xff] %v1651_v7  ;;  %v1428_v9 = vsel %vm1419_vm0, %v1425_v56, %v1427_v5  ;;  %v1429_v10 = vrot.slane %v1360_v6, 1  ;;  %v1869_v11 = vpack.c.bf16 %v1651_v7, %v6179_v57 }
 0x23d   :  { %v6187_v12 = vsel %vm1588_vm3, %v1556_v3, %v1620_v8  ;;  %v1518_v13 = vmax.f32 %v1358_v53, %v1428_v9 }
 0x23e   :  { %1684 = vst [vmem:[#allocation2 + $0x10] sm:$0xff] %v6187_v12  ;;  %v1430_v14 = vsel %vm1419_vm0, %v1427_v5, %v1429_v10  ;;  %v1226_v15 = vpop.f32.mrb[12].mxu0 }
 0x23f   :  { %v1557_v16 = vadd.f32 %v6175_v44, %v1518_v13  ;;  %v1519_v17 = vmax.f32 %v1359_v0, %v1430_v14  ;;  %v1228_v18 = vpop.f32.mrb[13].mxu0  ;;  %v5208_v14 = vld [vmem:[#allocation3 + $0x130] ss:$8 sps:$4 sm:$0xff]  }
 0x240   :  { %v1361_v20 = vmax.f32 %v1226_v15, %v1228_v18  ;;  %v1230_v21 = vpop.f32.mrb[14].mxu0 }
 0x241   :  { %vm1589_vm4 = vcmp.gt.f32.partialorder %v1557_v16, 0.0  ;;  %v1621_v22 = vmul.f32 0.01, %v1557_v16  ;;  %v1558_v23 = vadd.f32 %v6175_v44, %v1519_v17  ;;  %v1232_v24 = vpop.f32.mrb[15].mxu0  ;;  %v5213_v17 = vld [vmem:[#allocation3 + $0x144] ss:$8 sps:$4 sm:$0xff]  }
 0x242   :  { %v1431_v25 = vrot.slane %v1361_v20, 1  ;;  %v1362_v26 = vmax.f32 %v1230_v21, %v1232_v24 }
 0x243   :  { %v6193_v27 = vsel %vm1589_vm4, %v1557_v16, %v1621_v22  ;;  %vm1590_vm5 = vcmp.gt.f32.partialorder %v1558_v23, 0.0  ;;  %v1622_v28 = vmul.f32 0.01, %v1558_v23  ;;  %v1745_v34 = vld [vmem:[#allocation2 + $0x2] sm:$0xff] }
 0x244   :  { %1685 = vst [vmem:[#allocation2 + $0x18] sm:$0xff] %v6193_v27  ;;  %v1432_v29 = vsel %vm1419_vm0, %v1429_v10, %v1431_v25  ;;  %v1433_v30 = vrot.slane %v1362_v26, 1  ;;  %v1874_v31 = vpack.c.bf16 %v6193_v27, %v6187_v12 }
 0x245   :  { %v6199_v32 = vsel %vm1590_vm5, %v1558_v23, %v1622_v28  ;;  %v1520_v33 = vmax.f32 %v1360_v6, %v1432_v29  ;;  %v1746_v35 = vld [vmem:[#allocation2 + $0xa] sm:$0xff]  ;;  %v5210_v6 = vld [vmem:[#allocation3 + $0x134] ss:$8 sps:$4 sm:$0xff]  }
 0x246   :  { %1686 = vst [vmem:[#allocation2 + $0x20] sm:$0xff] %v6199_v32  ;;  %v1434_v36 = vsel %vm1419_vm0, %v1431_v25, %v1433_v30  ;;  %v1236_v37 = vpop.f32.mrb[16].mxu0  ;;  %v1870_v38 = vpack.c.bf16 %v1746_v35, %v1745_v34  ;;  %v5211_v29 = vld [vmem:[#allocation3 + $0x140] ss:$8 sps:$4 sm:$0xff]  }
 0x247   :  { %v1559_v40 = vadd.f32 %v6175_v44, %v1520_v33  ;;  %v1521_v41 = vmax.f32 %v1361_v20, %v1434_v36  ;;  %v1238_v42 = vpop.f32.mrb[17].mxu0  ;;  %v5216_v33 = vld [vmem:[#allocation3 + $0x154] ss:$8 sps:$4 sm:$0xff]  }
 0x248   :  { %v1363_v45 = vmax.f32 %v1236_v37, %v1238_v42  ;;  %v1240_v46 = vpop.f32.mrb[18].mxu0  ;;  %2461 = vmatprep.mubr.bf16.mxu1 %v1870_v38 }
 0x249   :  { %vm1591_vm6 = vcmp.gt.f32.partialorder %v1559_v40, 0.0  ;;  %v1623_v47 = vmul.f32 0.01, %v1559_v40  ;;  %v1560_v48 = vadd.f32 %v6175_v44, %v1521_v41  ;;  %v1242_v49 = vpop.f32.mrb[19].mxu0  ;;  %2462 = vmatmul.mubr.bf16.vlgmr.msra.gmra.mrb[0].mxu1 %v1869_v11  ;;  %v5214_v41 = vld [vmem:[#allocation3 + $0x150] ss:$8 sps:$4 sm:$0xff]  }
 0x24a   :  { %v1435_v50 = vrot.slane %v1363_v45, 1  ;;  %v1364_v51 = vmax.f32 %v1240_v46, %v1242_v49  ;;  %2621 = vmatpush1.bf16.msra.mxu1 %v5199_v39 }
 0x24b   :  { %v6205_v53 = vsel %vm1591_vm6, %v1559_v40, %v1623_v47  ;;  %vm1592_vm7 = vcmp.gt.f32.partialorder %v1560_v48, 0.0  ;;  %v1624_v54 = vmul.f32 0.01, %v1560_v48  ;;  %2622 = vmatprep.subr.bf16.mxu1 %v5204_v43  ;;  %v1747_v61 = vld [vmem:[#allocation2 + $0x12] sm:$0xff] }
 0x24c   :  { %1687 = vst [vmem:[#allocation2 + $0x28] sm:$0xff] %v6205_v53  ;;  %v1436_v56 = vsel %vm1419_vm0, %v1433_v30, %v1435_v50  ;;  %v1437_v57 = vrot.slane %v1364_v51, 1  ;;  %v1879_v58 = vpack.c.bf16 %v6205_v53, %v6199_v32 }
 0x24d   :  { %v6211_v59 = vsel %vm1592_vm7, %v1560_v48, %v1624_v54  ;;  %v1522_v60 = vmax.f32 %v1362_v26, %v1436_v56  ;;  %v1748_v62 = vld [vmem:[#allocation2 + $0x1a] sm:$0xff] }
 0x24e   :  { %1688 = vst [vmem:[#allocation2 + $0x30] sm:$0xff] %v6211_v59  ;;  %v1438_v63 = vsel %vm1419_vm0, %v1435_v50, %v1437_v57  ;;  %v1246_v0 = vpop.f32.mrb[20].mxu0  ;;  %v1875_v1 = vpack.c.bf16 %v1748_v62, %v1747_v61  ;;  %2623 = vmatpush1.bf16.msra.mxu1 %v5202_v52  ;;  %v5217_v56 = vld [vmem:[#allocation3 + $0x160] ss:$8 sps:$4 sm:$0xff]  }
 0x24f   :  { %v1561_v3 = vadd.f32 %v6175_v44, %v1522_v60  ;;  %v1523_v4 = vmax.f32 %v1363_v45, %v1438_v63  ;;  %v1248_v5 = vpop.f32.mrb[21].mxu0  ;;  %2624 = vmatprep.subr.bf16.mxu1 %v5207_v55  ;;  %v5219_v45 = vld [vmem:[#allocation3 + $0x164] ss:$8 sps:$4 sm:$0xff]   ;;  %v5222_v60 = vld [vmem:[#allocation3 + $0x174] ss:$8 sps:$4 sm:$0xff]  }
 0x250   :  { %v1365_v7 = vmax.f32 %v1246_v0, %v1248_v5  ;;  %v1250_v8 = vpop.f32.mrb[22].mxu0  ;;  %2471 = vmatprep.mubr.bf16.mxu1 %v1875_v1 }
 0x251   :  { %vm1593_vm8 = vcmp.gt.f32.partialorder %v1561_v3, 0.0  ;;  %v1625_v9 = vmul.f32 0.01, %v1561_v3  ;;  %v1562_v10 = vadd.f32 %v6175_v44, %v1523_v4  ;;  %v1252_v11 = vpop.f32.mrb[23].mxu0  ;;  %2472 = vmatmul.mubr.bf16.gmra.mrb[4].mxu1 %v1874_v31  ;;  %v5220_v4 = vld [vmem:[#allocation3 + $0x170] ss:$8 sps:$4 sm:$0xff]  }
 0x252   :  { %v1439_v12 = vrot.slane %v1365_v7, 1  ;;  %v1366_v13 = vmax.f32 %v1250_v8, %v1252_v11  ;;  %2625 = vmatpush1.bf16.msra.mxu1 %v5205_v2 }
 0x253   :  { %v6217_v15 = vsel %vm1593_vm8, %v1561_v3, %v1625_v9  ;;  %vm1594_vm9 = vcmp.gt.f32.partialorder %v1562_v10, 0.0  ;;  %v1626_v16 = vmul.f32 0.01, %v1562_v10  ;;  %2626 = vmatprep.subr.bf16.mxu1 %v5210_v6  ;;  %v1749_v24 = vld [vmem:[#allocation2 + $0x22] sm:$0xff] }
 0x254   :  { %1689 = vst [vmem:[#allocation2 + $0x38] sm:$0xff] %v6217_v15  ;;  %v1440_v18 = vsel %vm1419_vm0, %v1437_v57, %v1439_v12  ;;  %v1441_v20 = vrot.slane %v1366_v13, 1  ;;  %v1884_v21 = vpack.c.bf16 %v6217_v15, %v6211_v59 }
 0x255   :  { %v6223_v22 = vsel %vm1594_vm9, %v1562_v10, %v1626_v16  ;;  %v1524_v23 = vmax.f32 %v1364_v51, %v1440_v18  ;;  %v1750_v25 = vld [vmem:[#allocation2 + $0x2a] sm:$0xff] }
 0x256   :  { %1690 = vst [vmem:[#allocation2 + $0x40] sm:$0xff] %v6223_v22  ;;  %v1442_v26 = vsel %vm1419_vm0, %v1439_v12, %v1441_v20  ;;  %v1256_v27 = vpop.f32.mrb[24].mxu0  ;;  %v1880_v28 = vpack.c.bf16 %v1750_v25, %v1749_v24  ;;  %2627 = vmatpush1.bf16.msra.mxu1 %v5208_v14  ;;  %v5223_v18 = vld [vmem:[#allocation3 + $0x180] ss:$8 sps:$4 sm:$0xff]  }
 0x257   :  { %v1563_v30 = vadd.f32 %v6175_v44, %v1524_v23  ;;  %v1525_v31 = vmax.f32 %v1365_v7, %v1442_v26  ;;  %v1258_v32 = vpop.f32.mrb[25].mxu0  ;;  %2628 = vmatprep.subr.bf16.mxu1 %v5213_v17  ;;  %v5225_v7 = vld [vmem:[#allocation3 + $0x184] ss:$8 sps:$4 sm:$0xff]   ;;  %v5228_v23 = vld [vmem:[#allocation3 + $0x194] ss:$8 sps:$4 sm:$0xff]  }
 0x258   :  { %v1367_v34 = vmax.f32 %v1256_v27, %v1258_v32  ;;  %v1260_v35 = vpop.f32.mrb[26].mxu0  ;;  %2481 = vmatprep.mubr.bf16.mxu1 %v1880_v28 }
 0x259   :  { %vm1595_vm10 = vcmp.gt.f32.partialorder %v1563_v30, 0.0  ;;  %v1627_v36 = vmul.f32 0.01, %v1563_v30  ;;  %v1564_v37 = vadd.f32 %v6175_v44, %v1525_v31  ;;  %v1262_v38 = vpop.f32.mrb[27].mxu0  ;;  %2482 = vmatmul.mubr.bf16.gmra.mrb[8].mxu1 %v1879_v58  ;;  %v5226_v31 = vld [vmem:[#allocation3 + $0x190] ss:$8 sps:$4 sm:$0xff]  }
 0x25a   :  { %v1443_v39 = vrot.slane %v1367_v34, 1  ;;  %v1368_v40 = vmax.f32 %v1260_v35, %v1262_v38  ;;  %2629 = vmatpush1.bf16.msra.mxu1 %v5211_v29 }
 0x25b   :  { %v6229_v42 = vsel %vm1595_vm10, %v1563_v30, %v1627_v36  ;;  %vm1596_vm11 = vcmp.gt.f32.partialorder %v1564_v37, 0.0  ;;  %v1628_v43 = vmul.f32 0.01, %v1564_v37  ;;  %2630 = vmatprep.subr.bf16.mxu1 %v5216_v33  ;;  %v1751_v51 = vld [vmem:[#allocation2 + $0x32] sm:$0xff] }
 0x25c   :  { %1691 = vst [vmem:[#allocation2 + $0x48] sm:$0xff] %v6229_v42  ;;  %v1444_v46 = vsel %vm1419_vm0, %v1441_v20, %v1443_v39  ;;  %v1445_v47 = vrot.slane %v1368_v40, 1  ;;  %v1889_v48 = vpack.c.bf16 %v6229_v42, %v6223_v22 }
 0x25d   :  { %v6235_v49 = vsel %vm1596_vm11, %v1564_v37, %v1628_v43  ;;  %v1526_v50 = vmax.f32 %v1366_v13, %v1444_v46  ;;  %v1752_v52 = vld [vmem:[#allocation2 + $0x3a] sm:$0xff] }
 0x25e   :  { %1692 = vst [vmem:[#allocation2 + $0x50] sm:$0xff] %v6235_v49  ;;  %v1446_v53 = vsel %vm1419_vm0, %v1443_v39, %v1445_v47  ;;  %v1266_v54 = vpop.f32.mrb[28].mxu0  ;;  %v1885_v55 = vpack.c.bf16 %v1752_v52, %v1751_v51  ;;  %2631 = vmatpush1.bf16.msra.mxu1 %v5214_v41  ;;  %v5229_v46 = vld [vmem:[#allocation3 + $0x1a0] ss:$8 sps:$4 sm:$0xff]  }
 0x25f   :  { %v1565_v57 = vadd.f32 %v6175_v44, %v1526_v50  ;;  %v1527_v58 = vmax.f32 %v1367_v34, %v1446_v53  ;;  %v1268_v59 = vpop.f32.mrb[29].mxu0  ;;  %2632 = vmatprep.subr.bf16.mxu1 %v5219_v45  ;;  %v5231_v34 = vld [vmem:[#allocation3 + $0x1a4] ss:$8 sps:$4 sm:$0xff]   ;;  %v5234_v50 = vld [vmem:[#allocation3 + $0x1b4] ss:$8 sps:$4 sm:$0xff]  }
 0x260   :  { %v1369_v61 = vmax.f32 %v1266_v54, %v1268_v59  ;;  %v1270_v62 = vpop.f32.mrb[30].mxu0  ;;  %2491 = vmatprep.mubr.bf16.mxu1 %v1885_v55 }
 0x261   :  { %vm1597_vm12 = vcmp.gt.f32.partialorder %v1565_v57, 0.0  ;;  %v1629_v63 = vmul.f32 0.01, %v1565_v57  ;;  %v1566_v0 = vadd.f32 %v6175_v44, %v1527_v58  ;;  %v1272_v1 = vpop.f32.mrb[31].mxu0  ;;  %2492 = vmatmul.mubr.bf16.gmra.mrb[12].mxu1 %v1884_v21  ;;  %v5232_v58 = vld [vmem:[#allocation3 + $0x1b0] ss:$8 sps:$4 sm:$0xff]  }
 0x262   :  { %v1447_v2 = vrot.slane %v1369_v61, 1  ;;  %v1370_v3 = vmax.f32 %v1270_v62, %v1272_v1  ;;  %2633 = vmatpush1.bf16.msra.mxu1 %v5217_v56 }
 0x263   :  { %v6241_v5 = vsel %vm1597_vm12, %v1565_v57, %v1629_v63  ;;  %vm1598_vm13 = vcmp.gt.f32.partialorder %v1566_v0, 0.0  ;;  %v1630_v6 = vmul.f32 0.01, %v1566_v0  ;;  %2634 = vmatprep.subr.bf16.mxu1 %v5222_v60  ;;  %v1753_v13 = vld [vmem:[#allocation2 + $0x42] sm:$0xff] }
 0x264   :  { %1693 = vst [vmem:[#allocation2 + $0x58] sm:$0xff] %v6241_v5  ;;  %v1448_v8 = vsel %vm1419_vm0, %v1445_v47, %v1447_v2  ;;  %v1449_v9 = vrot.slane %v1370_v3, 1  ;;  %v1894_v10 = vpack.c.bf16 %v6241_v5, %v6235_v49 }
 0x265   :  { %v6247_v11 = vsel %vm1598_vm13, %v1566_v0, %v1630_v6  ;;  %v1528_v12 = vmax.f32 %v1368_v40, %v1448_v8  ;;  %v1754_v14 = vld [vmem:[#allocation2 + $0x4a] sm:$0xff] }
 0x266   :  { %1694 = vst [vmem:[#allocation2 + $0x60] sm:$0xff] %v6247_v11  ;;  %v1450_v15 = vsel %vm1419_vm0, %v1447_v2, %v1449_v9  ;;  %v1276_v16 = vpop.f32.mrb[32].mxu0  ;;  %v1890_v17 = vpack.c.bf16 %v1754_v14, %v1753_v13  ;;  %2635 = vmatpush1.bf16.msra.mxu1 %v5220_v4  ;;  %v5235_v8 = vld [vmem:[#allocation3 + $0x1c0] ss:$8 sps:$4 sm:$0xff]  }
 0x267   :  { %v1567_v20 = vadd.f32 %v6175_v44, %v1528_v12  ;;  %v1529_v21 = vmax.f32 %v1369_v61, %v1450_v15  ;;  %v1278_v22 = vpop.f32.mrb[33].mxu0  ;;  %2636 = vmatprep.subr.bf16.mxu1 %v5225_v7  ;;  %v5237_v61 = vld [vmem:[#allocation3 + $0x1c4] ss:$8 sps:$4 sm:$0xff]   ;;  %v5240_v12 = vld [vmem:[#allocation3 + $0x1d4] ss:$8 sps:$4 sm:$0xff]  }
 0x268   :  { %v1371_v24 = vmax.f32 %v1276_v16, %v1278_v22  ;;  %v1280_v25 = vpop.f32.mrb[34].mxu0  ;;  %2501 = vmatprep.mubr.bf16.mxu1 %v1890_v17 }
 0x269   :  { %vm1599_vm14 = vcmp.gt.f32.partialorder %v1567_v20, 0.0  ;;  %v1631_v26 = vmul.f32 0.01, %v1567_v20  ;;  %v1568_v27 = vadd.f32 %v6175_v44, %v1529_v21  ;;  %v1282_v28 = vpop.f32.mrb[35].mxu0  ;;  %2502 = vmatmul.mubr.bf16.gmra.mrb[16].mxu1 %v1889_v48  ;;  %v5238_v21 = vld [vmem:[#allocation3 + $0x1d0] ss:$8 sps:$4 sm:$0xff]  }
 0x26a   :  { %v1451_v29 = vrot.slane %v1371_v24, 1  ;;  %v1372_v30 = vmax.f32 %v1280_v25, %v1282_v28  ;;  %2637 = vmatpush1.bf16.msra.mxu1 %v5223_v18 }
 0x26b   :  { %v6253_v32 = vsel %vm1599_vm14, %v1567_v20, %v1631_v26  ;;  %vm1600_vm15 = vcmp.gt.f32.partialorder %v1568_v27, 0.0  ;;  %v1632_v33 = vmul.f32 0.01, %v1568_v27  ;;  %2638 = vmatprep.subr.bf16.mxu1 %v5228_v23  ;;  %v1755_v40 = vld [vmem:[#allocation2 + $0x52] sm:$0xff] }
 0x26c   :  { %1695 = vst [vmem:[#allocation2 + $0x68] sm:$0xff] %v6253_v32  ;;  %v1452_v35 = vsel %vm1419_vm0, %v1449_v9, %v1451_v29  ;;  %v1453_v36 = vrot.slane %v1372_v30, 1  ;;  %v1899_v37 = vpack.c.bf16 %v6253_v32, %v6247_v11 }
 0x26d   :  { %v6259_v38 = vsel %vm1600_vm15, %v1568_v27, %v1632_v33  ;;  %v1530_v39 = vmax.f32 %v1370_v3, %v1452_v35  ;;  %v1756_v41 = vld [vmem:[#allocation2 + $0x5a] sm:$0xff] }
 0x26e   :  { %1696 = vst [vmem:[#allocation2 + $0x70] sm:$0xff] %v6259_v38  ;;  %v1454_v42 = vsel %vm1419_vm0, %v1451_v29, %v1453_v36  ;;  %v1286_v43 = vpop.f32.mrb[36].mxu0  ;;  %v1895_v45 = vpack.c.bf16 %v1756_v41, %v1755_v40  ;;  %2639 = vmatpush1.bf16.msra.mxu1 %v5226_v31  ;;  %v5241_v35 = vld [vmem:[#allocation3 + $0x1e0] ss:$8 sps:$4 sm:$0xff]  }
 0x26f   :  { %v1569_v47 = vadd.f32 %v6175_v44, %v1530_v39  ;;  %v1531_v48 = vmax.f32 %v1371_v24, %v1454_v42  ;;  %v1288_v49 = vpop.f32.mrb[37].mxu0  ;;  %2640 = vmatprep.subr.bf16.mxu1 %v5231_v34  ;;  %v5243_v24 = vld [vmem:[#allocation3 + $0x1e4] ss:$8 sps:$4 sm:$0xff]   ;;  %v5246_v39 = vld [vmem:[#allocation3 + $0x1f4] ss:$8 sps:$4 sm:$0xff]  }
 0x270   :  { %v1373_v51 = vmax.f32 %v1286_v43, %v1288_v49  ;;  %v1290_v52 = vpop.f32.mrb[38].mxu0  ;;  %2511 = vmatprep.mubr.bf16.mxu1 %v1895_v45 }
 0x271   :  { %vm1601_vm1 = vcmp.gt.f32.partialorder %v1569_v47, 0.0  ;;  %v1633_v53 = vmul.f32 0.01, %v1569_v47  ;;  %v1570_v54 = vadd.f32 %v6175_v44, %v1531_v48  ;;  %v1292_v55 = vpop.f32.mrb[39].mxu0  ;;  %2512 = vmatmul.mubr.bf16.gmra.mrb[20].mxu1 %v1894_v10  ;;  %v5244_v48 = vld [vmem:[#allocation3 + $0x1f0] ss:$8 sps:$4 sm:$0xff]  }
 0x272   :  { %v1455_v56 = vrot.slane %v1373_v51, 1  ;;  %v1374_v57 = vmax.f32 %v1290_v52, %v1292_v55  ;;  %2641 = vmatpush1.bf16.msra.mxu1 %v5229_v46 }
 0x273   :  { %v6265_v59 = vsel %vm1601_vm1, %v1569_v47, %v1633_v53  ;;  %vm1602_vm2 = vcmp.gt.f32.partialorder %v1570_v54, 0.0  ;;  %v1634_v60 = vmul.f32 0.01, %v1570_v54  ;;  %2642 = vmatprep.subr.bf16.mxu1 %v5234_v50  ;;  %v1757_v3 = vld [vmem:[#allocation2 + $0x62] sm:$0xff] }
 0x274   :  { %1697 = vst [vmem:[#allocation2 + $0x78] sm:$0xff] %v6265_v59  ;;  %v1456_v62 = vsel %vm1419_vm0, %v1453_v36, %v1455_v56  ;;  %v1457_v63 = vrot.slane %v1374_v57, 1  ;;  %v1904_v0 = vpack.c.bf16 %v6265_v59, %v6259_v38 }
 0x275   :  { %v6271_v1 = vsel %vm1602_vm2, %v1570_v54, %v1634_v60  ;;  %v1532_v2 = vmax.f32 %v1372_v30, %v1456_v62  ;;  %v1758_v4 = vld [vmem:[#allocation2 + $0x6a] sm:$0xff]  ;;  %vm3064_vm2 = vcmask 1045504  }
 0x276   :  { %1698 = vst [vmem:[#allocation2 + $0x80] sm:$0xff] %v6271_v1  ;;  %v1458_v5 = vsel %vm1419_vm0, %v1455_v56, %v1457_v63  ;;  %v1296_v6 = vpop.f32.mrb[40].mxu0  ;;  %v1900_v7 = vpack.c.bf16 %v1758_v4, %v1757_v3  ;;  %2643 = vmatpush1.bf16.msra.mxu1 %v5232_v58 }
 0x277   :  { %v1571_v9 = vadd.f32 %v6175_v44, %v1532_v2  ;;  %v1533_v10 = vmax.f32 %v1373_v51, %v1458_v5  ;;  %v1298_v11 = vpop.f32.mrb[41].mxu0  ;;  %2644 = vmatprep.subr.bf16.mxu1 %v5237_v61 }
 0x278   :  { %v1375_v13 = vmax.f32 %v1296_v6, %v1298_v11  ;;  %v1300_v14 = vpop.f32.mrb[42].mxu0  ;;  %2521 = vmatprep.mubr.bf16.mxu1 %v1900_v7 }
 0x279   :  { %vm1603_vm3 = vcmp.gt.f32.partialorder %v1571_v9, 0.0  ;;  %v1635_v15 = vmul.f32 0.01, %v1571_v9  ;;  %v1572_v16 = vadd.f32 %v6175_v44, %v1533_v10  ;;  %v1302_v17 = vpop.f32.mrb[43].mxu0  ;;  %2522 = vmatmul.mubr.bf16.gmra.mrb[24].mxu1 %v1899_v37 }
 0x27a   :  { %v1459_v18 = vrot.slane %v1375_v13, 1  ;;  %v1376_v20 = vmax.f32 %v1300_v14, %v1302_v17  ;;  %2645 = vmatpush1.bf16.msra.mxu1 %v5235_v8 }
 0x27b   :  { %v6277_v22 = vsel %vm1603_vm3, %v1571_v9, %v1635_v15  ;;  %vm1604_vm4 = vcmp.gt.f32.partialorder %v1572_v16, 0.0  ;;  %v1636_v23 = vmul.f32 0.01, %v1572_v16  ;;  %2646 = vmatprep.subr.bf16.mxu1 %v5240_v12  ;;  %v1759_v30 = vld [vmem:[#allocation2 + $0x72] sm:$0xff]  ;;  %vm3364_vm3 = vcmask 924672  }
 0x27c   :  { %1699 = vst [vmem:[#allocation2 + $0x88] sm:$0xff] %v6277_v22  ;;  %v1460_v25 = vsel %vm1419_vm0, %v1457_v63, %v1459_v18  ;;  %v1461_v26 = vrot.slane %v1376_v20, 1  ;;  %v1909_v27 = vpack.c.bf16 %v6277_v22, %v6271_v1 }
 0x27d   :  { %v6283_v28 = vsel %vm1604_vm4, %v1572_v16, %v1636_v23  ;;  %v1534_v29 = vmax.f32 %v1374_v57, %v1460_v25  ;;  %v1760_v31 = vld [vmem:[#allocation2 + $0x7a] sm:$0xff] }
 0x27e   :  { %1700 = vst [vmem:[#allocation2 + $0x90] sm:$0xff] %v6283_v28  ;;  %v1462_v32 = vsel %vm1419_vm0, %v1459_v18, %v1461_v26  ;;  %v1306_v33 = vpop.f32.mrb[44].mxu0  ;;  %v1905_v34 = vpack.c.bf16 %v1760_v31, %v1759_v30  ;;  %2647 = vmatpush1.bf16.msra.mxu1 %v5238_v21  ;;  %v5249_v31 = vld [vmem:[#allocation3 + $0x204] ss:$8 sps:$4 sm:$0xff]  }
 0x27f   :  { %v1573_v36 = vadd.f32 %v6175_v44, %v1534_v29  ;;  %v1535_v37 = vmax.f32 %v1375_v13, %v1462_v32  ;;  %v1308_v38 = vpop.f32.mrb[45].mxu0  ;;  %2648 = vmatprep.subr.bf16.mxu1 %v5243_v24 }
 0x280   :  { %v1377_v40 = vmax.f32 %v1306_v33, %v1308_v38  ;;  %v1310_v41 = vpop.f32.mrb[46].mxu0  ;;  %2531 = vmatprep.mubr.bf16.mxu1 %v1905_v34 }
 0x281   :  { %vm1605_vm5 = vcmp.gt.f32.partialorder %v1573_v36, 0.0  ;;  %v1637_v42 = vmul.f32 0.01, %v1573_v36  ;;  %v1574_v43 = vadd.f32 %v6175_v44, %v1535_v37  ;;  %v1312_v45 = vpop.f32.mrb[47].mxu0  ;;  %2532 = vmatmul.mubr.bf16.gmra.mrb[28].mxu1 %v1904_v0 }
 0x282   :  { %v1463_v46 = vrot.slane %v1377_v40, 1  ;;  %v1378_v47 = vmax.f32 %v1310_v41, %v1312_v45  ;;  %2649 = vmatpush1.bf16.msra.mxu1 %v5241_v35 }
 0x283   :  { %v1669_v49 = vsel %vm1605_vm5, %v1573_v36, %v1637_v42  ;;  %vm1606_vm6 = vcmp.gt.f32.partialorder %v1574_v43, 0.0  ;;  %v1638_v50 = vmul.f32 0.01, %v1574_v43  ;;  %2650 = vmatprep.subr.bf16.mxu1 %v5246_v39  ;;  %v1761_v56 = vld [vmem:[#allocation2 + $0x82] sm:$0xff] }
 0x284   :  { %1701 = vst [vmem:[#allocation2 + $0x98] sm:$0xff] %v1669_v49  ;;  %v1464_v51 = vsel %vm1419_vm0, %v1461_v26, %v1463_v46  ;;  %v1465_v52 = vrot.slane %v1378_v47, 1  ;;  %v1914_v53 = vpack.c.bf16 %v1669_v49, %v6283_v28 }
 0x285   :  { %v6291_v54 = vsel %vm1606_vm6, %v1574_v43, %v1638_v50  ;;  %v1536_v55 = vmax.f32 %v1376_v20, %v1464_v51  ;;  %v1762_v57 = vld [vmem:[#allocation2 + $0x8a] sm:$0xff] }
 0x286   :  { %1702 = vst [vmem:[#allocation2 + $0xa0] sm:$0xff] %v6291_v54  ;;  %v1466_v58 = vsel %vm1419_vm0, %v1463_v46, %v1465_v52  ;;  %v1316_v59 = vpop.f32.mrb[48].mxu0  ;;  %v1910_v60 = vpack.c.bf16 %v1762_v57, %v1761_v56  ;;  %2651 = vmatpush1.bf16.msra.mxu1 %v5244_v48 }
 0x287   :  { %v1575_v61 = vadd.f32 %v6175_v44, %v1536_v55  ;;  %v1537_v62 = vmax.f32 %v1377_v40, %v1466_v58  ;;  %v1318_v63 = vpop.f32.mrb[49].mxu0  ;;  %2811 = vmatprep.subr.bf16.mxu1 %v5249_v31 }
 0x288   :  { %v1379_v0 = vmax.f32 %v1316_v59, %v1318_v63  ;;  %v1320_v1 = vpop.f32.mrb[50].mxu0  ;;  %2541 = vmatprep.mubr.bf16.mxu1 %v1910_v60 }
 0x289   :  { %vm1607_vm7 = vcmp.gt.f32.partialorder %v1575_v61, 0.0  ;;  %v1639_v2 = vmul.f32 0.01, %v1575_v61  ;;  %v1576_v3 = vadd.f32 %v6175_v44, %v1537_v62  ;;  %v1322_v4 = vpop.f32.mrb[51].mxu0  ;;  %2542 = vmatmul.mubr.bf16.gmra.mrb[32].mxu1 %v1909_v27 }
 0x28a   :  { %v1467_v5 = vrot.slane %v1379_v0, 1  ;;  %v1380_v6 = vmax.f32 %v1320_v1, %v1322_v4 }
 0x28b   :  { %v6297_v7 = vsel %vm1607_vm7, %v1575_v61, %v1639_v2  ;;  %vm1608_vm8 = vcmp.gt.f32.partialorder %v1576_v3, 0.0  ;;  %v1640_v8 = vmul.f32 0.01, %v1576_v3  ;;  %v1763_v14 = vld [vmem:[#allocation2 + $0x92] sm:$0xff] }
 0x28c   :  { %1703 = vst [vmem:[#allocation2 + $0xa8] sm:$0xff] %v6297_v7  ;;  %v1468_v9 = vsel %vm1419_vm0, %v1465_v52, %v1467_v5  ;;  %v1469_v10 = vrot.slane %v1380_v6, 1  ;;  %v1919_v11 = vpack.c.bf16 %v6297_v7, %v6291_v54 }
 0x28d   :  { %v6303_v12 = vsel %vm1608_vm8, %v1576_v3, %v1640_v8  ;;  %v1538_v13 = vmax.f32 %v1378_v47, %v1468_v9  ;;  %v1764_v15 = vld [vmem:[#allocation2 + $0x9a] sm:$0xff] }
 0x28e   :  { %1704 = vst [vmem:[#allocation2 + $0xb0] sm:$0xff] %v6303_v12  ;;  %v1470_v16 = vsel %vm1419_vm0, %v1467_v5, %v1469_v10  ;;  %v1326_v17 = vpop.f32.mrb[52].mxu0  ;;  %v1915_v18 = vpack.c.bf16 %v1764_v15, %v1763_v14  ;;  %v1923_v23 = vpack.c.bf16 %v6303_v12, %v6297_v7 }
 0x28f   :  { %v1577_v20 = vadd.f32 %v6175_v44, %v1538_v13  ;;  %v1539_v21 = vmax.f32 %v1379_v0, %v1470_v16  ;;  %v1328_v22 = vpop.f32.mrb[53].mxu0 }
 0x290   :  { %v1381_v24 = vmax.f32 %v1326_v17, %v1328_v22  ;;  %v1330_v25 = vpop.f32.mrb[54].mxu0  ;;  %2551 = vmatprep.mubr.bf16.mxu1 %v1915_v18 }
 0x291   :  { %vm1609_vm9 = vcmp.gt.f32.partialorder %v1577_v20, 0.0  ;;  %v1641_v26 = vmul.f32 0.01, %v1577_v20  ;;  %v1578_v27 = vadd.f32 %v6175_v44, %v1539_v21  ;;  %v1332_v28 = vpop.f32.mrb[55].mxu0  ;;  %2552 = vmatmul.mubr.bf16.gmra.mrb[36].mxu1 %v1914_v53 }
 0x292   :  { %v1471_v29 = vrot.slane %v1381_v24, 1  ;;  %v1382_v30 = vmax.f32 %v1330_v25, %v1332_v28 }
 0x293   :  { %v6311_v32 = vsel %vm1609_vm9, %v1577_v20, %v1641_v26  ;;  %vm1610_vm10 = vcmp.gt.f32.partialorder %v1578_v27, 0.0  ;;  %v1642_v33 = vmul.f32 0.01, %v1578_v27  ;;  %v1765_v39 = vld [vmem:[#allocation2 + $0xa2] sm:$0xff] }
 0x294   :  { %1705 = vst [vmem:[#allocation2 + $0xb8] sm:$0xff] %v6311_v32  ;;  %v1472_v34 = vsel %vm1419_vm0, %v1469_v10, %v1471_v29  ;;  %v1473_v35 = vrot.slane %v1382_v30, 1  ;;  %v1924_v36 = vpack.c.bf16 %v6311_v32, %v6303_v12 }
 0x295   :  { %v6317_v37 = vsel %vm1610_vm10, %v1578_v27, %v1642_v33  ;;  %v1540_v38 = vmax.f32 %v1380_v6, %v1472_v34  ;;  %v1766_v40 = vld [vmem:[#allocation2 + $0xaa] sm:$0xff] }
 0x296   :  { %1706 = vst [vmem:[#allocation2 + $0xc0] sm:$0xff] %v6317_v37  ;;  %v1474_v41 = vsel %vm1419_vm0, %v1471_v29, %v1473_v35  ;;  %v1336_v42 = vpop.f32.mrb[56].mxu0  ;;  %v1920_v43 = vpack.c.bf16 %v1766_v40, %v1765_v39  ;;  %v1928_v48 = vpack.c.bf16 %v6317_v37, %v6311_v32 }
 0x297   :  { %v1579_v45 = vadd.f32 %v6175_v44, %v1540_v38  ;;  %v1541_v46 = vmax.f32 %v1381_v24, %v1474_v41  ;;  %v1338_v47 = vpop.f32.mrb[57].mxu0 }
 0x298   :  { %v1383_v49 = vmax.f32 %v1336_v42, %v1338_v47  ;;  %v1340_v50 = vpop.f32.mrb[58].mxu0  ;;  %2561 = vmatprep.mubr.bf16.mxu1 %v1920_v43 }
 0x299   :  { %vm1611_vm11 = vcmp.gt.f32.partialorder %v1579_v45, 0.0  ;;  %v1643_v51 = vmul.f32 0.01, %v1579_v45  ;;  %v1580_v52 = vadd.f32 %v6175_v44, %v1541_v46  ;;  %v1342_v53 = vpop.f32.mrb[59].mxu0  ;;  %2562 = vmatmul.mubr.bf16.gmra.mrb[40].mxu1 %v1919_v11 }
 0x29a   :  { %v1475_v55 = vrot.slane %v1383_v49, 1  ;;  %v1384_v56 = vmax.f32 %v1340_v50, %v1342_v53 }
 0x29b   :  { %v6325_v57 = vsel %vm1611_vm11, %v1579_v45, %v1643_v51  ;;  %vm1612_vm12 = vcmp.gt.f32.partialorder %v1580_v52, 0.0  ;;  %v1644_v58 = vmul.f32 0.01, %v1580_v52  ;;  %v1767_v0 = vld [vmem:[#allocation2 + $0xb2] sm:$0xff] }
 0x29c   :  { %1707 = vst [vmem:[#allocation2 + $0xc8] sm:$0xff] %v6325_v57  ;;  %v1476_v59 = vsel %vm1419_vm0, %v1473_v35, %v1475_v55  ;;  %v1477_v60 = vrot.slane %v1384_v56, 1  ;;  %v1929_v61 = vpack.c.bf16 %v6325_v57, %v6317_v37 }
 0x29d   :  { %v6331_v62 = vsel %vm1612_vm12, %v1580_v52, %v1644_v58  ;;  %v1542_v63 = vmax.f32 %v1382_v30, %v1476_v59  ;;  %v1768_v1 = vld [vmem:[#allocation2 + $0xba] sm:$0xff]  ;;  %v1808_v59 = vld [vmem:[#allocation2 + $0xe] sm:$0xff] }
 0x29e   :  { %1708 = vst [vmem:[#allocation2 + $0xd0] sm:$0xff] %v6331_v62  ;;  %v1478_v2 = vsel %vm1419_vm0, %v1475_v55, %v1477_v60  ;;  %v1346_v3 = vpop.f32.mrb[60].mxu0  ;;  %v1925_v4 = vpack.c.bf16 %v1768_v1, %v1767_v0  ;;  %v1933_v9 = vpack.c.bf16 %v6331_v62, %v6325_v57  ;;  %v1777_v0 = vld [vmem:[#allocation2 + $0xc] sm:$0xff]  ;;  %v1810_v1 = vld [vmem:[#allocation2 + $0x1e] sm:$0xff] }
 0x29f   :  { %v1581_v5 = vadd.f32 %v6175_v44, %v1542_v63  ;;  %v1543_v6 = vmax.f32 %v1383_v49, %v1478_v2  ;;  %v1348_v8 = vpop.f32.mrb[61].mxu0  ;;  %v1776_v2 = vld [vmem:[#allocation2 + $0x4] sm:$0xff] }
 0x2a0   :  { %v1385_v10 = vmax.f32 %v1346_v3, %v1348_v8  ;;  %v1350_v11 = vpop.f32.mrb[62].mxu0  ;;  %2571 = vmatprep.mubr.bf16.mxu1 %v1925_v4  ;;  %v5247_v3 = vld [vmem:[#allocation3 + $0x200] ss:$8 sps:$4 sm:$0xff]   ;;  %v1871_v4 = vpack.c.bf16 %v1777_v0, %v1776_v2  ;;  %v1786_v0 = vld [vmem:[#allocation2 + $0x54] sm:$0xff] }
 0x2a1   :  { %vm1613_vm13 = vcmp.gt.f32.partialorder %v1581_v5, 0.0  ;;  %v1645_v13 = vmul.f32 0.01, %v1581_v5  ;;  %v1582_v14 = vadd.f32 %v6175_v44, %v1543_v6  ;;  %v1352_v15 = vpop.f32.mrb[63].mxu0  ;;  %2572 = vmatmul.mubr.bf16.gmra.mrb[44].mxu1 %v1924_v36  ;;  %v5252_v6 = vld [vmem:[#allocation3 + $0x214] ss:$8 sps:$4 sm:$0xff]  }
 0x2a2   :  { %v1479_v16 = vrot.slane %v1385_v10, 1  ;;  %v1386_v17 = vmax.f32 %v1350_v11, %v1352_v15  ;;  %v5255_v11 = vld [vmem:[#allocation3 + $0x224] ss:$8 sps:$4 sm:$0xff]   ;;  %v1778_v15 = vld [vmem:[#allocation2 + $0x14] sm:$0xff] }
 0x2a3   :  { %v6339_v18 = vsel %vm1613_vm13, %v1581_v5, %v1645_v13  ;;  %vm1614_vm14 = vcmp.gt.f32.partialorder %v1582_v14, 0.0  ;;  %v1646_v20 = vmul.f32 0.01, %v1582_v14  ;;  %v1769_v27 = vld [vmem:[#allocation2 + $0xc2] sm:$0xff]  ;;  %v1809_v5 = vld [vmem:[#allocation2 + $0x16] sm:$0xff] }
 0x2a4   :  { %1709 = vst [vmem:[#allocation2 + $0xd8] sm:$0xff] %v6339_v18  ;;  %v1480_v21 = vsel %vm1419_vm0, %v1477_v60, %v1479_v16  ;;  %v1481_v22 = vrot.slane %v1386_v17, 1  ;;  %v1934_v24 = vpack.c.bf16 %v6339_v18, %v6331_v62  ;;  %v1877_v8 = vpack.c.bf16 %v1810_v1, %v1809_v5  ;;  %v1779_v13 = vld [vmem:[#allocation2 + $0x1c] sm:$0xff]  ;;  %v1819_v2 = vld [vmem:[#allocation2 + $0x66] sm:$0xff] }
 0x2a5   :  { %v6345_v25 = vsel %vm1614_vm14, %v1582_v14, %v1646_v20  ;;  %v1544_v26 = vmax.f32 %v1384_v56, %v1480_v21  ;;  %v1770_v28 = vld [vmem:[#allocation2 + $0xca] sm:$0xff]  ;;  %v5258_v21 = vld [vmem:[#allocation3 + $0x234] ss:$8 sps:$4 sm:$0xff]  }
 0x2a6   :  { %1710 = vst [vmem:[#allocation2 + $0xe0] sm:$0xff] %v6345_v25  ;;  %v1482_v29 = vsel %vm1419_vm0, %v1479_v16, %v1481_v22  ;;  %v1546_v30 = vmax.f32 %v1386_v17, %v1481_v22  ;;  %v1930_v31 = vpack.c.bf16 %v1770_v28, %v1769_v27  ;;  %v1938_v35 = vpack.c.bf16 %v6345_v25, %v6339_v18  ;;  %v1812_v14 = vld [vmem:[#allocation2 + $0x2e] sm:$0xff]  ;;  %v5253_v16 = vld [vmem:[#allocation3 + $0x220] ss:$8 sps:$4 sm:$0xff]  }
 0x2a7   :  { %v1583_v33 = vadd.f32 %v6175_v44, %v1544_v26  ;;  %v1545_v34 = vmax.f32 %v1385_v10, %v1482_v29  ;;  %v5250_v10 = vld [vmem:[#allocation3 + $0x210] ss:$8 sps:$4 sm:$0xff]   ;;  %v1876_v17 = vpack.c.bf16 %v1779_v13, %v1778_v15  ;;  %v1811_v20 = vld [vmem:[#allocation2 + $0x26] sm:$0xff]  ;;  %v1814_v28 = vld [vmem:[#allocation2 + $0x3e] sm:$0xff] }
 0x2a8   :  { %v1585_v36 = vadd.f32 %v6175_v44, %v1546_v30  ;;  %2581 = vmatprep.mubr.bf16.mxu1 %v1930_v31  ;;  %v1882_v22 = vpack.c.bf16 %v1812_v14, %v1811_v20  ;;  %v5261_v26 = vld [vmem:[#allocation3 + $0x244] ss:$8 sps:$4 sm:$0xff]   ;;  %v5259_v30 = vld [vmem:[#allocation3 + $0x240] ss:$8 sps:$4 sm:$0xff]   ;;  %v1790_v15 = vld [vmem:[#allocation2 + $0x74] sm:$0xff] }
 0x2a9   :  { %vm1615_vm15 = vcmp.gt.f32.partialorder %v1583_v33, 0.0  ;;  %v1647_v38 = vmul.f32 0.01, %v1583_v33  ;;  %v1584_v39 = vadd.f32 %v6175_v44, %v1545_v34  ;;  %2582 = vmatmul.mubr.bf16.gmra.mrb[48].mxu1 %v1929_v61  ;;  %v1807_v61 = vld [vmem:[#allocation2 + $0x6] sm:$0xff]  ;;  %v5264_v34 = vld [vmem:[#allocation3 + $0x254] ss:$8 sps:$4 sm:$0xff]  }
 0x2aa   :  { %vm1617_vm1 = vcmp.gt.f32.partialorder %v1585_v36, 0.0  ;;  %v1649_v40 = vmul.f32 0.01, %v1585_v36  ;;  %v1872_v63 = vpack.c.bf16 %v1808_v59, %v1807_v61  ;;  %v1781_v27 = vld [vmem:[#allocation2 + $0x2c] sm:$0xff]  ;;  %v1780_v29 = vld [vmem:[#allocation2 + $0x24] sm:$0xff]  ;;  %v1817_v59 = vld [vmem:[#allocation2 + $0x56] sm:$0xff] }
 0x2ab   :  { %v6354_v41 = vsel %vm1615_vm15, %v1583_v33, %v1647_v38  ;;  %vm1616_vm0 = vcmp.gt.f32.partialorder %v1584_v39, 0.0  ;;  %v1648_v42 = vmul.f32 0.01, %v1584_v39  ;;  %v1771_v47 = vld [vmem:[#allocation2 + $0xd2] sm:$0xff]  ;;  %v1881_v31 = vpack.c.bf16 %v1781_v27, %v1780_v29  ;;  %v1787_v61 = vld [vmem:[#allocation2 + $0x5c] sm:$0xff] }
 0x2ac   :  { %1711 = vst [vmem:[#allocation2 + $0xe8] sm:$0xff] %v6354_v41  ;;  %v1681_v43 = vsel %vm1617_vm1, %v1585_v36, %v1649_v40  ;;  %v1939_v45 = vpack.c.bf16 %v6354_v41, %v6345_v25  ;;  %v1813_v33 = vld [vmem:[#allocation2 + $0x36] sm:$0xff]  ;;  %v1896_v1 = vpack.c.bf16 %v1787_v61, %v1786_v0  ;;  %v1822_v5 = vld [vmem:[#allocation2 + $0x7e] sm:$0xff]  ;;  %v1824_v14 = vld [vmem:[#allocation2 + $0x8e] sm:$0xff] }
 0x2ad   :  { %v6359_v46 = vsel %vm1616_vm0, %v1584_v39, %v1648_v42  ;;  %1713 = vst [vmem:[#allocation2 + $0xf8] sm:$0x7] %v1681_v43  ;;  %v1772_v49 = vld [vmem:[#allocation2 + $0xda] sm:$0xff]  ;;  %v1887_v36 = vpack.c.bf16 %v1814_v28, %v1813_v33  ;;  %v5267_v39 = vld [vmem:[#allocation3 + $0x264] ss:$8 sps:$4 sm:$0xff]  }
 0x2ae   :  { %1712 = vst [vmem:[#allocation2 + $0xf0] sm:$0xff] %v6359_v46  ;;  %v1935_v44 = vpack.c.bf16 %v1772_v49, %v1771_v47  ;;  %v1943_v50 = vpack.c.bf16 %v6359_v46, %v6354_v41  ;;  %v5262_v38 = vld [vmem:[#allocation3 + $0x250] ss:$8 sps:$4 sm:$0xff]   ;;  %v1783_v40 = vld [vmem:[#allocation2 + $0x3c] sm:$0xff]  ;;  %v1815_v49 = vld [vmem:[#allocation2 + $0x46] sm:$0xff] }
 0x2af   :  { %v1816_v42 = vld [vmem:[#allocation2 + $0x4e] sm:$0xff]  ;;  %v1791_v13 = vld [vmem:[#allocation2 + $0x7c] sm:$0xff] }
 0x2b0   :  { %2591 = vmatprep.mubr.bf16.mxu1 %v1935_v44  ;;  %v1782_v43 = vld [vmem:[#allocation2 + $0x34] sm:$0xff]  ;;  %v1795_v29 = vld [vmem:[#allocation2 + $0x9c] sm:$0xff] }
 0x2b1   :  { %2592 = vmatmul.mubr.bf16.gmra.mrb[52].mxu1 %v1934_v24  ;;  %v5256_v24 = vld [vmem:[#allocation3 + $0x230] ss:$8 sps:$4 sm:$0xff]   ;;  %v1886_v47 = vpack.c.bf16 %v1783_v40, %v1782_v43  ;;  %v5270_v44 = vld [vmem:[#allocation3 + $0x274] ss:$8 sps:$4 sm:$0xff]   ;;  %v1796_v40 = vld [vmem:[#allocation2 + $0xa4] sm:$0xff] }
 0x2b2   :  { %v1825_v27 = vld [vmem:[#allocation2 + $0x96] sm:$0xff]  ;;  %v6400_v46 = vld [vmem:[%s6831_s8] ss:$0 sm:$0xff] }
 0x2b3   :  { %v1773_v51 = vld [vmem:[#allocation2 + $0xe2] sm:$0xff]  ;;  %v1829_v43 = vld [vmem:[#allocation2 + $0xb6] sm:$0xff] }
 0x2b5   :  { %v1774_v52 = vld [vmem:[#allocation2 + $0xea] sm:$0xff]  ;;  %v1775_v53 = vld [vmem:[#allocation2 + $0xf2] sm:$0x7] }
 0x2b6   :  { %v1940_v55 = vpack.c.bf16 %v1774_v52, %v1773_v51  ;;  %v1945_v56 = vpack.c.bf16 %v1775_v53, %v1775_v53  ;;  %v1744_v58 = vld [vmem:[#allocation2 + $0xf0] sm:$0x7]  ;;  %v1892_v51 = vpack.c.bf16 %v1816_v42, %v1815_v49 }
 0x2b7   :  { %v1944_v60 = vpack.c.bf16 %v1744_v58, %v1744_v58  ;;  %v5268_v52 = vld [vmem:[#allocation3 + $0x270] ss:$8 sps:$4 sm:$0xff]  }
 0x2b8   :  { %2601 = vmatprep.mubr.bf16.mxu1 %v1940_v55  ;;  %v1785_v53 = vld [vmem:[#allocation2 + $0x4c] sm:$0xff]  ;;  %v1818_v55 = vld [vmem:[#allocation2 + $0x5e] sm:$0xff] }
 0x2b9   :  { %2602 = vmatmul.mubr.bf16.gmra.mrb[56].mxu1 %v1939_v45  ;;  %v5265_v45 = vld [vmem:[#allocation3 + $0x260] ss:$8 sps:$4 sm:$0xff]   ;;  %v1832_v49 = vld [vmem:[#allocation2 + $0xce] sm:$0xff] }
 0x2ba   :  { %2611 = vmatprep.mubr.bf16.mxu1 %v1945_v56  ;;  %v1784_v56 = vld [vmem:[#allocation2 + $0x44] sm:$0xff]  ;;  %v1836_v0 = vld [vmem:[#allocation2 + $0xee] sm:$0xff] }
 0x2bb   :  { %v1891_v58 = vpack.c.bf16 %v1785_v53, %v1784_v56  ;;  %v1834_v56 = vld [vmem:[#allocation2 + $0xde] sm:$0xff] }
 0x2c1   :  { %2612 = vmatmul.mubr.bf16.gmra.mrb[60].mxu1 %v1944_v60  ;;  %v1897_v60 = vpack.c.bf16 %v1818_v55, %v1817_v59  ;;  %v1801_v55 = vld [vmem:[#allocation2 + $0xcc] sm:$0xff] }
 0x2c2   :  { %2652 = vmatprep.mubr.bf16.mxu1 %v1872_v63  ;;  %v1820_v63 = vld [vmem:[#allocation2 + $0x6e] sm:$0xff] }
 0x2c9   :  { %2653 = vmatmul.mubr.bf16.vlgmr.msra.gmra.mrb[0].mxu1 %v1871_v4  ;;  %v1789_v4 = vld [vmem:[#allocation2 + $0x6c] sm:$0xff] }
 0x2ca   :  { %2662 = vmatprep.mubr.bf16.mxu1 %v1877_v8  ;;  %2812 = vmatpush1.bf16.msra.mxu1 %v5247_v3  ;;  %v1902_v3 = vpack.c.bf16 %v1820_v63, %v1819_v2  ;;  %v1803_v63 = vld [vmem:[#allocation2 + $0xdc] sm:$0xff] }
 0x2cb   :  { %2813 = vmatprep.subr.bf16.mxu1 %v5252_v6  ;;  %v1788_v6 = vld [vmem:[#allocation2 + $0x64] sm:$0xff] }
 0x2cc   :  { %v1901_v8 = vpack.c.bf16 %v1789_v4, %v1788_v6  ;;  %v1837_v6 = vld [vmem:[#allocation2 + $0xf6] sm:$0x7] }
 0x2ce   :  { %2814 = vmatpush1.bf16.msra.mxu1 %v5250_v10  ;;  %v1821_v10 = vld [vmem:[#allocation2 + $0x76] sm:$0xff] }
 0x2cf   :  { %2815 = vmatprep.subr.bf16.mxu1 %v5255_v11  ;;  %v1907_v11 = vpack.c.bf16 %v1822_v5, %v1821_v10  ;;  %v1805_v5 = vld [vmem:[#allocation2 + $0xec] sm:$0xff] }
 0x2d1   :  { %2663 = vmatmul.mubr.bf16.gmra.mrb[4].mxu1 %v1876_v17  ;;  %v1823_v17 = vld [vmem:[#allocation2 + $0x86] sm:$0xff] }
 0x2d2   :  { %2672 = vmatprep.mubr.bf16.mxu1 %v1882_v22  ;;  %2816 = vmatpush1.bf16.msra.mxu1 %v5253_v16  ;;  %v1906_v16 = vpack.c.bf16 %v1791_v13, %v1790_v15  ;;  %v1912_v20 = vpack.c.bf16 %v1824_v14, %v1823_v17  ;;  %v1826_v22 = vld [vmem:[#allocation2 + $0x9e] sm:$0xff]  ;;  %v1806_v13 = vld [vmem:[#allocation2 + $0xf4] sm:$0x7] }
 0x2d3   :  { %2817 = vmatprep.subr.bf16.mxu1 %v5258_v21  ;;  %v1793_v21 = vld [vmem:[#allocation2 + $0x8c] sm:$0xff]  ;;  %v1917_v28 = vpack.c.bf16 %v1826_v22, %v1825_v27  ;;  %v1946_v14 = vpack.c.bf16 %v1806_v13, %v1806_v13 }
 0x2d4   :  { %v1839_v15 = vld [vmem:[#allocation2 + $0x10] sm:$0xff] }
 0x2d6   :  { %2818 = vmatpush1.bf16.msra.mxu1 %v5256_v24  ;;  %v1792_v24 = vld [vmem:[#allocation2 + $0x84] sm:$0xff] }
 0x2d7   :  { %2819 = vmatprep.subr.bf16.mxu1 %v5261_v26  ;;  %v1911_v26 = vpack.c.bf16 %v1793_v21, %v1792_v24  ;;  %v1840_v21 = vld [vmem:[#allocation2 + $0x18] sm:$0xff]  ;;  %v1843_v24 = vld [vmem:[#allocation2 + $0x30] sm:$0xff] }
 0x2d9   :  { %2673 = vmatmul.mubr.bf16.gmra.mrb[8].mxu1 %v1881_v31  ;;  %v1794_v31 = vld [vmem:[#allocation2 + $0x94] sm:$0xff] }
 0x2da   :  { %2682 = vmatprep.mubr.bf16.mxu1 %v1887_v36  ;;  %2820 = vmatpush1.bf16.msra.mxu1 %v5259_v30  ;;  %v1828_v30 = vld [vmem:[#allocation2 + $0xae] sm:$0xff]  ;;  %v1916_v33 = vpack.c.bf16 %v1795_v29, %v1794_v31  ;;  %v1844_v29 = vld [vmem:[#allocation2 + $0x38] sm:$0xff] }
 0x2db   :  { %2821 = vmatprep.subr.bf16.mxu1 %v5264_v34  ;;  %v1827_v34 = vld [vmem:[#allocation2 + $0xa6] sm:$0xff]  ;;  %v1847_v31 = vld [vmem:[#allocation2 + $0x50] sm:$0xff] }
 0x2dc   :  { %v1922_v36 = vpack.c.bf16 %v1828_v30, %v1827_v34 }
 0x2de   :  { %2822 = vmatpush1.bf16.msra.mxu1 %v5262_v38  ;;  %v1797_v38 = vld [vmem:[#allocation2 + $0xac] sm:$0xff] }
 0x2df   :  { %2823 = vmatprep.subr.bf16.mxu1 %v5267_v39  ;;  %v1830_v39 = vld [vmem:[#allocation2 + $0xbe] sm:$0xff]  ;;  %v1921_v42 = vpack.c.bf16 %v1797_v38, %v1796_v40  ;;  %v1851_v40 = vld [vmem:[#allocation2 + $0x70] sm:$0xff] }
 0x2e0   :  { %v1848_v38 = vld [vmem:[#allocation2 + $0x58] sm:$0xff] }
 0x2e1   :  { %2683 = vmatmul.mubr.bf16.gmra.mrb[12].mxu1 %v1886_v47  ;;  %v1799_v47 = vld [vmem:[#allocation2 + $0xbc] sm:$0xff] }
 0x2e2   :  { %2692 = vmatprep.mubr.bf16.mxu1 %v1892_v51  ;;  %2824 = vmatpush1.bf16.msra.mxu1 %v5265_v45  ;;  %v1927_v45 = vpack.c.bf16 %v1830_v39, %v1829_v43 }
 0x2e3   :  { %2825 = vmatprep.subr.bf16.mxu1 %v5270_v44  ;;  %v1798_v44 = vld [vmem:[#allocation2 + $0xb4] sm:$0xff] }
 0x2e4   :  { %v1926_v51 = vpack.c.bf16 %v1799_v47, %v1798_v44  ;;  %v1852_v47 = vld [vmem:[#allocation2 + $0x78] sm:$0xff]  ;;  %v1855_v44 = vld [vmem:[#allocation2 + $0x90] sm:$0xff] }
 0x2e6   :  { %2826 = vmatpush1.bf16.msra.mxu1 %v5268_v52  ;;  %v1831_v52 = vld [vmem:[#allocation2 + $0xc6] sm:$0xff] }
 0x2e7   :  { %v1932_v53 = vpack.c.bf16 %v1832_v49, %v1831_v52 }
 0x2e9   :  { %2693 = vmatmul.mubr.bf16.gmra.mrb[16].mxu1 %v1891_v58  ;;  %v1800_v58 = vld [vmem:[#allocation2 + $0xc4] sm:$0xff] }
 0x2ea   :  { %2702 = vmatprep.mubr.bf16.mxu1 %v1897_v60  ;;  %v1931_v59 = vpack.c.bf16 %v1801_v55, %v1800_v58  ;;  %v1833_v60 = vld [vmem:[#allocation2 + $0xd6] sm:$0xff] }
 0x2eb   :  { %v1937_v61 = vpack.c.bf16 %v1834_v56, %v1833_v60 }
 0x2f1   :  { %2703 = vmatmul.mubr.bf16.gmra.mrb[20].mxu1 %v1896_v1  ;;  %v1802_v1 = vld [vmem:[#allocation2 + $0xd4] sm:$0xff] }
 0x2f2   :  { %2712 = vmatprep.mubr.bf16.mxu1 %v1902_v3  ;;  %v1936_v2 = vpack.c.bf16 %v1803_v63, %v1802_v1  ;;  %v1835_v3 = vld [vmem:[#allocation2 + $0xe6] sm:$0xff] }
 0x2f3   :  { %v1942_v4 = vpack.c.bf16 %v1836_v0, %v1835_v3  ;;  %v5273_v1 = vld [vmem:[%s6827_s4 + $0x4] ss:$8 sps:$4 sm:$0xff]  }
 0x2f4   :  { %4366 = vmatprep.mubr.msk.bf16.mxu0 %vm3364_vm3, %v5273_v1 }
 0x2f9   :  { %2713 = vmatmul.mubr.bf16.gmra.mrb[24].mxu1 %v1901_v8  ;;  %v1804_v8 = vld [vmem:[#allocation2 + $0xe4] sm:$0xff] }
 0x2fa   :  { %2722 = vmatprep.mubr.bf16.mxu1 %v1907_v11  ;;  %v1941_v10 = vpack.c.bf16 %v1805_v5, %v1804_v8  ;;  %v1947_v11 = vpack.c.bf16 %v1837_v6, %v1837_v6 }
 0x301   :  { %2723 = vmatmul.mubr.bf16.gmra.mrb[28].mxu1 %v1906_v16  ;;  %v1838_v16 = vld [vmem:[#allocation2 + $0x8] sm:$0xff] }
 0x302   :  { %2732 = vmatprep.mubr.bf16.mxu1 %v1912_v20  ;;  %v1873_v17 = vpack.c.bf16 %v1839_v15, %v1838_v16  ;;  %v1841_v20 = vld [vmem:[#allocation2 + $0x20] sm:$0xff] }
 0x303   :  { %v1878_v22 = vpack.c.bf16 %v1841_v20, %v1840_v21 }
 0x309   :  { %2733 = vmatmul.mubr.bf16.gmra.mrb[32].mxu1 %v1911_v26  ;;  %v1842_v26 = vld [vmem:[#allocation2 + $0x28] sm:$0xff] }
 0x30a   :  { %2742 = vmatprep.mubr.bf16.mxu1 %v1917_v28  ;;  %v1883_v27 = vpack.c.bf16 %v1843_v24, %v1842_v26  ;;  %v1845_v28 = vld [vmem:[#allocation2 + $0x40] sm:$0xff] }
 0x30b   :  { %v1888_v30 = vpack.c.bf16 %v1845_v28, %v1844_v29 }
 0x311   :  { %2743 = vmatmul.mubr.bf16.gmra.mrb[36].mxu1 %v1916_v33  ;;  %v1846_v33 = vld [vmem:[#allocation2 + $0x48] sm:$0xff] }
 0x312   :  { %2752 = vmatprep.mubr.bf16.mxu1 %v1922_v36  ;;  %v1893_v34 = vpack.c.bf16 %v1847_v31, %v1846_v33  ;;  %v1849_v36 = vld [vmem:[#allocation2 + $0x60] sm:$0xff] }
 0x313   :  { %v1898_v39 = vpack.c.bf16 %v1849_v36, %v1848_v38 }
 0x319   :  { %2753 = vmatmul.mubr.bf16.gmra.mrb[40].mxu1 %v1921_v42  ;;  %v1850_v42 = vld [vmem:[#allocation2 + $0x68] sm:$0xff] }
 0x31a   :  { %2762 = vmatprep.mubr.bf16.mxu1 %v1927_v45  ;;  %v1903_v43 = vpack.c.bf16 %v1851_v40, %v1850_v42  ;;  %v1853_v45 = vld [vmem:[#allocation2 + $0x80] sm:$0xff] }
 0x31b   :  { %v1908_v49 = vpack.c.bf16 %v1853_v45, %v1852_v47 }
 0x321   :  { %2763 = vmatmul.mubr.bf16.gmra.mrb[44].mxu1 %v1926_v51  ;;  %v1854_v51 = vld [vmem:[#allocation2 + $0x88] sm:$0xff] }
 0x322   :  { %2772 = vmatprep.mubr.bf16.mxu1 %v1932_v53  ;;  %v1913_v52 = vpack.c.bf16 %v1855_v44, %v1854_v51  ;;  %v1856_v53 = vld [vmem:[#allocation2 + $0x98] sm:$0xff] }
 0x323   :  { %v1918_v55 = vpack.c.bf16 %v6291_v54, %v1856_v53  ;;  %v1868_v54 = vld [vmem:[#allocation2 + $0xf8] sm:$0x7] }
 0x324   :  { %v1948_v7 = vpack.c.bf16 %v1868_v54, %v1868_v54 }
 0x329   :  { %2773 = vmatmul.mubr.bf16.gmra.mrb[48].mxu1 %v1931_v59 }
 0x32a   :  { %2782 = vmatprep.mubr.bf16.mxu1 %v1937_v61 }
 0x331   :  { %2783 = vmatmul.mubr.bf16.gmra.mrb[52].mxu1 %v1936_v2 }
 0x332   :  { %2792 = vmatprep.mubr.bf16.mxu1 %v1942_v4 }
 0x339   :  { %2793 = vmatmul.mubr.bf16.gmra.mrb[56].mxu1 %v1941_v10 }
 0x33a   :  { %2802 = vmatprep.mubr.bf16.mxu1 %v1947_v11 }
 0x341   :  { %2803 = vmatmul.mubr.bf16.gmra.mrb[60].mxu1 %v1946_v14 }
 0x342   :  { %2843 = vmatprep.mubr.bf16.mxu1 %v5354_v19 }
 0x349   :  { %2844 = vmatmul.mubr.bf16.vlgmr.msra.gmra.mrb[0].mxu1 %v1873_v17 }
 0x34a   :  { %2853 = vmatprep.mubr.bf16.mxu1 %v5354_v19 }
 0x351   :  { %2854 = vmatmul.mubr.bf16.gmra.mrb[4].mxu1 %v1878_v22 }
 0x352   :  { %2863 = vmatprep.mubr.bf16.mxu1 %v5354_v19 }
 0x359   :  { %2864 = vmatmul.mubr.bf16.gmra.mrb[8].mxu1 %v1883_v27 }
 0x35a   :  { %2873 = vmatprep.mubr.bf16.mxu1 %v5354_v19 }
 0x361   :  { %2874 = vmatmul.mubr.bf16.gmra.mrb[12].mxu1 %v1888_v30 }
 0x362   :  { %2883 = vmatprep.mubr.bf16.mxu1 %v5354_v19 }
 0x369   :  { %2884 = vmatmul.mubr.bf16.gmra.mrb[16].mxu1 %v1893_v34 }
 0x36a   :  { %2893 = vmatprep.mubr.bf16.mxu1 %v5354_v19 }
 0x371   :  { %2894 = vmatmul.mubr.bf16.gmra.mrb[20].mxu1 %v1898_v39 }
 0x372   :  { %2903 = vmatprep.mubr.bf16.mxu1 %v5354_v19 }
 0x379   :  { %2904 = vmatmul.mubr.bf16.gmra.mrb[24].mxu1 %v1903_v43 }
 0x37a   :  { %2913 = vmatprep.mubr.bf16.mxu1 %v5354_v19 }
 0x381   :  { %2914 = vmatmul.mubr.bf16.gmra.mrb[28].mxu1 %v1908_v49 }
 0x382   :  { %2923 = vmatprep.mubr.bf16.mxu1 %v5354_v19 }
 0x389   :  { %2924 = vmatmul.mubr.bf16.gmra.mrb[32].mxu1 %v1913_v52 }
 0x38a   :  { %2933 = vmatprep.mubr.bf16.mxu1 %v5354_v19 }
 0x391   :  { %2934 = vmatmul.mubr.bf16.gmra.mrb[36].mxu1 %v1918_v55 }
 0x392   :  { %2943 = vmatprep.mubr.bf16.mxu1 %v5354_v19 }
 0x399   :  { %2944 = vmatmul.mubr.bf16.gmra.mrb[40].mxu1 %v1923_v23 }
 0x39a   :  { %2953 = vmatprep.mubr.bf16.mxu1 %v5354_v19 }
 0x3a1   :  { %2954 = vmatmul.mubr.bf16.gmra.mrb[44].mxu1 %v1928_v48 }
 0x3a2   :  { %2963 = vmatprep.mubr.bf16.mxu1 %v5354_v19 }
 0x3a9   :  { %2964 = vmatmul.mubr.bf16.gmra.mrb[48].mxu1 %v1933_v9 }
 0x3aa   :  { %2973 = vmatprep.mubr.bf16.mxu1 %v5354_v19 }
 0x3b1   :  { %2974 = vmatmul.mubr.bf16.gmra.mrb[52].mxu1 %v1938_v35 }
 0x3b2   :  { %2983 = vmatprep.mubr.bf16.mxu1 %v5354_v19 }
 0x3b9   :  { %2984 = vmatmul.mubr.bf16.gmra.mrb[56].mxu1 %v1943_v50 }
 0x3ba   :  { %2993 = vmatprep.mubr.bf16.mxu1 %v5354_v19 }
 0x3c1   :  { %2994 = vmatmul.mubr.bf16.gmra.mrb[60].mxu1 %v1948_v7 }
 0x41c   :  { %v2845_v12 = vpop.f32.mrb[0].mxu1 }
 0x41d   :  { %v2847_v23 = vpop.f32.mrb[1].mxu1 }
 0x41e   :  { %v3002_v32 = vmax.f32 %v2845_v12, %v2847_v23  ;;  %v2849_v37 = vpop.f32.mrb[2].mxu1  ;;  %v5279_v12 = vld [vmem:[%s6826_s3 + $0x40] sm:$0xff]  }
 0x41f   :  { %v2851_v48 = vpop.f32.mrb[3].mxu1 }
 0x420   :  { %v3003_v57 = vmax.f32 %v2849_v37, %v2851_v48  ;;  %v3065_v62 = vrot.slane %v3002_v32, 2 }
 0x422   :  { %v3066_v9 = vrot.slane %v3003_v57, 2 }
 0x424   :  { %v3067_v18 = vsel %vm3064_vm2, %v3065_v62, %v3066_v9  ;;  %v2855_v25 = vpop.f32.mrb[4].mxu1 }
 0x425   :  { %v3157_v35 = vmax.f32 %v3002_v32, %v3067_v18  ;;  %v2857_v41 = vpop.f32.mrb[5].mxu1  ;;  %v5280_v18 = vld [vmem:[%s6826_s3 + $0x48] sm:$0xff]  }
 0x426   :  { %v3004_v50 = vmax.f32 %v2855_v25, %v2857_v41  ;;  %v2859_v56 = vpop.f32.mrb[6].mxu1 }
 0x427   :  { %v2861_v58 = vpop.f32.mrb[7].mxu1  ;;  %v3195_v61 = vadd.f32 %v6400_v46, %v3157_v35 }
 0x428   :  { %v3068_v59 = vrot.slane %v3004_v50, 2  ;;  %v3005_v60 = vmax.f32 %v2859_v56, %v2861_v58 }
 0x429   :  { %v3257_v10 = vmul.f32 0.01, %v3195_v61  ;;  %vm3226_vm4 = vcmp.gt.f32.partialorder %v3195_v61, 0.0 }
 0x42a   :  { %v3069_v63 = vsel %vm3064_vm2, %v3066_v9, %v3068_v59  ;;  %v3070_v0 = vrot.slane %v3005_v60, 2 }
 0x42b   :  { %v3158_v2 = vmax.f32 %v3003_v57, %v3069_v63  ;;  %v6411_v21 = vsel %vm3226_vm4, %v3195_v61, %v3257_v10  ;;  %v5355_v57 = vmov 0.0  }
 0x42c   :  { %v3071_v3 = vsel %vm3064_vm2, %v3068_v59, %v3070_v0  ;;  %v2865_v4 = vpop.f32.mrb[8].mxu1  ;;  %4589 = vmatprep.subr.bf16.mxu1 %v5355_v57 }
 0x42d   :  { %v3196_v5 = vadd.f32 %v6400_v46, %v3158_v2  ;;  %v3159_v6 = vmax.f32 %v3004_v50, %v3071_v3  ;;  %v2867_v8 = vpop.f32.mrb[9].mxu1  ;;  %4590 = vmatpush3.bf16.msra.mxu1 %v5279_v12 }
 0x42e   :  { %v3006_v11 = vmax.f32 %v2865_v4, %v2867_v8  ;;  %v2869_v13 = vpop.f32.mrb[10].mxu1  ;;  %4591 = vmatprep.subr.bf16.mxu1 %v5355_v57 }
 0x42f   :  { %v2871_v14 = vpop.f32.mrb[11].mxu1  ;;  %vm3227_vm5 = vcmp.gt.f32.partialorder %v3196_v5, 0.0  ;;  %v3258_v15 = vmul.f32 0.01, %v3196_v5  ;;  %v3197_v20 = vadd.f32 %v6400_v46, %v3159_v6 }
 0x430   :  { %v3072_v16 = vrot.slane %v3006_v11, 2  ;;  %v3007_v17 = vmax.f32 %v2869_v13, %v2871_v14  ;;  %v5282_v13 = vld [vmem:[%s6826_s3 + $0x58] sm:$0xff]  }
 0x431   :  { %v6413_v22 = vsel %vm3227_vm5, %v3196_v5, %v3258_v15  ;;  %v3259_v36 = vmul.f32 0.01, %v3197_v20  ;;  %vm3228_vm6 = vcmp.gt.f32.partialorder %v3197_v20, 0.0  ;;  %4592 = vmatpush3.bf16.msra.mxu1 %v5280_v18 }
 0x432   :  { %v3073_v24 = vsel %vm3064_vm2, %v3070_v0, %v3072_v16  ;;  %v3074_v26 = vrot.slane %v3007_v17, 2  ;;  %v3324_v27 = vpack.c.bf16 %v6413_v22, %v6411_v21  ;;  %v5281_v0 = vld [vmem:[%s6826_s3 + $0x50] sm:$0xff]   ;;  %4593 = vmatprep.subr.bf16.mxu1 %v5355_v57 }
 0x433   :  { %v3160_v28 = vmax.f32 %v3005_v60, %v3073_v24  ;;  %v6421_v49 = vsel %vm3228_vm6, %v3197_v20, %v3259_v36 }
 0x434   :  { %v3075_v29 = vsel %vm3064_vm2, %v3072_v16, %v3074_v26  ;;  %v2875_v30 = vpop.f32.mrb[12].mxu1 }
 0x435   :  { %v3198_v31 = vadd.f32 %v6400_v46, %v3160_v28  ;;  %v3161_v33 = vmax.f32 %v3006_v11, %v3075_v29  ;;  %v2877_v34 = vpop.f32.mrb[13].mxu1  ;;  %4594 = vmatpush3.bf16.msra.mxu1 %v5281_v0 }
 0x436   :  { %v3008_v38 = vmax.f32 %v2875_v30, %v2877_v34  ;;  %v2879_v39 = vpop.f32.mrb[14].mxu1  ;;  %4595 = vmatprep.subr.bf16.mxu1 %v5355_v57 }
 0x437   :  { %v2881_v40 = vpop.f32.mrb[15].mxu1  ;;  %vm3229_vm7 = vcmp.gt.f32.partialorder %v3198_v31, 0.0  ;;  %v3260_v42 = vmul.f32 0.01, %v3198_v31  ;;  %v3199_v47 = vadd.f32 %v6400_v46, %v3161_v33 }
 0x438   :  { %v3076_v43 = vrot.slane %v3008_v38, 2  ;;  %v3009_v45 = vmax.f32 %v2879_v39, %v2881_v40 }
 0x439   :  { %v6423_v44 = vsel %vm3229_vm7, %v3198_v31, %v3260_v42  ;;  %v3261_v48 = vmul.f32 0.01, %v3199_v47  ;;  %vm3230_vm8 = vcmp.gt.f32.partialorder %v3199_v47, 0.0  ;;  %4596 = vmatpush3.bf16.msra.mxu1 %v5282_v13  ;;  %v5283_v31 = vld [vmem:[%s6826_s3 + $0x60] sm:$0xff]  }
 0x43a   :  { %v3077_v51 = vsel %vm3064_vm2, %v3074_v26, %v3076_v43  ;;  %v3078_v52 = vrot.slane %v3009_v45, 2  ;;  %v3325_v53 = vpack.c.bf16 %v6423_v44, %v6421_v49  ;;  %4597 = vmatprep.subr.bf16.mxu1 %v5355_v57 }
 0x43b   :  { %v3162_v55 = vmax.f32 %v3007_v17, %v3077_v51  ;;  %v6439_v58 = vsel %vm3230_vm8, %v3199_v47, %v3261_v48  ;;  %v5284_v47 = vld [vmem:[%s6826_s3 + $0x68] sm:$0xff]  }
 0x43c   :  { %v3079_v54 = vsel %vm3064_vm2, %v3076_v43, %v3078_v52  ;;  %v2885_v7 = vpop.f32.mrb[16].mxu1 }
 0x43d   :  { %v3200_v23 = vadd.f32 %v6400_v46, %v3162_v55  ;;  %v3163_v32 = vmax.f32 %v3008_v38, %v3079_v54  ;;  %v2887_v37 = vpop.f32.mrb[17].mxu1  ;;  %4598 = vmatpush3.bf16.msra.mxu1 %v5283_v31 }
 0x43e   :  { %v3010_v62 = vmax.f32 %v2885_v7, %v2887_v37  ;;  %v2889_v9 = vpop.f32.mrb[18].mxu1  ;;  %4599 = vmatprep.subr.bf16.mxu1 %v5355_v57 }
 0x43f   :  { %v2891_v25 = vpop.f32.mrb[19].mxu1  ;;  %vm3231_vm9 = vcmp.gt.f32.partialorder %v3200_v23, 0.0  ;;  %v3262_v35 = vmul.f32 0.01, %v3200_v23  ;;  %v3201_v56 = vadd.f32 %v6400_v46, %v3163_v32 }
 0x440   :  { %v3080_v41 = vrot.slane %v3010_v62, 2  ;;  %v3011_v50 = vmax.f32 %v2889_v9, %v2891_v25 }
 0x441   :  { %v6441_v59 = vsel %vm3231_vm9, %v3200_v23, %v3262_v35  ;;  %v3263_v8 = vmul.f32 0.01, %v3201_v56  ;;  %vm3232_vm10 = vcmp.gt.f32.partialorder %v3201_v56, 0.0  ;;  %4600 = vmatpush3.bf16.msra.mxu1 %v5284_v47 }
 0x442   :  { %v3081_v60 = vsel %vm3064_vm2, %v3078_v52, %v3080_v41  ;;  %v3082_v61 = vrot.slane %v3011_v50, 2  ;;  %v3326_v63 = vpack.c.bf16 %v6441_v59, %v6439_v58  ;;  %4601 = vmatprep.subr.bf16.mxu1 %v5355_v57 }
 0x443   :  { %v3164_v1 = vmax.f32 %v3009_v45, %v3081_v60  ;;  %v6457_v24 = vsel %vm3232_vm10, %v3201_v56, %v3263_v8 }
 0x444   :  { %v3083_v2 = vsel %vm3064_vm2, %v3080_v41, %v3082_v61  ;;  %v2895_v3 = vpop.f32.mrb[20].mxu1 }
 0x445   :  { %v3202_v4 = vadd.f32 %v6400_v46, %v3164_v1  ;;  %v3165_v5 = vmax.f32 %v3010_v62, %v3083_v2  ;;  %v2897_v6 = vpop.f32.mrb[21].mxu1 }
 0x446   :  { %v3012_v10 = vmax.f32 %v2895_v3, %v2897_v6  ;;  %v2899_v11 = vpop.f32.mrb[22].mxu1 }
 0x447   :  { %v2901_v14 = vpop.f32.mrb[23].mxu1  ;;  %vm3233_vm11 = vcmp.gt.f32.partialorder %v3202_v4, 0.0  ;;  %v3264_v15 = vmul.f32 0.01, %v3202_v4  ;;  %v3203_v20 = vadd.f32 %v6400_v46, %v3165_v5 }
 0x448   :  { %v3084_v16 = vrot.slane %v3012_v10, 2  ;;  %v3013_v17 = vmax.f32 %v2899_v11, %v2901_v14 }
 0x449   :  { %v6459_v26 = vsel %vm3233_vm11, %v3202_v4, %v3264_v15  ;;  %v3265_v42 = vmul.f32 0.01, %v3203_v20  ;;  %vm3234_vm12 = vcmp.gt.f32.partialorder %v3203_v20, 0.0 }
 0x44a   :  { %v3085_v28 = vsel %vm3064_vm2, %v3082_v61, %v3084_v16  ;;  %v3086_v29 = vrot.slane %v3013_v17, 2  ;;  %v3327_v30 = vpack.c.bf16 %v6459_v26, %v6457_v24 }
 0x44b   :  { %v3166_v33 = vmax.f32 %v3011_v50, %v3085_v28  ;;  %v6475_v12 = vsel %vm3234_vm12, %v3203_v20, %v3265_v42 }
 0x44c   :  { %v3087_v34 = vsel %vm3064_vm2, %v3084_v16, %v3086_v29  ;;  %v2905_v36 = vpop.f32.mrb[24].mxu1 }
 0x44d   :  { %v3204_v38 = vadd.f32 %v6400_v46, %v3166_v33  ;;  %v3167_v39 = vmax.f32 %v3012_v10, %v3087_v34  ;;  %v2907_v40 = vpop.f32.mrb[25].mxu1 }
 0x44e   :  { %v3014_v43 = vmax.f32 %v2905_v36, %v2907_v40  ;;  %v2909_v45 = vpop.f32.mrb[26].mxu1 }
 0x44f   :  { %v2911_v51 = vpop.f32.mrb[27].mxu1  ;;  %vm3235_vm13 = vcmp.gt.f32.partialorder %v3204_v38, 0.0  ;;  %v3266_v52 = vmul.f32 0.01, %v3204_v38  ;;  %v3205_v7 = vadd.f32 %v6400_v46, %v3167_v39 }
 0x450   :  { %v3088_v55 = vrot.slane %v3014_v43, 2  ;;  %v3015_v54 = vmax.f32 %v2909_v45, %v2911_v51 }
 0x451   :  { %v6477_v23 = vsel %vm3235_vm13, %v3204_v38, %v3266_v52  ;;  %v3267_v50 = vmul.f32 0.01, %v3205_v7  ;;  %vm3236_vm14 = vcmp.gt.f32.partialorder %v3205_v7, 0.0 }
 0x452   :  { %v3089_v32 = vsel %vm3064_vm2, %v3086_v29, %v3088_v55  ;;  %v3090_v37 = vrot.slane %v3015_v54, 2  ;;  %v3328_v48 = vpack.c.bf16 %v6477_v23, %v6475_v12 }
 0x453   :  { %v3168_v62 = vmax.f32 %v3013_v17, %v3089_v32  ;;  %v6486_v4 = vsel %vm3236_vm14, %v3205_v7, %v3267_v50 }
 0x454   :  { %v3091_v9 = vsel %vm3064_vm2, %v3088_v55, %v3090_v37  ;;  %v2915_v18 = vpop.f32.mrb[28].mxu1 }
 0x455   :  { %v3206_v25 = vadd.f32 %v6400_v46, %v3168_v62  ;;  %v3169_v35 = vmax.f32 %v3014_v43, %v3091_v9  ;;  %v2917_v41 = vpop.f32.mrb[29].mxu1 }
 0x456   :  { %v3016_v56 = vmax.f32 %v2915_v18, %v2917_v41  ;;  %v2919_v60 = vpop.f32.mrb[30].mxu1 }
 0x457   :  { %v2921_v61 = vpop.f32.mrb[31].mxu1  ;;  %vm3237_vm15 = vcmp.gt.f32.partialorder %v3206_v25, 0.0  ;;  %v3268_v0 = vmul.f32 0.01, %v3206_v25  ;;  %v3207_v3 = vadd.f32 %v6400_v46, %v3169_v35 }
 0x458   :  { %v3092_v1 = vrot.slane %v3016_v56, 2  ;;  %v3017_v2 = vmax.f32 %v2919_v60, %v2921_v61 }
 0x459   :  { %v6488_v5 = vsel %vm3237_vm15, %v3206_v25, %v3268_v0  ;;  %v3269_v20 = vmul.f32 0.01, %v3207_v3  ;;  %vm3238_vm1 = vcmp.gt.f32.partialorder %v3207_v3, 0.0 }
 0x45a   :  { %v3093_v6 = vsel %vm3064_vm2, %v3090_v37, %v3092_v1  ;;  %v3094_v8 = vrot.slane %v3017_v2, 2  ;;  %v3329_v10 = vpack.c.bf16 %v6488_v5, %v6486_v4  ;;  %v3323_v4 = vld [vmem:[%s6827_s4 + $0x20] sm:$0xff]  ;;  %v5276_v5 = vld [vmem:[%s6827_s4 + $0x10] ss:$8 sps:$4 sm:$0xff]  }
 0x45b   :  { %v3170_v11 = vmax.f32 %v3015_v54, %v3093_v6  ;;  %v6496_v39 = vsel %vm3238_vm1, %v3207_v3, %v3269_v20 }
 0x45c   :  { %v3095_v13 = vsel %vm3064_vm2, %v3092_v1, %v3094_v8  ;;  %v2925_v14 = vpop.f32.mrb[32].mxu1 }
 0x45d   :  { %v3208_v15 = vadd.f32 %v6400_v46, %v3170_v11  ;;  %v3171_v16 = vmax.f32 %v3016_v56, %v3095_v13  ;;  %v2927_v17 = vpop.f32.mrb[33].mxu1 }
 0x45e   :  { %v3018_v28 = vmax.f32 %v2925_v14, %v2927_v17  ;;  %v2929_v29 = vpop.f32.mrb[34].mxu1 }
 0x45f   :  { %v2931_v31 = vpop.f32.mrb[35].mxu1  ;;  %vm3239_vm0 = vcmp.gt.f32.partialorder %v3208_v15, 0.0  ;;  %v3270_v33 = vmul.f32 0.01, %v3208_v15  ;;  %v3209_v38 = vadd.f32 %v6400_v46, %v3171_v16 }
 0x460   :  { %v3096_v34 = vrot.slane %v3018_v28, 2  ;;  %v3019_v36 = vmax.f32 %v2929_v29, %v2931_v31 }
 0x461   :  { %v6498_v40 = vsel %vm3239_vm0, %v3208_v15, %v3270_v33  ;;  %v3271_v32 = vmul.f32 0.01, %v3209_v38  ;;  %vm3240_vm4 = vcmp.gt.f32.partialorder %v3209_v38, 0.0 }
 0x462   :  { %v3097_v42 = vsel %vm3064_vm2, %v3094_v8, %v3096_v34  ;;  %v3098_v43 = vrot.slane %v3019_v36, 2  ;;  %v3330_v45 = vpack.c.bf16 %v6498_v40, %v6496_v39  ;;  %v4364_v39 = vcombine.low %v3323_v4, %v3323_v4  ;;  %v5287_v40 = vld [vmem:[%s6826_s3] sm:$0xff]  }
 0x463   :  { %v3172_v47 = vmax.f32 %v3017_v2, %v3097_v42  ;;  %v6506_v50 = vsel %vm3240_vm4, %v3209_v38, %v3271_v32  ;;  %vm3374_vm4 = vcmask 1040384  }
 0x464   :  { %v3099_v51 = vsel %vm3064_vm2, %v3096_v34, %v3098_v43  ;;  %v2935_v52 = vpop.f32.mrb[36].mxu1 }
 0x465   :  { %v3210_v55 = vadd.f32 %v6400_v46, %v3172_v47  ;;  %v3173_v54 = vmax.f32 %v3018_v28, %v3099_v51  ;;  %v2937_v7 = vpop.f32.mrb[37].mxu1 }
 0x466   :  { %v3020_v37 = vmax.f32 %v2935_v52, %v2937_v7  ;;  %v2939_v62 = vpop.f32.mrb[38].mxu1 }
 0x467   :  { %v2941_v9 = vpop.f32.mrb[39].mxu1  ;;  %vm3241_vm5 = vcmp.gt.f32.partialorder %v3210_v55, 0.0  ;;  %v3272_v18 = vmul.f32 0.01, %v3210_v55  ;;  %v3211_v41 = vadd.f32 %v6400_v46, %v3173_v54 }
 0x468   :  { %v3100_v25 = vrot.slane %v3020_v37, 2  ;;  %v3021_v35 = vmax.f32 %v2939_v62, %v2941_v9 }
 0x469   :  { %v6508_v56 = vsel %vm3241_vm5, %v3210_v55, %v3272_v18  ;;  %v3273_v13 = vmul.f32 0.01, %v3211_v41  ;;  %vm3242_vm6 = vcmp.gt.f32.partialorder %v3211_v41, 0.0 }
 0x46a   :  { %v3101_v60 = vsel %vm3064_vm2, %v3098_v43, %v3100_v25  ;;  %v3102_v61 = vrot.slane %v3021_v35, 2  ;;  %v3331_v0 = vpack.c.bf16 %v6508_v56, %v6506_v50  ;;  %v5291_v50 = vld [vmem:[%s6826_s3 + $0x10] sm:$0xff]   ;;  %v5293_v56 = vld [vmem:[%s6826_s3 + $0x18] sm:$0xff]  }
 0x46b   :  { %v3174_v1 = vmax.f32 %v3019_v36, %v3101_v60  ;;  %v3304_v29 = vsel %vm3242_vm6, %v3211_v41, %v3273_v13 }
 0x46c   :  { %v3103_v2 = vsel %vm3064_vm2, %v3100_v25, %v3102_v61  ;;  %v2945_v3 = vpop.f32.mrb[40].mxu1 }
 0x46d   :  { %v3175_v6 = vmax.f32 %v3020_v37, %v3103_v2  ;;  %v2947_v8 = vpop.f32.mrb[41].mxu1  ;;  %v3212_v11 = vadd.f32 %v6400_v46, %v3174_v1 }
 0x46e   :  { %v3022_v14 = vmax.f32 %v2945_v3, %v2947_v8  ;;  %v2949_v15 = vpop.f32.mrb[42].mxu1 }
 0x46f   :  { %v2951_v16 = vpop.f32.mrb[43].mxu1  ;;  %vm3243_vm7 = vcmp.gt.f32.partialorder %v3212_v11, 0.0  ;;  %v3274_v17 = vmul.f32 0.01, %v3212_v11  ;;  %v3213_v33 = vadd.f32 %v6400_v46, %v3175_v6 }
 0x470   :  { %v3104_v20 = vrot.slane %v3022_v14, 2  ;;  %v3023_v28 = vmax.f32 %v2949_v15, %v2951_v16 }
 0x471   :  { %v3305_v31 = vsel %vm3243_vm7, %v3212_v11, %v3274_v17  ;;  %v3275_v54 = vmul.f32 0.01, %v3213_v33  ;;  %vm3244_vm8 = vcmp.gt.f32.partialorder %v3213_v33, 0.0 }
 0x472   :  { %v3105_v34 = vsel %vm3064_vm2, %v3102_v61, %v3104_v20  ;;  %v3106_v36 = vrot.slane %v3023_v28, 2  ;;  %v3332_v38 = vpack.c.bf16 %v3305_v31, %v3304_v29 }
 0x473   :  { %v3176_v42 = vmax.f32 %v3021_v35, %v3105_v34  ;;  %v3306_v25 = vsel %vm3244_vm8, %v3213_v33, %v3275_v54 }
 0x474   :  { %v3107_v43 = vsel %vm3064_vm2, %v3104_v20, %v3106_v36  ;;  %v2955_v47 = vpop.f32.mrb[44].mxu1  ;;  %4484 = vmatprep.subr.bf16.mxu0 %v3332_v38 }
 0x475   :  { %v3177_v51 = vmax.f32 %v3022_v14, %v3107_v43  ;;  %v2957_v52 = vpop.f32.mrb[45].mxu1  ;;  %4485 = vmatpush3.bf16.msra.mxu0 %v3324_v27  ;;  %v3214_v55 = vadd.f32 %v6400_v46, %v3176_v42 }
 0x476   :  { %v3024_v7 = vmax.f32 %v2955_v47, %v2957_v52  ;;  %v2959_v32 = vpop.f32.mrb[46].mxu1 }
 0x477   :  { %v2961_v37 = vpop.f32.mrb[47].mxu1  ;;  %vm3245_vm9 = vcmp.gt.f32.partialorder %v3214_v55, 0.0  ;;  %v3276_v62 = vmul.f32 0.01, %v3214_v55  ;;  %v3215_v41 = vadd.f32 %v6400_v46, %v3177_v51 }
 0x478   :  { %v3108_v9 = vrot.slane %v3024_v7, 2  ;;  %v3025_v18 = vmax.f32 %v2959_v32, %v2961_v37 }
 0x479   :  { %v3307_v35 = vsel %vm3245_vm9, %v3214_v55, %v3276_v62  ;;  %v3277_v8 = vmul.f32 0.01, %v3215_v41  ;;  %vm3246_vm10 = vcmp.gt.f32.partialorder %v3215_v41, 0.0  ;;  %vm4191_vm9 = vcmask 80896  }
 0x47a   :  { %v3109_v60 = vsel %vm3064_vm2, %v3106_v36, %v3108_v9  ;;  %v3110_v61 = vrot.slane %v3025_v18, 2  ;;  %v3333_v21 = vpack.c.bf16 %v3307_v35, %v3306_v25 }
 0x47b   :  { %v3178_v22 = vmax.f32 %v3023_v28, %v3109_v60  ;;  %v3308_v20 = vsel %vm3246_vm10, %v3215_v41, %v3277_v8 }
 0x47c   :  { %v3111_v27 = vsel %vm3064_vm2, %v3108_v9, %v3110_v61  ;;  %v2965_v1 = vpop.f32.mrb[48].mxu1  ;;  %4486 = vmatprep.subr.bf16.mxu0 %v3333_v21 }
 0x47d   :  { %v3179_v2 = vmax.f32 %v3024_v7, %v3111_v27  ;;  %v2967_v3 = vpop.f32.mrb[49].mxu1  ;;  %4487 = vmatpush3.bf16.msra.mxu0 %v3325_v53  ;;  %v3216_v6 = vadd.f32 %v6400_v46, %v3178_v22 }
 0x47e   :  { %v3026_v11 = vmax.f32 %v2965_v1, %v2967_v3  ;;  %v2969_v13 = vpop.f32.mrb[50].mxu1 }
 0x47f   :  { %v2971_v14 = vpop.f32.mrb[51].mxu1  ;;  %vm3247_vm11 = vcmp.gt.f32.partialorder %v3216_v6, 0.0  ;;  %v3278_v15 = vmul.f32 0.01, %v3216_v6  ;;  %v3217_v29 = vadd.f32 %v6400_v46, %v3179_v2 }
 0x480   :  { %v3112_v16 = vrot.slane %v3026_v11, 2  ;;  %v3027_v17 = vmax.f32 %v2969_v13, %v2971_v14 }
 0x481   :  { %v3309_v28 = vsel %vm3247_vm11, %v3216_v6, %v3278_v15  ;;  %v3279_v43 = vmul.f32 0.01, %v3217_v29  ;;  %vm3248_vm12 = vcmp.gt.f32.partialorder %v3217_v29, 0.0 }
 0x482   :  { %v3113_v31 = vsel %vm3064_vm2, %v3110_v61, %v3112_v16  ;;  %v3114_v33 = vrot.slane %v3027_v17, 2  ;;  %v3334_v49 = vpack.c.bf16 %v3309_v28, %v3308_v20 }
 0x483   :  { %v3180_v44 = vmax.f32 %v3025_v18, %v3113_v31  ;;  %v3310_v32 = vsel %vm3248_vm12, %v3217_v29, %v3279_v43 }
 0x484   :  { %v3115_v53 = vsel %vm3064_vm2, %v3112_v16, %v3114_v33  ;;  %v2975_v34 = vpop.f32.mrb[52].mxu1  ;;  %4488 = vmatprep.subr.bf16.mxu0 %v3334_v49 }
 0x485   :  { %v3181_v36 = vmax.f32 %v3026_v11, %v3115_v53  ;;  %v2977_v38 = vpop.f32.mrb[53].mxu1  ;;  %4489 = vmatpush3.bf16.msra.mxu0 %v3326_v63  ;;  %v3218_v42 = vadd.f32 %v6400_v46, %v3180_v44 }
 0x486   :  { %v3028_v47 = vmax.f32 %v2975_v34, %v2977_v38  ;;  %v2979_v51 = vpop.f32.mrb[54].mxu1 }
 0x487   :  { %v2981_v52 = vpop.f32.mrb[55].mxu1  ;;  %vm3249_vm13 = vcmp.gt.f32.partialorder %v3218_v42, 0.0  ;;  %v3280_v55 = vmul.f32 0.01, %v3218_v42  ;;  %v3219_v62 = vadd.f32 %v6400_v46, %v3181_v36 }
 0x488   :  { %v3116_v54 = vrot.slane %v3028_v47, 2  ;;  %v3029_v7 = vmax.f32 %v2979_v51, %v2981_v52 }
 0x489   :  { %v3311_v37 = vsel %vm3249_vm13, %v3218_v42, %v3280_v55  ;;  %v3281_v61 = vmul.f32 0.01, %v3219_v62  ;;  %vm3250_vm14 = vcmp.gt.f32.partialorder %v3219_v62, 0.0 }
 0x48a   :  { %v3117_v9 = vsel %vm3064_vm2, %v3114_v33, %v3116_v54  ;;  %v3118_v18 = vrot.slane %v3029_v7, 2  ;;  %v3335_v58 = vpack.c.bf16 %v3311_v37, %v3310_v32 }
 0x48b   :  { %v3182_v59 = vmax.f32 %v3027_v17, %v3117_v9  ;;  %v3312_v6 = vsel %vm3250_vm14, %v3219_v62, %v3281_v61 }
 0x48c   :  { %v3119_v63 = vsel %vm3064_vm2, %v3116_v54, %v3118_v18  ;;  %v2985_v25 = vpop.f32.mrb[56].mxu1  ;;  %4490 = vmatprep.subr.bf16.mxu0 %v3335_v58  ;;  %v3376_v54 = vsel %vm3374_vm4, 65535, %v5354_v19  ;;  %v5274_v19 = vld [vmem:[%s6827_s4 + $0x14] ss:$8 sps:$4 sm:$0xff]  }
 0x48d   :  { %v3183_v35 = vmax.f32 %v3028_v47, %v3119_v63  ;;  %v2987_v41 = vpop.f32.mrb[57].mxu1  ;;  %4491 = vmatpush3.bf16.msra.mxu0 %v3327_v30  ;;  %v3220_v60 = vadd.f32 %v6400_v46, %v3182_v59  ;;  %v5299_v58 = vld [vmem:[%s6826_s3 + $0x30] sm:$0xff]   ;;  %v5301_v63 = vld [vmem:[%s6826_s3 + $0x38] sm:$0xff]  }
 0x48e   :  { %v3030_v21 = vmax.f32 %v2985_v25, %v2987_v41  ;;  %v2989_v22 = vpop.f32.mrb[58].mxu1  ;;  %v5285_v59 = vld [vmem:[%s6826_s3 + $0x70] sm:$0xff]   ;;  %v5286_v25 = vld [vmem:[%s6826_s3 + $0x78] sm:$0xff]  }
 0x48f   :  { %v2991_v27 = vpop.f32.mrb[59].mxu1  ;;  %vm3251_vm15 = vcmp.gt.f32.partialorder %v3220_v60, 0.0  ;;  %v3282_v1 = vmul.f32 0.01, %v3220_v60  ;;  %v3221_v11 = vadd.f32 %v6400_v46, %v3183_v35  ;;  %4602 = vmatpush3.bf16.msra.mxu1 %v5285_v59  ;;  %v4102_v59 = vld [vmem:[%s6829_s6 + $0x20] sm:$0xff] }
 0x490   :  { %v3120_v2 = vrot.slane %v3030_v21, 2  ;;  %v3031_v3 = vmax.f32 %v2989_v22, %v2991_v27  ;;  %4603 = vmatprep.subr.bf16.mxu1 %v5355_v57  ;;  %v5303_v27 = vld [vmem:[%s6826_s3 + $0xc0] sm:$0xff]  }
 0x491   :  { %v3313_v8 = vsel %vm3251_vm15, %v3220_v60, %v3282_v1  ;;  %v3283_v28 = vmul.f32 0.01, %v3221_v11  ;;  %vm3252_vm1 = vcmp.gt.f32.partialorder %v3221_v11, 0.0 }
 0x492   :  { %v3121_v13 = vsel %vm3064_vm2, %v3118_v18, %v3120_v2  ;;  %v3122_v14 = vrot.slane %v3031_v3, 2  ;;  %v3336_v24 = vpack.c.bf16 %v3313_v8, %v3312_v6  ;;  %v5297_v18 = vld [vmem:[%s6826_s3 + $0x28] sm:$0xff]  }
 0x493   :  { %v3184_v26 = vmax.f32 %v3029_v7, %v3121_v13  ;;  %v3314_v53 = vsel %vm3252_vm1, %v3221_v11, %v3283_v28  ;;  %4604 = vmatpush3.bf16.msra.mxu1 %v5286_v25  ;;  %v5305_v11 = vld [vmem:[%s6826_s3 + $0xc8] sm:$0xff]   ;;  %v5309_v28 = vld [vmem:[%s6826_s3 + $0xd8] sm:$0xff]  }
 0x494   :  { %v3123_v30 = vsel %vm3064_vm2, %v3120_v2, %v3122_v14  ;;  %v2995_v15 = vpop.f32.mrb[60].mxu1  ;;  %4492 = vmatprep.subr.bf16.mxu0 %v3336_v24  ;;  %4629 = vmatprep.subr.bf16.mxu1 %v5355_v57  ;;  %v5288_v2 = vld [vmem:[%s6826_s3 + $0x80] sm:$0xff]   ;;  %v5290_v24 = vld [vmem:[%s6826_s3 + $0x88] sm:$0xff]  }
 0x495   :  { %v3185_v16 = vmax.f32 %v3030_v21, %v3123_v30  ;;  %v2997_v17 = vpop.f32.mrb[61].mxu1  ;;  %4493 = vmatpush3.bf16.msra.mxu0 %v3328_v48  ;;  %v3222_v20 = vadd.f32 %v6400_v46, %v3184_v26 }
 0x496   :  { %v3032_v29 = vmax.f32 %v2995_v15, %v2997_v17  ;;  %v2999_v31 = vpop.f32.mrb[62].mxu1  ;;  %v5307_v15 = vld [vmem:[%s6826_s3 + $0xd0] sm:$0xff]  }
 0x497   :  { %v3000_v33 = vpop.f32.mrb[63].mxu1  ;;  %vm3253_vm0 = vcmp.gt.f32.partialorder %v3222_v20, 0.0  ;;  %v3284_v49 = vmul.f32 0.01, %v3222_v20  ;;  %v3223_v36 = vadd.f32 %v6400_v46, %v3185_v16  ;;  %v5292_v17 = vld [vmem:[%s6826_s3 + $0x90] sm:$0xff]  }
 0x498   :  { %v3124_v44 = vrot.slane %v3032_v29, 2 }
 0x499   :  { %v3315_v34 = vsel %vm3253_vm0, %v3222_v20, %v3284_v49  ;;  %v3285_v47 = vmul.f32 0.01, %v3223_v36  ;;  %vm3254_vm5 = vcmp.gt.f32.partialorder %v3223_v36, 0.0  ;;  %v5294_v49 = vld [vmem:[%s6826_s3 + $0x98] sm:$0xff]  }
 0x49a   :  { %v3125_v38 = vsel %vm3064_vm2, %v3122_v14, %v3124_v44  ;;  %v3187_v42 = vmax.f32 %v3032_v29, %v3124_v44  ;;  %v3337_v43 = vpack.c.bf16 %v3315_v34, %v3314_v53  ;;  %vm5356_vm2 = vmmov 0   ;;  %v5311_v53 = vld [vmem:[%s6826_s3 + $0xe0] sm:$0xff]  }
 0x49b   :  { %v3186_v12 = vmax.f32 %v3031_v3, %v3125_v38  ;;  %v3316_v7 = vsel %vm3254_vm5, %v3223_v36, %v3285_v47  ;;  %4605 = vmatprep.mubr.msk.bf16.mxu1 %vm5356_vm2, %v5355_v57  ;;  %v5296_v34 = vld [vmem:[%s6826_s3 + $0xa0] sm:$0xff]   ;;  %v5313_v36 = vld [vmem:[%s6826_s3 + $0xe8] sm:$0xff]  }
 0x49c   :  { %v3225_v23 = vadd.f32 %v6400_v46, %v3187_v42  ;;  %4494 = vmatprep.subr.bf16.mxu0 %v3337_v43  ;;  %v5298_v38 = vld [vmem:[%s6826_s3 + $0xa8] sm:$0xff]   ;;  %v5315_v42 = vld [vmem:[%s6826_s3 + $0xf0] sm:$0xff]   ;;  %v5319_v47 = vld [vmem:[%s6828_s5] sm:$0xff]  }
 0x49d   :  { %4495 = vmatpush3.bf16.msra.mxu0 %v3329_v10  ;;  %v3224_v48 = vadd.f32 %v6400_v46, %v3186_v12  ;;  %v5271_v46 = vld [vmem:[%s6827_s4] ss:$8 sps:$4 sm:$0xff]   ;;  %v4365_v10 = vcombine.high %v3323_v4, %v3323_v4  ;;  %v5300_v43 = vld [vmem:[%s6826_s3 + $0xb0] sm:$0xff]   ;;  %v5317_v12 = vld [vmem:[%s6826_s3 + $0xf8] sm:$0xff]  }
 0x49e   :  { %v3287_v51 = vmul.f32 0.01, %v3225_v23  ;;  %vm3256_vm6 = vcmp.gt.f32.partialorder %v3225_v23, 0.0 }
 0x49f   :  { %vm3255_vm7 = vcmp.gt.f32.partialorder %v3224_v48, 0.0  ;;  %v3286_v52 = vmul.f32 0.01, %v3224_v48 }
 0x4a0   :  { %v3318_v55 = vsel %vm3256_vm6, %v3225_v23, %v3287_v51  ;;  %v5302_v23 = vld [vmem:[%s6826_s3 + $0xb8] sm:$0xff]   ;;  %v5304_v51 = vld [vmem:[%s6826_s3 + $0x100] sm:$0xff]  }
 0x4a1   :  { %v3317_v32 = vsel %vm3255_vm7, %v3224_v48, %v3286_v52  ;;  %v3339_v37 = vpack.c.bf16 %v3318_v55, %v3318_v55  ;;  %v5320_v52 = vld [vmem:[%s6828_s5 + $0x8] sm:$0xff]  }
 0x4a2   :  { %v3338_v62 = vpack.c.bf16 %v3317_v32, %v3316_v7  ;;  %v5306_v55 = vld [vmem:[%s6826_s3 + $0x108] sm:$0xff]   ;;  %v5308_v7 = vld [vmem:[%s6826_s3 + $0x110] sm:$0xff]   ;;  %v5322_v32 = vld [vmem:[%s6828_s5 + $0x18] sm:$0xff]  }
 0x4a3   :  { %v3378_v9 = vand.u32 %v3376_v54, %v3339_v37  ;;  %v5321_v54 = vld [vmem:[%s6828_s5 + $0x10] sm:$0xff]   ;;  %v5310_v37 = vld [vmem:[%s6826_s3 + $0x118] sm:$0xff]  }
 0x4a4   :  { %4496 = vmatprep.subr.bf16.mxu0 %v3338_v62  ;;  %v5312_v62 = vld [vmem:[%s6826_s3 + $0x120] sm:$0xff]  }
 0x4a5   :  { %4497 = vmatpush3.bf16.msra.mxu0 %v3330_v45  ;;  %v5289_v45 = vld [vmem:[%s6826_s3 + $0x8] sm:$0xff]  }
 0x4a6   :  { %4498 = vmatprep.subr.bf16.mxu0 %v3378_v9  ;;  %v5314_v9 = vld [vmem:[%s6826_s3 + $0x128] sm:$0xff]  }
 0x4a9   :  { %4499 = vmatpush3.bf16.msra.mxu0 %v3331_v0  ;;  %v5295_v0 = vld [vmem:[%s6826_s3 + $0x20] sm:$0xff]  }
 0x4aa   :  { %4609 = vmatprep.subr.bf16.mxu0 %v5355_v57 }
 0x4ac   :  { %3413 = vmatmul.mubr.bf16.vlgmr.msra.gmra.mrb[64].mxu0 %v5271_v46  ;;  %v5316_v46 = vld [vmem:[%s6826_s3 + $0x130] sm:$0xff]  }
 0x4ad   :  { %4367 = vmatprep.mubr.msk.bf16.mxu0 %vm3364_vm3, %v5274_v19  ;;  %4610 = vmatpush3.bf16.msra.mxu0 %v5287_v40  ;;  %v5318_v19 = vld [vmem:[%s6826_s3 + $0x138] sm:$0xff]  }
 0x4ae   :  { %4611 = vmatprep.subr.bf16.mxu0 %v5355_v57  ;;  %v5326_v40 = vld [vmem:[%s6828_s5 + $0x38] sm:$0xff]  }
 0x4b1   :  { %4612 = vmatpush3.bf16.msra.mxu0 %v5289_v45  ;;  %v4098_v45 = vld [vmem:[%s6829_s6] sm:$0xff] }
 0x4b2   :  { %4613 = vmatprep.subr.bf16.mxu0 %v5355_v57 }
 0x4b4   :  { %3421 = vmatmul.mubr.bf16.gmra.mrb[68].mxu0 %v5276_v5  ;;  %v5323_v5 = vld [vmem:[%s6828_s5 + $0x20] sm:$0xff]  }
 0x4b5   :  { %4368 = vmatprep.mubr.msk.bf16.mxu0 %vm3364_vm3, %v4365_v10  ;;  %4614 = vmatpush3.bf16.msra.mxu0 %v5291_v50  ;;  %v5324_v10 = vld [vmem:[%s6828_s5 + $0x28] sm:$0xff]  }
 0x4b6   :  { %4615 = vmatprep.subr.bf16.mxu0 %v5355_v57  ;;  %v4099_v50 = vld [vmem:[%s6829_s6 + $0x8] sm:$0xff] }
 0x4b9   :  { %4616 = vmatpush3.bf16.msra.mxu0 %v5293_v56  ;;  %v4100_v56 = vld [vmem:[%s6829_s6 + $0x10] sm:$0xff] }
 0x4ba   :  { %4617 = vmatprep.subr.bf16.mxu0 %v5355_v57 }
 0x4bc   :  { %3429 = vmatmul.mubr.bf16.gmra.mrb[72].mxu0 %v4364_v39  ;;  %v5325_v39 = vld [vmem:[%s6828_s5 + $0x30] sm:$0xff]  }
 0x4bd   :  { %4618 = vmatpush3.bf16.msra.mxu0 %v5295_v0  ;;  %4625 = vmatprep.mubr.msk.bf16.mxu0 %vm5356_vm2, %v5355_v57  ;;  %v5357_v0 = vmov 0.0|0.0  }
 0x4be   :  { %4619 = vmatprep.subr.bf16.mxu0 %v5355_v57 }
 0x4c1   :  { %4620 = vmatpush3.bf16.msra.mxu0 %v5297_v18  ;;  %v4101_v18 = vld [vmem:[%s6829_s6 + $0x18] sm:$0xff] }
 0x4c2   :  { %4621 = vmatprep.subr.bf16.mxu0 %v5355_v57 }
 0x4c5   :  { %4622 = vmatpush3.bf16.msra.mxu0 %v5299_v58  ;;  %v4748_v58 = vpack.c.bf16 %v4101_v18, %v4100_v56 }
 0x4c6   :  { %4623 = vmatprep.subr.bf16.mxu0 %v5355_v57 }
 0x4c9   :  { %4624 = vmatpush3.bf16.msra.mxu0 %v5301_v63  ;;  %v4103_v63 = vld [vmem:[%s6829_s6 + $0x28] sm:$0xff] }
 0x4ca   :  { %4649 = vmatprep.subr.bf16.mxu0 %v5355_v57  ;;  %v4751_v25 = vpack.c.bf16 %v4103_v63, %v4102_v59 }
 0x57f   :  { %v4500_v35 = vpop.f32.mrb[64].mxu0 }
 0x580   :  { %v4501_v41 = vpop.f32.mrb[65].mxu0 }
 0x581   :  { %v4502_v60 = vadd.f32 %v4501_v41, %v4500_v35  ;;  %v4503_v61 = vpop.f32.mrb[66].mxu0  ;;  %v4104_v35 = vld [vmem:[%s6829_s6 + $0x30] sm:$0xff]  ;;  %v4105_v41 = vld [vmem:[%s6829_s6 + $0x38] sm:$0xff] }
 0x582   :  { %v4504_v21 = vpop.f32.mrb[67].mxu0 }
 0x583   :  { %v4505_v22 = vadd.f32 %v4504_v21, %v4503_v61  ;;  %v4106_v61 = vld [vmem:[%s6829_s6 + $0x40] sm:$0xff]  ;;  %v4107_v21 = vld [vmem:[%s6829_s6 + $0x48] sm:$0xff] }
 0x585   :  { %v3436_v1 = vpack.c.bf16 %v4505_v22, %v4502_v60  ;;  %v4754_v60 = vpack.c.bf16 %v4105_v41, %v4104_v35  ;;  %v4757_v22 = vpack.c.bf16 %v4107_v21, %v4106_v61 }
 0x587   :  { %v3473_v3 = vrot.slane %v3436_v1, 4  ;;  %v4506_v6 = vpop.f32.mrb[68].mxu0  ;;  %4626 = vmatmul.mubr.bf16.vlgmr.msra.gmra.mrb[76].mxu0 %v3436_v1  ;;  %v4109_v1 = vld [vmem:[%s6829_s6 + $0x58] sm:$0xff] }
 0x588   :  { %v4507_v8 = vpop.f32.mrb[69].mxu0  ;;  %4650 = vmatpush3.bf16.msra.mxu0 %v5303_v27  ;;  %4665 = vmatprep.mubr.msk.bf16.mxu0 %vm5356_vm2, %v5355_v57  ;;  %v4108_v27 = vld [vmem:[%s6829_s6 + $0x50] sm:$0xff] }
 0x589   :  { %4606 = vmatmul.mubr.bf16.vlgmr.msra.gmra.mrb[64].mxu1 %v3473_v3  ;;  %v4508_v13 = vadd.f32 %v4507_v8, %v4506_v6  ;;  %v4509_v14 = vpop.f32.mrb[70].mxu0  ;;  %4651 = vmatprep.subr.bf16.mxu0 %v5355_v57  ;;  %v4110_v3 = vld [vmem:[%s6829_s6 + $0x60] sm:$0xff]  ;;  %v4111_v6 = vld [vmem:[%s6829_s6 + $0x68] sm:$0xff] }
 0x58a   :  { %4630 = vmatpush3.bf16.msra.mxu1 %v5288_v2  ;;  %v4510_v26 = vpop.f32.mrb[71].mxu0  ;;  %4645 = vmatprep.mubr.msk.bf16.mxu1 %vm5356_vm2, %v5355_v57  ;;  %v4760_v2 = vpack.c.bf16 %v4109_v1, %v4108_v27  ;;  %v4763_v8 = vpack.c.bf16 %v4111_v6, %v4110_v3 }
 0x58b   :  { %4631 = vmatprep.subr.bf16.mxu1 %v5355_v57  ;;  %v4511_v30 = vadd.f32 %v4510_v26, %v4509_v14 }
 0x58c   :  { %4652 = vmatpush3.bf16.msra.mxu0 %v5305_v11 }
 0x58d   :  { %v3437_v16 = vpack.c.bf16 %v4511_v30, %v4508_v13  ;;  %4653 = vmatprep.subr.bf16.mxu0 %v5355_v57 }
 0x58e   :  { %4632 = vmatpush3.bf16.msra.mxu1 %v5290_v24 }
 0x58f   :  { %4633 = vmatprep.subr.bf16.mxu1 %v5355_v57  ;;  %v4512_v20 = vpop.f32.mrb[72].mxu0  ;;  %v3775_v48 = vrot.slane %v3437_v16, 4 }
 0x590   :  { %4654 = vmatpush3.bf16.msra.mxu0 %v5307_v15  ;;  %v4513_v29 = vpop.f32.mrb[73].mxu0 }
 0x591   :  { %4655 = vmatprep.subr.bf16.mxu0 %v5355_v57  ;;  %v6653_v31 = vadd.f32 %v4513_v29, %v4512_v20  ;;  %v4515_v33 = vpop.f32.mrb[74].mxu0 }
 0x592   :  { %4634 = vmatpush3.bf16.msra.mxu1 %v5292_v17  ;;  %v4516_v44 = vpop.f32.mrb[75].mxu0 }
 0x593   :  { %4635 = vmatprep.subr.bf16.mxu1 %v5355_v57  ;;  %v3438_v4 = vpack.c.bf16 %v6653_v31, %v6653_v31 }
 0x594   :  { %4656 = vmatpush3.bf16.msra.mxu0 %v5309_v28 }
 0x595   :  { %4657 = vmatprep.subr.bf16.mxu0 %v5355_v57 }
 0x596   :  { %4636 = vmatpush3.bf16.msra.mxu1 %v5294_v49 }
 0x597   :  { %4637 = vmatprep.subr.bf16.mxu1 %v5355_v57 }
 0x598   :  { %4658 = vmatpush3.bf16.msra.mxu0 %v5311_v53 }
 0x599   :  { %4659 = vmatprep.subr.bf16.mxu0 %v5355_v57 }
 0x59a   :  { %4638 = vmatpush3.bf16.msra.mxu1 %v5296_v34 }
 0x59b   :  { %4639 = vmatprep.subr.bf16.mxu1 %v5355_v57 }
 0x59c   :  { %4660 = vmatpush3.bf16.msra.mxu0 %v5313_v36 }
 0x59d   :  { %4661 = vmatprep.subr.bf16.mxu0 %v5355_v57 }
 0x59e   :  { %4640 = vmatpush3.bf16.msra.mxu1 %v5298_v38 }
 0x59f   :  { %4641 = vmatprep.subr.bf16.mxu1 %v5355_v57 }
 0x5a0   :  { %4662 = vmatpush3.bf16.msra.mxu0 %v5315_v42  ;;  %v4473_v42 = vld [vmem:[%s6832_s9] ss:$0 sm:$0xff] }
 0x5a1   :  { %4663 = vmatprep.subr.bf16.mxu0 %v5355_v57 }
 0x5a2   :  { %4642 = vmatpush3.bf16.msra.mxu1 %v5300_v43 }
 0x5a3   :  { %4643 = vmatprep.subr.bf16.mxu1 %v5355_v57 }
 0x5a4   :  { %4664 = vmatpush3.bf16.msra.mxu0 %v5317_v12 }
 0x5a5   :  { %4689 = vmatprep.subr.bf16.mxu0 %v5355_v57 }
 0x5a6   :  { %4644 = vmatpush3.bf16.msra.mxu1 %v5302_v23 }
 0x5a7   :  { %4669 = vmatprep.subr.bf16.mxu1 %v5355_v57  ;;  %4666 = vmatmul.mubr.bf16.vlgmr.msra.gmra.mrb[80].mxu0 %v3775_v48 }
 0x5a8   :  { %4690 = vmatpush3.bf16.msra.mxu0 %v5319_v47  ;;  %4705 = vmatprep.mubr.msk.bf16.mxu0 %vm5356_vm2, %v5355_v57 }
 0x5a9   :  { %4646 = vmatmul.mubr.bf16.vlgmr.msra.gmra.mrb[68].mxu1 %v3437_v16  ;;  %4691 = vmatprep.subr.bf16.mxu0 %v5355_v57 }
 0x5aa   :  { %4670 = vmatpush3.bf16.msra.mxu1 %v5304_v51  ;;  %4685 = vmatprep.mubr.msk.bf16.mxu1 %vm5356_vm2, %v5355_v57 }
 0x5ab   :  { %4671 = vmatprep.subr.bf16.mxu1 %v5355_v57 }
 0x5ac   :  { %4692 = vmatpush3.bf16.msra.mxu0 %v5320_v52 }
 0x5ad   :  { %4693 = vmatprep.subr.bf16.mxu0 %v5355_v57 }
 0x5ae   :  { %4672 = vmatpush3.bf16.msra.mxu1 %v5306_v55 }
 0x5af   :  { %4673 = vmatprep.subr.bf16.mxu1 %v5355_v57 }
 0x5b0   :  { %4694 = vmatpush3.bf16.msra.mxu0 %v5321_v54  ;;  %v4112_v54 = vld [vmem:[%s6829_s6 + $0x70] sm:$0xff] }
 0x5b1   :  { %4695 = vmatprep.subr.bf16.mxu0 %v5355_v57 }
 0x5b2   :  { %4674 = vmatpush3.bf16.msra.mxu1 %v5308_v7  ;;  %v4113_v7 = vld [vmem:[%s6829_s6 + $0x78] sm:$0xff] }
 0x5b3   :  { %4675 = vmatprep.subr.bf16.mxu1 %v5355_v57 }
 0x5b4   :  { %4696 = vmatpush3.bf16.msra.mxu0 %v5322_v32  ;;  %v4766_v32 = vpack.c.bf16 %v4113_v7, %v4112_v54 }
 0x5b5   :  { %4697 = vmatprep.subr.bf16.mxu0 %v5355_v57 }
 0x5b6   :  { %4676 = vmatpush3.bf16.msra.mxu1 %v5310_v37  ;;  %v4474_v37 = vld [vmem:[%s6833_s10] ss:$0 sm:$0xff] }
 0x5b7   :  { %4677 = vmatprep.subr.bf16.mxu1 %v5355_v57 }
 0x5b8   :  { %4698 = vmatpush3.bf16.msra.mxu0 %v5323_v5 }
 0x5b9   :  { %4699 = vmatprep.subr.bf16.mxu0 %v5355_v57 }
 0x5ba   :  { %4678 = vmatpush3.bf16.msra.mxu1 %v5312_v62 }
 0x5bb   :  { %4679 = vmatprep.subr.bf16.mxu1 %v5355_v57 }
 0x5bc   :  { %4700 = vmatpush3.bf16.msra.mxu0 %v5324_v10 }
 0x5bd   :  { %4701 = vmatprep.subr.bf16.mxu0 %v5355_v57 }
 0x5be   :  { %4680 = vmatpush3.bf16.msra.mxu1 %v5314_v9 }
 0x5bf   :  { %4681 = vmatprep.subr.bf16.mxu1 %v5355_v57 }
 0x5c0   :  { %4702 = vmatpush3.bf16.msra.mxu0 %v5325_v39  ;;  %v4483_v39 = vld [vmem:[%s6834_s11] ss:$0 sm:$0xff] }
 0x5c1   :  { %4703 = vmatprep.subr.bf16.mxu0 %v5355_v57 }
 0x5c2   :  { %4682 = vmatpush3.bf16.msra.mxu1 %v5316_v46 }
 0x5c3   :  { %4683 = vmatprep.subr.bf16.mxu1 %v5355_v57 }
 0x5c4   :  { %4704 = vmatpush3.bf16.msra.mxu0 %v5326_v40 }
 0x5c6   :  { %4684 = vmatpush3.bf16.msra.mxu1 %v5318_v19 }
 0x5c7   :  { %4744 = vmatprep.subr.bf16.mxu1 %v5357_v0 }
 0x5c9   :  { %4686 = vmatmul.mubr.bf16.vlgmr.msra.gmra.mrb[72].mxu1 %v3438_v4 }
 0x5ca   :  { %4741 = vmatprep.mubr.msk.f32.mxu1 %vm5356_vm2, %v5355_v57  ;;  %v4745_v57 = vpack.c.bf16 %v4099_v50, %v4098_v45 }
 0x5cc   :  { %4746 = vmatpush3.bf16.msra.mxu1 %v4745_v57 }
 0x5cd   :  { %4747 = vmatprep.subr.bf16.mxu1 %v5357_v0 }
 0x5d0   :  { %4749 = vmatpush3.bf16.msra.mxu1 %v4748_v58 }
 0x5d1   :  { %4750 = vmatprep.subr.bf16.mxu1 %v5357_v0 }
 0x5d4   :  { %4752 = vmatpush3.bf16.msra.mxu1 %v4751_v25 }
 0x5d5   :  { %4753 = vmatprep.subr.bf16.mxu1 %v5357_v0 }
 0x5d8   :  { %4755 = vmatpush3.bf16.msra.mxu1 %v4754_v60 }
 0x5d9   :  { %4756 = vmatprep.subr.bf16.mxu1 %v5357_v0 }
 0x5dc   :  { %4758 = vmatpush3.bf16.msra.mxu1 %v4757_v22 }
 0x5dd   :  { %4759 = vmatprep.subr.bf16.mxu1 %v5357_v0 }
 0x5e0   :  { %4761 = vmatpush3.bf16.msra.mxu1 %v4760_v2 }
 0x5e1   :  { %4762 = vmatprep.subr.bf16.mxu1 %v5357_v0 }
 0x5e4   :  { %4764 = vmatpush3.bf16.msra.mxu1 %v4763_v8 }
 0x5e5   :  { %4765 = vmatprep.subr.bf16.mxu1 %v5357_v0 }
 0x5e8   :  { %4767 = vmatpush3.bf16.msra.mxu1 %v4766_v32 }
 0x65a   :  { %v3645_v11 = vpop.f32.mrb[76].mxu0 }
 0x65b   :  { %v4627_v13 = vpop.f32.mrb[77].mxu0 }
 0x65c   :  { %v3557_v14 = vpop.f32.mrb[64].mxu1  ;;  %v3648_v24 = vpop.f32.mrb[78].mxu0 }
 0x65d   :  { %v4607_v26 = vpop.f32.mrb[65].mxu1  ;;  %v3646_v30 = vadd.f32 %v3645_v11, %v3557_v14  ;;  %v4628_v15 = vpop.f32.mrb[79].mxu0 }
 0x65e   :  { %v3560_v16 = vpop.f32.mrb[66].mxu1 }
 0x65f   :  { %v4608_v17 = vpop.f32.mrb[67].mxu1 }
 0x67a   :  { %v3859_v20 = vpop.f32.mrb[80].mxu0 }
 0x67b   :  { %v4667_v28 = vpop.f32.mrb[81].mxu0 }
 0x67c   :  { %v3750_v29 = vpop.f32.mrb[68].mxu1  ;;  %v3862_v31 = vpop.f32.mrb[82].mxu0 }
 0x67d   :  { %v3756_v33 = vadd.f32 %v3750_v29, %v3646_v30  ;;  %v4647_v49 = vpop.f32.mrb[69].mxu1  ;;  %v4668_v44 = vpop.f32.mrb[83].mxu0 }
 0x67e   :  { %v3753_v53 = vpop.f32.mrb[70].mxu1 }
 0x67f   :  { %v3865_v34 = vadd.f32 %v3859_v20, %v3756_v33  ;;  %v4648_v36 = vpop.f32.mrb[71].mxu1 }
 0x69c   :  { %v3965_v38 = vpop.f32.mrb[72].mxu1 }
 0x69d   :  { %v3971_v43 = vadd.f32 %v3965_v38, %v3865_v34  ;;  %v4687_v12 = vpop.f32.mrb[73].mxu1 }
 0x69e   :  { %v3968_v23 = vpop.f32.mrb[74].mxu1 }
 0x69f   :  { %v3979_v48 = vadd.f32 %v4473_v42, %v3971_v43  ;;  %v4688_v47 = vpop.f32.mrb[75].mxu1 }
 0x6a1   :  { %vm3980_vm3 = vcmp.gt.f32.partialorder %v3979_v48, 0.0  ;;  %v3981_v51 = vmul.f32 0.01, %v3979_v48 }
 0x6a3   :  { %v3982_v52 = vsel %vm3980_vm3, %v3979_v48, %v3981_v51 }
 0x6a4   :  { %v3983_v55 = vpack.c.bf16 %v3982_v52, %v3982_v52 }
 0x6a6   :  { %4706 = vmatmul.mubr.bf16.vlgmr.msra.gmra.mrb[84].mxu0 %v3983_v55 }
 0x779   :  { %v4089_v62 = vpop.f32.mrb[84].mxu0 }
 0x77a   :  { %v4090_v9 = vadd.f32 %v4474_v37, %v4089_v62  ;;  %v4707_v46 = vpop.f32.mrb[85].mxu0 }
 0x77b   :  { %v4092_v19 = vpop.f32.mrb[86].mxu0 }
 0x77c   :  { %vm4095_vm8 = vcmp.gt.f32.partialorder %v4090_v9, 0.0  ;;  %v4096_v4 = vmul.f32 0.01, %v4090_v9  ;;  %v4708_v5 = vpop.f32.mrb[87].mxu0 }
 0x77e   :  { %v4097_v10 = vsel %vm4095_vm8, %v4090_v9, %v4096_v4 }
 0x77f   :  { %4742 = vmatmul.mubr.f32.vlgmr.msra.gmra.mrb[76].mxu1 %v4097_v10 }
 0x852   :  { %v4187_v40 = vpop.f32.mrb[76].mxu1 }
 0x853   :  { %v4188_v45 = vadd.f32 %v4483_v39, %v4187_v40  ;;  %v4743_v50 = vpop.f32.mrb[77].mxu1 }
 0x855   :  { %4192 = vst.msk [vmem:[%s6835_s12] sm:$0xff] %vm4191_vm9, %v4188_v45 }
 0x856   :  { %4197 = vsyncpa [#allocation4], 1 }

</bundles_post_ra>
